<compile_context>
chip_gen: v7x
topology: tpu7x:2x2x1
jax: 0.10.0
libtpu: 0.0.40
codegen_flags: <defaults>
</compile_context>

<pallas_src>
import functools

import jax
import jax.numpy as jnp
from jax.experimental import pallas as pl
from jax.experimental.pallas import tpu as pltpu


# ----------------------------------------------------------------------------
# In-kernel helpers
# ----------------------------------------------------------------------------
def _cell(gates, c, H):
    """LSTM cell update; gate columns are ordered (i, f, o, g)."""
    sig = jax.nn.sigmoid(gates[:, : 3 * H])
    i = sig[:, 0:H]
    f = sig[:, H:2 * H]
    o = sig[:, 2 * H:3 * H]
    g = jnp.tanh(gates[:, 3 * H:])
    c_new = f * c + i * g
    h_new = o * jnp.tanh(c_new)
    return h_new, c_new


def _run_stack(gate_x_fn, whh0, wcats, bls, T, B, H, L):
    """Fully unrolled multi-layer LSTM recurrence.

    gate_x_fn(t) -> (B, 4H): precomputed layer-0 input gates (bias included).
    Layers >= 1 use fused concat([h_below, h_l]) @ W_cat.
    Returns the list of top-layer hidden states, one per timestep.
    """
    hs = [jnp.zeros((B, H), jnp.float32) for _ in range(L)]
    cs = [jnp.zeros((B, H), jnp.float32) for _ in range(L)]
    tops = []
    for t in range(T):
        g0 = gate_x_fn(t) + jnp.dot(hs[0], whh0,
                                    preferred_element_type=jnp.float32)
        hs[0], cs[0] = _cell(g0, cs[0], H)
        inp = hs[0]
        for l in range(1, L):
            xcat = jnp.concatenate([inp, hs[l]], axis=1)           # (B, 2H)
            gl = jnp.dot(xcat, wcats[l - 1],
                         preferred_element_type=jnp.float32) + bls[l - 1]
            hs[l], cs[l] = _cell(gl, cs[l], H)
            inp = hs[l]
        tops.append(inp)
    return tops


# ----------------------------------------------------------------------------
# Fused VAE kernel: encoder LSTM -> heads -> decoder LSTM -> output projection
# ----------------------------------------------------------------------------
def vae_kernel(L, H, T, B, x_ref, *refs):
    n_enc = 3 + 2 * (L - 1)          # wih0, whh0, b0, then (wcat, b) per layer
    n_dec = 1 + 2 * (L - 1)          # whh0, then (wcat, b) per layer

    idx = 0
    enc_lstm = refs[idx:idx + n_enc]; idx += n_enc
    w_mlp, b_mlp, w_mv, b_mv = refs[idx:idx + 4]; idx += 4
    w_din, b_din = refs[idx:idx + 2]; idx += 2
    dec_lstm = refs[idx:idx + n_dec]; idx += n_dec
    w_d2, b_d2 = refs[idx:idx + 2]; idx += 2
    out_ref, mean_ref, logvar_ref = refs[idx:]

    latent = mean_ref.shape[1]

    # Hoist all LSTM weight/bias loads out of the recurrences.
    e_wih0 = enc_lstm[0][...]
    e_whh0 = enc_lstm[1][...]
    e_b0 = enc_lstm[2][...]
    e_wcat = [enc_lstm[3 + 2 * (l - 1)][...] for l in range(1, L)]
    e_bl = [enc_lstm[4 + 2 * (l - 1)][...] for l in range(1, L)]
    d_whh0 = dec_lstm[0][...]
    d_wcat = [dec_lstm[1 + 2 * (l - 1)][...] for l in range(1, L)]
    d_bl = [dec_lstm[2 + 2 * (l - 1)][...] for l in range(1, L)]

    # ---------------- Encoder ----------------
    # One batched layer-0 input projection for all timesteps.
    x2d = x_ref[...]                                               # (T*B, F)
    gate_x = jnp.dot(x2d, e_wih0,
                     preferred_element_type=jnp.float32) + e_b0    # (T*B, 4H)

    tops = _run_stack(lambda t: gate_x[t * B:(t + 1) * B, :],
                      e_whh0, e_wcat, e_bl, T, B, H, L)

    acc = tops[0]
    for h in tops[1:]:
        acc = acc + h                                              # sum over time

    enc = jnp.dot(acc, w_mlp[...],
                  preferred_element_type=jnp.float32) + b_mlp[...]  # (B, latent)

    # Fused mean / log_var head: one (B, latent) @ (latent, 2*latent) matmul.
    mv = jnp.dot(enc, w_mv[...],
                 preferred_element_type=jnp.float32) + b_mv[...]
    mean_ref[...] = mv[:, :latent]
    logvar_ref[...] = mv[:, latent:]
    # TODO(synk): reparameterization_trick(mean, log_var) samples z, but z is
    # unused by the module's returned values, so sampling is omitted here.

    # ---------------- Decoder ----------------
    # unsqueeze(1).repeat(1,T,1) + mlp1 + layer-0 input projection is loop-
    # invariant; mlp1 and W_ih0 were folded at prep time -> one matmul total.
    gate_x0 = jnp.dot(enc, w_din[...],
                      preferred_element_type=jnp.float32) + b_din[...]  # (B, 4H)

    d_tops = _run_stack(lambda t: gate_x0,
                        d_whh0, d_wcat, d_bl, T, B, H, L)

    # One output projection + one lane-dense store.
    h_all = jnp.concatenate(d_tops, axis=0)                        # (T*B, H)
    out_ref[...] = jnp.dot(h_all, w_d2[...],
                           preferred_element_type=jnp.float32) + b_d2[...]


# ----------------------------------------------------------------------------
# Parameters (PyTorch layout / semantics) and kernel-layout preparation
# ----------------------------------------------------------------------------
def init_params(key, input_size, hidden, latent, num_layers):
    keys = iter(jax.random.split(key, 64))

    def unif(shape, k):
        return jax.random.uniform(next(keys), shape, jnp.float32, -k, k)

    kH = 1.0 / float(hidden) ** 0.5
    kL = 1.0 / float(latent) ** 0.5

    def lstm_stack(first_in):
        layers = []
        for l in range(num_layers):
            in_l = first_in if l == 0 else hidden
            layers.append((unif((4 * hidden, in_l), kH),    # w_ih
                           unif((4 * hidden, hidden), kH),  # w_hh
                           unif((4 * hidden,), kH),         # b_ih
                           unif((4 * hidden,), kH)))        # b_hh
        return layers

    return {
        "enc_lstm": lstm_stack(input_size),
        "enc_mlp": (unif((latent, hidden), kH), unif((latent,), kH)),
        "enc_mean": (unif((latent, latent), kL), unif((latent,), kL)),
        "enc_var": (unif((latent, latent), kL), unif((latent,), kL)),
        "dec_mlp1": (unif((hidden, latent), kL), unif((hidden,), kL)),
        "dec_lstm": lstm_stack(hidden),
        "dec_mlp2": (unif((input_size, hidden), kH), unif((input_size,), kH)),
    }


def prep_kernel_params(p, hidden):
    """Convert PyTorch-layout params into the kernel's fused/permuted layout."""
    H = hidden
    # Re-order gate columns (i, f, g, o) -> (i, f, o, g).
    perm = jnp.concatenate([jnp.arange(0, 2 * H),
                            jnp.arange(3 * H, 4 * H),
                            jnp.arange(2 * H, 3 * H)])

    def lin(wb):
        w, b = wb
        return [w.T, b[None, :]]

    # Encoder LSTM stack.
    enc_stack = []
    w_ih, w_hh, b_ih, b_hh = p["enc_lstm"][0]
    enc_stack.append(w_ih.T[:, perm])                        # (F, 4H)
    enc_stack.append(w_hh.T[:, perm])                        # (H, 4H)
    enc_stack.append((b_ih + b_hh)[perm][None, :])           # (1, 4H)
    for w_ih, w_hh, b_ih, b_hh in p["enc_lstm"][1:]:
        enc_stack.append(jnp.concatenate([w_ih.T, w_hh.T], axis=0)[:, perm])
        enc_stack.append((b_ih + b_hh)[perm][None, :])

    # Encoder head: fuse mean / log_var projections into one matmul.
    w_mean, b_mean = p["enc_mean"]
    w_var, b_var = p["enc_var"]
    w_mv = jnp.concatenate([w_mean.T, w_var.T], axis=1)      # (latent, 2*latent)
    b_mv = jnp.concatenate([b_mean, b_var])[None, :]         # (1, 2*latent)

    # Decoder: fold mlp1 + decoder layer-0 input projection (loop-invariant).
    #   gate_x0 = enc @ (W1.T @ Wih0.T)[:,perm] + ((b1 @ Wih0.T) + bih0 + bhh0)[perm]
    w1, b1 = p["dec_mlp1"]                                   # (H, latent), (H,)
    d_wih0, d_whh0, d_bih0, d_bhh0 = p["dec_lstm"][0]
    w_din = (w1.T @ d_wih0.T)[:, perm]                       # (latent, 4H)
    b_din = ((b1 @ d_wih0.T) + d_bih0 + d_bhh0)[perm][None, :]

    dec_stack = [d_whh0.T[:, perm]]                          # (H, 4H)
    for w_ih, w_hh, b_ih, b_hh in p["dec_lstm"][1:]:
        dec_stack.append(jnp.concatenate([w_ih.T, w_hh.T], axis=0)[:, perm])
        dec_stack.append((b_ih + b_hh)[perm][None, :])

    return (enc_stack
            + lin(p["enc_mlp"]) + [w_mv, b_mv]
            + [w_din, b_din]
            + dec_stack
            + lin(p["dec_mlp2"]))


# ----------------------------------------------------------------------------
# Wrapper: single fused pallas_call
# ----------------------------------------------------------------------------
@functools.partial(jax.jit, static_argnums=(2, 3))
def lstm_vae_forward(x, kparams, num_layers, hidden):
    B, T, F = x.shape
    n_enc = 3 + 2 * (num_layers - 1)
    latent = kparams[n_enc].shape[1]          # w_mlp: (H, latent)

    # batch_first (B,T,F) -> time-major, flattened (T*B, F)
    x_tm = jnp.transpose(x, (1, 0, 2)).reshape(T * B, F)

    vmem = pl.BlockSpec(memory_space=pltpu.MemorySpace.VMEM)
    inputs = [x_tm] + list(kparams)

    out2d, mean, log_var = pl.pallas_call(
        functools.partial(vae_kernel, num_layers, hidden, T, B),
        out_shape=(
            jax.ShapeDtypeStruct((T * B, F), jnp.float32),
            jax.ShapeDtypeStruct((B, latent), jnp.float32),
            jax.ShapeDtypeStruct((B, latent), jnp.float32),
        ),
        in_specs=[vmem] * len(inputs),
        out_specs=(vmem, vmem, vmem),
    )(*inputs)

    output = jnp.transpose(out2d.reshape(T, B, F), (1, 0, 2))   # back to (B,T,F)
    return output, mean, log_var


# ----------------------------------------------------------------------------
# Plain-JAX reference (mirrors PyTorch semantics) for a correctness check
# ----------------------------------------------------------------------------
def ref_forward(x, p, num_layers, hidden):
    H = hidden

    def run_lstm(x_btf, layers):                     # x: (B, T, in)
        B, T, _ = x_btf.shape
        hs = [jnp.zeros((B, H), jnp.float32) for _ in layers]
        cs = [jnp.zeros((B, H), jnp.float32) for _ in layers]
        outs = []
        for t in range(T):
            inp = x_btf[:, t, :]
            for l, (w_ih, w_hh, b_ih, b_hh) in enumerate(layers):
                gates = inp @ w_ih.T + hs[l] @ w_hh.T + b_ih + b_hh
                i = jax.nn.sigmoid(gates[:, :H])
                f = jax.nn.sigmoid(gates[:, H:2 * H])
                g = jnp.tanh(gates[:, 2 * H:3 * H])
                o = jax.nn.sigmoid(gates[:, 3 * H:])
                cs[l] = f * cs[l] + i * g
                hs[l] = o * jnp.tanh(cs[l])
                inp = hs[l]
            outs.append(inp)
        return jnp.stack(outs, axis=1)               # (B, T, H)

    h_all = run_lstm(x, p["enc_lstm"])
    acc = h_all.sum(axis=1)
    w, b = p["enc_mlp"]; enc = acc @ w.T + b
    wm, bm = p["enc_mean"]; mean = enc @ wm.T + bm
    wv, bv = p["enc_var"]; log_var = enc @ wv.T + bv

    w1, b1 = p["dec_mlp1"]; x0 = enc @ w1.T + b1
    T = x.shape[1]
    seq = jnp.broadcast_to(x0[:, None, :], (x0.shape[0], T, x0.shape[1]))
    dec_h = run_lstm(seq, p["dec_lstm"])
    w2, b2 = p["dec_mlp2"]
    out = dec_h @ w2.T + b2
    return out, mean, log_var


if __name__ == "__main__":
    B, T = 2, 8
    input_size, hidden, latent, num_layers = 16, 32, 16, 2

    key = jax.random.PRNGKey(0)
    kx, kp = jax.random.split(key)
    x = jax.random.normal(kx, (B, T, input_size), jnp.float32)

    params = init_params(kp, input_size, hidden, latent, num_layers)
    kparams = prep_kernel_params(params, hidden)

    out, mean, log_var = jax.block_until_ready(
        lstm_vae_forward(x, kparams, num_layers, hidden)
    )

    assert out.shape == (B, T, input_size)
    assert mean.shape == (B, latent) and log_var.shape == (B, latent)

    r_out, r_mean, r_lv = ref_forward(x, params, num_layers, hidden)
    assert jnp.allclose(out, r_out, atol=1e-4, rtol=1e-4)
    assert jnp.allclose(mean, r_mean, atol=1e-4, rtol=1e-4)
    assert jnp.allclose(log_var, r_lv, atol=1e-4, rtol=1e-4)

    print("KERNEL_OK")
</pallas_src>

<mosaic_0001>
module attributes {stable_mosaic.version = 11 : i64} {
  func.func @vae_kernel(%arg0: memref<16x16xf32, #tpu.memory_space<vmem>>, %arg1: memref<16x128xf32, #tpu.memory_space<vmem>>, %arg2: memref<32x128xf32, #tpu.memory_space<vmem>>, %arg3: memref<1x128xf32, #tpu.memory_space<vmem>>, %arg4: memref<64x128xf32, #tpu.memory_space<vmem>>, %arg5: memref<1x128xf32, #tpu.memory_space<vmem>>, %arg6: memref<32x16xf32, #tpu.memory_space<vmem>>, %arg7: memref<1x16xf32, #tpu.memory_space<vmem>>, %arg8: memref<16x32xf32, #tpu.memory_space<vmem>>, %arg9: memref<1x32xf32, #tpu.memory_space<vmem>>, %arg10: memref<16x128xf32, #tpu.memory_space<vmem>>, %arg11: memref<1x128xf32, #tpu.memory_space<vmem>>, %arg12: memref<32x128xf32, #tpu.memory_space<vmem>>, %arg13: memref<64x128xf32, #tpu.memory_space<vmem>>, %arg14: memref<1x128xf32, #tpu.memory_space<vmem>>, %arg15: memref<32x16xf32, #tpu.memory_space<vmem>>, %arg16: memref<1x16xf32, #tpu.memory_space<vmem>>, %arg17: memref<16x16xf32, #tpu.memory_space<vmem>>, %arg18: memref<2x16xf32, #tpu.memory_space<vmem>>, %arg19: memref<2x16xf32, #tpu.memory_space<vmem>>) attributes {dimension_semantics = [], scalar_prefetch = 0 : i64, scratch_operands = 0 : i64, tpu.core_type = #tpu.core_type<tc>} {
    %c0 = arith.constant 0 : index
    %c0_0 = arith.constant 0 : index
    %0 = vector.load %arg1[%c0, %c0_0] : memref<16x128xf32, #tpu.memory_space<vmem>>, vector<16x128xf32>
    %c0_1 = arith.constant 0 : index
    %c0_2 = arith.constant 0 : index
    %1 = vector.load %arg2[%c0_1, %c0_2] : memref<32x128xf32, #tpu.memory_space<vmem>>, vector<32x128xf32>
    %c0_3 = arith.constant 0 : index
    %c0_4 = arith.constant 0 : index
    %2 = vector.load %arg3[%c0_3, %c0_4] : memref<1x128xf32, #tpu.memory_space<vmem>>, vector<1x128xf32>
    %c0_5 = arith.constant 0 : index
    %c0_6 = arith.constant 0 : index
    %3 = vector.load %arg4[%c0_5, %c0_6] : memref<64x128xf32, #tpu.memory_space<vmem>>, vector<64x128xf32>
    %c0_7 = arith.constant 0 : index
    %c0_8 = arith.constant 0 : index
    %4 = vector.load %arg5[%c0_7, %c0_8] : memref<1x128xf32, #tpu.memory_space<vmem>>, vector<1x128xf32>
    %c0_9 = arith.constant 0 : index
    %c0_10 = arith.constant 0 : index
    %5 = vector.load %arg12[%c0_9, %c0_10] : memref<32x128xf32, #tpu.memory_space<vmem>>, vector<32x128xf32>
    %c0_11 = arith.constant 0 : index
    %c0_12 = arith.constant 0 : index
    %6 = vector.load %arg13[%c0_11, %c0_12] : memref<64x128xf32, #tpu.memory_space<vmem>>, vector<64x128xf32>
    %c0_13 = arith.constant 0 : index
    %c0_14 = arith.constant 0 : index
    %7 = vector.load %arg14[%c0_13, %c0_14] : memref<1x128xf32, #tpu.memory_space<vmem>>, vector<1x128xf32>
    %c0_15 = arith.constant 0 : index
    %c0_16 = arith.constant 0 : index
    %8 = vector.load %arg0[%c0_15, %c0_16] : memref<16x16xf32, #tpu.memory_space<vmem>>, vector<16x16xf32>
    %cst = arith.constant dense<0.000000e+00> : vector<16x128xf32>
    %9 = tpu.matmul %8, %0, %cst {dimension_numbers = #tpu.dot_dimension_numbers<[1], [0], [0], [1], [0, 0, 1, 1], [], []>} : vector<16x16xf32>, vector<16x128xf32>, vector<16x128xf32> -> vector<16x128xf32>
    %10 = vector.broadcast %2 : vector<1x128xf32> to vector<16x128xf32>
    %11 = arith.addf %9, %10 : vector<16x128xf32>
    %cst_17 = arith.constant 0.000000e+00 : f32
    %12 = vector.broadcast %cst_17 : f32 to vector<2x32xf32>
    %cst_18 = arith.constant 0.000000e+00 : f32
    %13 = vector.broadcast %cst_18 : f32 to vector<2x32xf32>
    %cst_19 = arith.constant 0.000000e+00 : f32
    %14 = vector.broadcast %cst_19 : f32 to vector<2x32xf32>
    %cst_20 = arith.constant 0.000000e+00 : f32
    %15 = vector.broadcast %cst_20 : f32 to vector<2x32xf32>
    %16 = vector.extract_strided_slice %11 {offsets = [0, 0], sizes = [2, 128], strides = [1, 1]} : vector<16x128xf32> to vector<2x128xf32>
    %cst_21 = arith.constant dense<0.000000e+00> : vector<2x128xf32>
    %17 = tpu.matmul %12, %1, %cst_21 {dimension_numbers = #tpu.dot_dimension_numbers<[1], [0], [0], [1], [0, 0, 1, 1], [], []>} : vector<2x32xf32>, vector<32x128xf32>, vector<2x128xf32> -> vector<2x128xf32>
    %18 = arith.addf %16, %17 : vector<2x128xf32>
    %19 = vector.extract_strided_slice %18 {offsets = [0, 0], sizes = [2, 96], strides = [1, 1]} : vector<2x128xf32> to vector<2x96xf32>
    %20 = arith.negf %19 : vector<2x96xf32>
    %21 = math.exp %20 : vector<2x96xf32>
    %cst_22 = arith.constant 1.000000e+00 : f32
    %22 = vector.broadcast %cst_22 : f32 to vector<2x96xf32>
    %23 = arith.addf %22, %21 : vector<2x96xf32>
    %24 = arith.divf %22, %23 : vector<2x96xf32>
    %25 = vector.extract_strided_slice %24 {offsets = [0, 0], sizes = [2, 32], strides = [1, 1]} : vector<2x96xf32> to vector<2x32xf32>
    %26 = vector.extract_strided_slice %24 {offsets = [0, 32], sizes = [2, 32], strides = [1, 1]} : vector<2x96xf32> to vector<2x32xf32>
    %27 = vector.extract_strided_slice %24 {offsets = [0, 64], sizes = [2, 32], strides = [1, 1]} : vector<2x96xf32> to vector<2x32xf32>
    %28 = vector.extract_strided_slice %18 {offsets = [0, 96], sizes = [2, 32], strides = [1, 1]} : vector<2x128xf32> to vector<2x32xf32>
    %29 = math.tanh %28 : vector<2x32xf32>
    %30 = arith.mulf %26, %14 : vector<2x32xf32>
    %31 = arith.mulf %25, %29 : vector<2x32xf32>
    %32 = arith.addf %30, %31 : vector<2x32xf32>
    %33 = math.tanh %32 : vector<2x32xf32>
    %34 = arith.mulf %27, %33 : vector<2x32xf32>
    %35 = tpu.concatenate %34, %13 in 1 : vector<2x32xf32>, vector<2x32xf32> -> vector<2x64xf32>
    %cst_23 = arith.constant dense<0.000000e+00> : vector<2x128xf32>
    %36 = tpu.matmul %35, %3, %cst_23 {dimension_numbers = #tpu.dot_dimension_numbers<[1], [0], [0], [1], [0, 0, 1, 1], [], []>} : vector<2x64xf32>, vector<64x128xf32>, vector<2x128xf32> -> vector<2x128xf32>
    %37 = vector.broadcast %4 : vector<1x128xf32> to vector<2x128xf32>
    %38 = arith.addf %36, %37 : vector<2x128xf32>
    %39 = vector.extract_strided_slice %38 {offsets = [0, 0], sizes = [2, 96], strides = [1, 1]} : vector<2x128xf32> to vector<2x96xf32>
    %40 = arith.negf %39 : vector<2x96xf32>
    %41 = math.exp %40 : vector<2x96xf32>
    %cst_24 = arith.constant 1.000000e+00 : f32
    %42 = vector.broadcast %cst_24 : f32 to vector<2x96xf32>
    %43 = arith.addf %42, %41 : vector<2x96xf32>
    %44 = arith.divf %42, %43 : vector<2x96xf32>
    %45 = vector.extract_strided_slice %44 {offsets = [0, 0], sizes = [2, 32], strides = [1, 1]} : vector<2x96xf32> to vector<2x32xf32>
    %46 = vector.extract_strided_slice %44 {offsets = [0, 32], sizes = [2, 32], strides = [1, 1]} : vector<2x96xf32> to vector<2x32xf32>
    %47 = vector.extract_strided_slice %44 {offsets = [0, 64], sizes = [2, 32], strides = [1, 1]} : vector<2x96xf32> to vector<2x32xf32>
    %48 = vector.extract_strided_slice %38 {offsets = [0, 96], sizes = [2, 32], strides = [1, 1]} : vector<2x128xf32> to vector<2x32xf32>
    %49 = math.tanh %48 : vector<2x32xf32>
    %50 = arith.mulf %46, %15 : vector<2x32xf32>
    %51 = arith.mulf %45, %49 : vector<2x32xf32>
    %52 = arith.addf %50, %51 : vector<2x32xf32>
    %53 = math.tanh %52 : vector<2x32xf32>
    %54 = arith.mulf %47, %53 : vector<2x32xf32>
    %55 = vector.extract_strided_slice %11 {offsets = [2, 0], sizes = [2, 128], strides = [1, 1]} : vector<16x128xf32> to vector<2x128xf32>
    %cst_25 = arith.constant dense<0.000000e+00> : vector<2x128xf32>
    %56 = tpu.matmul %34, %1, %cst_25 {dimension_numbers = #tpu.dot_dimension_numbers<[1], [0], [0], [1], [0, 0, 1, 1], [], []>} : vector<2x32xf32>, vector<32x128xf32>, vector<2x128xf32> -> vector<2x128xf32>
    %57 = arith.addf %55, %56 : vector<2x128xf32>
    %58 = vector.extract_strided_slice %57 {offsets = [0, 0], sizes = [2, 96], strides = [1, 1]} : vector<2x128xf32> to vector<2x96xf32>
    %59 = arith.negf %58 : vector<2x96xf32>
    %60 = math.exp %59 : vector<2x96xf32>
    %cst_26 = arith.constant 1.000000e+00 : f32
    %61 = vector.broadcast %cst_26 : f32 to vector<2x96xf32>
    %62 = arith.addf %61, %60 : vector<2x96xf32>
    %63 = arith.divf %61, %62 : vector<2x96xf32>
    %64 = vector.extract_strided_slice %63 {offsets = [0, 0], sizes = [2, 32], strides = [1, 1]} : vector<2x96xf32> to vector<2x32xf32>
    %65 = vector.extract_strided_slice %63 {offsets = [0, 32], sizes = [2, 32], strides = [1, 1]} : vector<2x96xf32> to vector<2x32xf32>
    %66 = vector.extract_strided_slice %63 {offsets = [0, 64], sizes = [2, 32], strides = [1, 1]} : vector<2x96xf32> to vector<2x32xf32>
    %67 = vector.extract_strided_slice %57 {offsets = [0, 96], sizes = [2, 32], strides = [1, 1]} : vector<2x128xf32> to vector<2x32xf32>
    %68 = math.tanh %67 : vector<2x32xf32>
    %69 = arith.mulf %65, %32 : vector<2x32xf32>
    %70 = arith.mulf %64, %68 : vector<2x32xf32>
    %71 = arith.addf %69, %70 : vector<2x32xf32>
    %72 = math.tanh %71 : vector<2x32xf32>
    %73 = arith.mulf %66, %72 : vector<2x32xf32>
    %74 = tpu.concatenate %73, %54 in 1 : vector<2x32xf32>, vector<2x32xf32> -> vector<2x64xf32>
    %cst_27 = arith.constant dense<0.000000e+00> : vector<2x128xf32>
    %75 = tpu.matmul %74, %3, %cst_27 {dimension_numbers = #tpu.dot_dimension_numbers<[1], [0], [0], [1], [0, 0, 1, 1], [], []>} : vector<2x64xf32>, vector<64x128xf32>, vector<2x128xf32> -> vector<2x128xf32>
    %76 = vector.broadcast %4 : vector<1x128xf32> to vector<2x128xf32>
    %77 = arith.addf %75, %76 : vector<2x128xf32>
    %78 = vector.extract_strided_slice %77 {offsets = [0, 0], sizes = [2, 96], strides = [1, 1]} : vector<2x128xf32> to vector<2x96xf32>
    %79 = arith.negf %78 : vector<2x96xf32>
    %80 = math.exp %79 : vector<2x96xf32>
    %cst_28 = arith.constant 1.000000e+00 : f32
    %81 = vector.broadcast %cst_28 : f32 to vector<2x96xf32>
    %82 = arith.addf %81, %80 : vector<2x96xf32>
    %83 = arith.divf %81, %82 : vector<2x96xf32>
    %84 = vector.extract_strided_slice %83 {offsets = [0, 0], sizes = [2, 32], strides = [1, 1]} : vector<2x96xf32> to vector<2x32xf32>
    %85 = vector.extract_strided_slice %83 {offsets = [0, 32], sizes = [2, 32], strides = [1, 1]} : vector<2x96xf32> to vector<2x32xf32>
    %86 = vector.extract_strided_slice %83 {offsets = [0, 64], sizes = [2, 32], strides = [1, 1]} : vector<2x96xf32> to vector<2x32xf32>
    %87 = vector.extract_strided_slice %77 {offsets = [0, 96], sizes = [2, 32], strides = [1, 1]} : vector<2x128xf32> to vector<2x32xf32>
    %88 = math.tanh %87 : vector<2x32xf32>
    %89 = arith.mulf %85, %52 : vector<2x32xf32>
    %90 = arith.mulf %84, %88 : vector<2x32xf32>
    %91 = arith.addf %89, %90 : vector<2x32xf32>
    %92 = math.tanh %91 : vector<2x32xf32>
    %93 = arith.mulf %86, %92 : vector<2x32xf32>
    %94 = vector.extract_strided_slice %11 {offsets = [4, 0], sizes = [2, 128], strides = [1, 1]} : vector<16x128xf32> to vector<2x128xf32>
    %cst_29 = arith.constant dense<0.000000e+00> : vector<2x128xf32>
    %95 = tpu.matmul %73, %1, %cst_29 {dimension_numbers = #tpu.dot_dimension_numbers<[1], [0], [0], [1], [0, 0, 1, 1], [], []>} : vector<2x32xf32>, vector<32x128xf32>, vector<2x128xf32> -> vector<2x128xf32>
    %96 = arith.addf %94, %95 : vector<2x128xf32>
    %97 = vector.extract_strided_slice %96 {offsets = [0, 0], sizes = [2, 96], strides = [1, 1]} : vector<2x128xf32> to vector<2x96xf32>
    %98 = arith.negf %97 : vector<2x96xf32>
    %99 = math.exp %98 : vector<2x96xf32>
    %cst_30 = arith.constant 1.000000e+00 : f32
    %100 = vector.broadcast %cst_30 : f32 to vector<2x96xf32>
    %101 = arith.addf %100, %99 : vector<2x96xf32>
    %102 = arith.divf %100, %101 : vector<2x96xf32>
    %103 = vector.extract_strided_slice %102 {offsets = [0, 0], sizes = [2, 32], strides = [1, 1]} : vector<2x96xf32> to vector<2x32xf32>
    %104 = vector.extract_strided_slice %102 {offsets = [0, 32], sizes = [2, 32], strides = [1, 1]} : vector<2x96xf32> to vector<2x32xf32>
    %105 = vector.extract_strided_slice %102 {offsets = [0, 64], sizes = [2, 32], strides = [1, 1]} : vector<2x96xf32> to vector<2x32xf32>
    %106 = vector.extract_strided_slice %96 {offsets = [0, 96], sizes = [2, 32], strides = [1, 1]} : vector<2x128xf32> to vector<2x32xf32>
    %107 = math.tanh %106 : vector<2x32xf32>
    %108 = arith.mulf %104, %71 : vector<2x32xf32>
    %109 = arith.mulf %103, %107 : vector<2x32xf32>
    %110 = arith.addf %108, %109 : vector<2x32xf32>
    %111 = math.tanh %110 : vector<2x32xf32>
    %112 = arith.mulf %105, %111 : vector<2x32xf32>
    %113 = tpu.concatenate %112, %93 in 1 : vector<2x32xf32>, vector<2x32xf32> -> vector<2x64xf32>
    %cst_31 = arith.constant dense<0.000000e+00> : vector<2x128xf32>
    %114 = tpu.matmul %113, %3, %cst_31 {dimension_numbers = #tpu.dot_dimension_numbers<[1], [0], [0], [1], [0, 0, 1, 1], [], []>} : vector<2x64xf32>, vector<64x128xf32>, vector<2x128xf32> -> vector<2x128xf32>
    %115 = vector.broadcast %4 : vector<1x128xf32> to vector<2x128xf32>
    %116 = arith.addf %114, %115 : vector<2x128xf32>
    %117 = vector.extract_strided_slice %116 {offsets = [0, 0], sizes = [2, 96], strides = [1, 1]} : vector<2x128xf32> to vector<2x96xf32>
    %118 = arith.negf %117 : vector<2x96xf32>
    %119 = math.exp %118 : vector<2x96xf32>
    %cst_32 = arith.constant 1.000000e+00 : f32
    %120 = vector.broadcast %cst_32 : f32 to vector<2x96xf32>
    %121 = arith.addf %120, %119 : vector<2x96xf32>
    %122 = arith.divf %120, %121 : vector<2x96xf32>
    %123 = vector.extract_strided_slice %122 {offsets = [0, 0], sizes = [2, 32], strides = [1, 1]} : vector<2x96xf32> to vector<2x32xf32>
    %124 = vector.extract_strided_slice %122 {offsets = [0, 32], sizes = [2, 32], strides = [1, 1]} : vector<2x96xf32> to vector<2x32xf32>
    %125 = vector.extract_strided_slice %122 {offsets = [0, 64], sizes = [2, 32], strides = [1, 1]} : vector<2x96xf32> to vector<2x32xf32>
    %126 = vector.extract_strided_slice %116 {offsets = [0, 96], sizes = [2, 32], strides = [1, 1]} : vector<2x128xf32> to vector<2x32xf32>
    %127 = math.tanh %126 : vector<2x32xf32>
    %128 = arith.mulf %124, %91 : vector<2x32xf32>
    %129 = arith.mulf %123, %127 : vector<2x32xf32>
    %130 = arith.addf %128, %129 : vector<2x32xf32>
    %131 = math.tanh %130 : vector<2x32xf32>
    %132 = arith.mulf %125, %131 : vector<2x32xf32>
    %133 = vector.extract_strided_slice %11 {offsets = [6, 0], sizes = [2, 128], strides = [1, 1]} : vector<16x128xf32> to vector<2x128xf32>
    %cst_33 = arith.constant dense<0.000000e+00> : vector<2x128xf32>
    %134 = tpu.matmul %112, %1, %cst_33 {dimension_numbers = #tpu.dot_dimension_numbers<[1], [0], [0], [1], [0, 0, 1, 1], [], []>} : vector<2x32xf32>, vector<32x128xf32>, vector<2x128xf32> -> vector<2x128xf32>
    %135 = arith.addf %133, %134 : vector<2x128xf32>
    %136 = vector.extract_strided_slice %135 {offsets = [0, 0], sizes = [2, 96], strides = [1, 1]} : vector<2x128xf32> to vector<2x96xf32>
    %137 = arith.negf %136 : vector<2x96xf32>
    %138 = math.exp %137 : vector<2x96xf32>
    %cst_34 = arith.constant 1.000000e+00 : f32
    %139 = vector.broadcast %cst_34 : f32 to vector<2x96xf32>
    %140 = arith.addf %139, %138 : vector<2x96xf32>
    %141 = arith.divf %139, %140 : vector<2x96xf32>
    %142 = vector.extract_strided_slice %141 {offsets = [0, 0], sizes = [2, 32], strides = [1, 1]} : vector<2x96xf32> to vector<2x32xf32>
    %143 = vector.extract_strided_slice %141 {offsets = [0, 32], sizes = [2, 32], strides = [1, 1]} : vector<2x96xf32> to vector<2x32xf32>
    %144 = vector.extract_strided_slice %141 {offsets = [0, 64], sizes = [2, 32], strides = [1, 1]} : vector<2x96xf32> to vector<2x32xf32>
    %145 = vector.extract_strided_slice %135 {offsets = [0, 96], sizes = [2, 32], strides = [1, 1]} : vector<2x128xf32> to vector<2x32xf32>
    %146 = math.tanh %145 : vector<2x32xf32>
    %147 = arith.mulf %143, %110 : vector<2x32xf32>
    %148 = arith.mulf %142, %146 : vector<2x32xf32>
    %149 = arith.addf %147, %148 : vector<2x32xf32>
    %150 = math.tanh %149 : vector<2x32xf32>
    %151 = arith.mulf %144, %150 : vector<2x32xf32>
    %152 = tpu.concatenate %151, %132 in 1 : vector<2x32xf32>, vector<2x32xf32> -> vector<2x64xf32>
    %cst_35 = arith.constant dense<0.000000e+00> : vector<2x128xf32>
    %153 = tpu.matmul %152, %3, %cst_35 {dimension_numbers = #tpu.dot_dimension_numbers<[1], [0], [0], [1], [0, 0, 1, 1], [], []>} : vector<2x64xf32>, vector<64x128xf32>, vector<2x128xf32> -> vector<2x128xf32>
    %154 = vector.broadcast %4 : vector<1x128xf32> to vector<2x128xf32>
    %155 = arith.addf %153, %154 : vector<2x128xf32>
    %156 = vector.extract_strided_slice %155 {offsets = [0, 0], sizes = [2, 96], strides = [1, 1]} : vector<2x128xf32> to vector<2x96xf32>
    %157 = arith.negf %156 : vector<2x96xf32>
    %158 = math.exp %157 : vector<2x96xf32>
    %cst_36 = arith.constant 1.000000e+00 : f32
    %159 = vector.broadcast %cst_36 : f32 to vector<2x96xf32>
    %160 = arith.addf %159, %158 : vector<2x96xf32>
    %161 = arith.divf %159, %160 : vector<2x96xf32>
    %162 = vector.extract_strided_slice %161 {offsets = [0, 0], sizes = [2, 32], strides = [1, 1]} : vector<2x96xf32> to vector<2x32xf32>
    %163 = vector.extract_strided_slice %161 {offsets = [0, 32], sizes = [2, 32], strides = [1, 1]} : vector<2x96xf32> to vector<2x32xf32>
    %164 = vector.extract_strided_slice %161 {offsets = [0, 64], sizes = [2, 32], strides = [1, 1]} : vector<2x96xf32> to vector<2x32xf32>
    %165 = vector.extract_strided_slice %155 {offsets = [0, 96], sizes = [2, 32], strides = [1, 1]} : vector<2x128xf32> to vector<2x32xf32>
    %166 = math.tanh %165 : vector<2x32xf32>
    %167 = arith.mulf %163, %130 : vector<2x32xf32>
    %168 = arith.mulf %162, %166 : vector<2x32xf32>
    %169 = arith.addf %167, %168 : vector<2x32xf32>
    %170 = math.tanh %169 : vector<2x32xf32>
    %171 = arith.mulf %164, %170 : vector<2x32xf32>
    %172 = vector.extract_strided_slice %11 {offsets = [8, 0], sizes = [2, 128], strides = [1, 1]} : vector<16x128xf32> to vector<2x128xf32>
    %cst_37 = arith.constant dense<0.000000e+00> : vector<2x128xf32>
    %173 = tpu.matmul %151, %1, %cst_37 {dimension_numbers = #tpu.dot_dimension_numbers<[1], [0], [0], [1], [0, 0, 1, 1], [], []>} : vector<2x32xf32>, vector<32x128xf32>, vector<2x128xf32> -> vector<2x128xf32>
    %174 = arith.addf %172, %173 : vector<2x128xf32>
    %175 = vector.extract_strided_slice %174 {offsets = [0, 0], sizes = [2, 96], strides = [1, 1]} : vector<2x128xf32> to vector<2x96xf32>
    %176 = arith.negf %175 : vector<2x96xf32>
    %177 = math.exp %176 : vector<2x96xf32>
    %cst_38 = arith.constant 1.000000e+00 : f32
    %178 = vector.broadcast %cst_38 : f32 to vector<2x96xf32>
    %179 = arith.addf %178, %177 : vector<2x96xf32>
    %180 = arith.divf %178, %179 : vector<2x96xf32>
    %181 = vector.extract_strided_slice %180 {offsets = [0, 0], sizes = [2, 32], strides = [1, 1]} : vector<2x96xf32> to vector<2x32xf32>
    %182 = vector.extract_strided_slice %180 {offsets = [0, 32], sizes = [2, 32], strides = [1, 1]} : vector<2x96xf32> to vector<2x32xf32>
    %183 = vector.extract_strided_slice %180 {offsets = [0, 64], sizes = [2, 32], strides = [1, 1]} : vector<2x96xf32> to vector<2x32xf32>
    %184 = vector.extract_strided_slice %174 {offsets = [0, 96], sizes = [2, 32], strides = [1, 1]} : vector<2x128xf32> to vector<2x32xf32>
    %185 = math.tanh %184 : vector<2x32xf32>
    %186 = arith.mulf %182, %149 : vector<2x32xf32>
    %187 = arith.mulf %181, %185 : vector<2x32xf32>
    %188 = arith.addf %186, %187 : vector<2x32xf32>
    %189 = math.tanh %188 : vector<2x32xf32>
    %190 = arith.mulf %183, %189 : vector<2x32xf32>
    %191 = tpu.concatenate %190, %171 in 1 : vector<2x32xf32>, vector<2x32xf32> -> vector<2x64xf32>
    %cst_39 = arith.constant dense<0.000000e+00> : vector<2x128xf32>
    %192 = tpu.matmul %191, %3, %cst_39 {dimension_numbers = #tpu.dot_dimension_numbers<[1], [0], [0], [1], [0, 0, 1, 1], [], []>} : vector<2x64xf32>, vector<64x128xf32>, vector<2x128xf32> -> vector<2x128xf32>
    %193 = vector.broadcast %4 : vector<1x128xf32> to vector<2x128xf32>
    %194 = arith.addf %192, %193 : vector<2x128xf32>
    %195 = vector.extract_strided_slice %194 {offsets = [0, 0], sizes = [2, 96], strides = [1, 1]} : vector<2x128xf32> to vector<2x96xf32>
    %196 = arith.negf %195 : vector<2x96xf32>
    %197 = math.exp %196 : vector<2x96xf32>
    %cst_40 = arith.constant 1.000000e+00 : f32
    %198 = vector.broadcast %cst_40 : f32 to vector<2x96xf32>
    %199 = arith.addf %198, %197 : vector<2x96xf32>
    %200 = arith.divf %198, %199 : vector<2x96xf32>
    %201 = vector.extract_strided_slice %200 {offsets = [0, 0], sizes = [2, 32], strides = [1, 1]} : vector<2x96xf32> to vector<2x32xf32>
    %202 = vector.extract_strided_slice %200 {offsets = [0, 32], sizes = [2, 32], strides = [1, 1]} : vector<2x96xf32> to vector<2x32xf32>
    %203 = vector.extract_strided_slice %200 {offsets = [0, 64], sizes = [2, 32], strides = [1, 1]} : vector<2x96xf32> to vector<2x32xf32>
    %204 = vector.extract_strided_slice %194 {offsets = [0, 96], sizes = [2, 32], strides = [1, 1]} : vector<2x128xf32> to vector<2x32xf32>
    %205 = math.tanh %204 : vector<2x32xf32>
    %206 = arith.mulf %202, %169 : vector<2x32xf32>
    %207 = arith.mulf %201, %205 : vector<2x32xf32>
    %208 = arith.addf %206, %207 : vector<2x32xf32>
    %209 = math.tanh %208 : vector<2x32xf32>
    %210 = arith.mulf %203, %209 : vector<2x32xf32>
    %211 = vector.extract_strided_slice %11 {offsets = [10, 0], sizes = [2, 128], strides = [1, 1]} : vector<16x128xf32> to vector<2x128xf32>
    %cst_41 = arith.constant dense<0.000000e+00> : vector<2x128xf32>
    %212 = tpu.matmul %190, %1, %cst_41 {dimension_numbers = #tpu.dot_dimension_numbers<[1], [0], [0], [1], [0, 0, 1, 1], [], []>} : vector<2x32xf32>, vector<32x128xf32>, vector<2x128xf32> -> vector<2x128xf32>
    %213 = arith.addf %211, %212 : vector<2x128xf32>
    %214 = vector.extract_strided_slice %213 {offsets = [0, 0], sizes = [2, 96], strides = [1, 1]} : vector<2x128xf32> to vector<2x96xf32>
    %215 = arith.negf %214 : vector<2x96xf32>
    %216 = math.exp %215 : vector<2x96xf32>
    %cst_42 = arith.constant 1.000000e+00 : f32
    %217 = vector.broadcast %cst_42 : f32 to vector<2x96xf32>
    %218 = arith.addf %217, %216 : vector<2x96xf32>
    %219 = arith.divf %217, %218 : vector<2x96xf32>
    %220 = vector.extract_strided_slice %219 {offsets = [0, 0], sizes = [2, 32], strides = [1, 1]} : vector<2x96xf32> to vector<2x32xf32>
    %221 = vector.extract_strided_slice %219 {offsets = [0, 32], sizes = [2, 32], strides = [1, 1]} : vector<2x96xf32> to vector<2x32xf32>
    %222 = vector.extract_strided_slice %219 {offsets = [0, 64], sizes = [2, 32], strides = [1, 1]} : vector<2x96xf32> to vector<2x32xf32>
    %223 = vector.extract_strided_slice %213 {offsets = [0, 96], sizes = [2, 32], strides = [1, 1]} : vector<2x128xf32> to vector<2x32xf32>
    %224 = math.tanh %223 : vector<2x32xf32>
    %225 = arith.mulf %221, %188 : vector<2x32xf32>
    %226 = arith.mulf %220, %224 : vector<2x32xf32>
    %227 = arith.addf %225, %226 : vector<2x32xf32>
    %228 = math.tanh %227 : vector<2x32xf32>
    %229 = arith.mulf %222, %228 : vector<2x32xf32>
    %230 = tpu.concatenate %229, %210 in 1 : vector<2x32xf32>, vector<2x32xf32> -> vector<2x64xf32>
    %cst_43 = arith.constant dense<0.000000e+00> : vector<2x128xf32>
    %231 = tpu.matmul %230, %3, %cst_43 {dimension_numbers = #tpu.dot_dimension_numbers<[1], [0], [0], [1], [0, 0, 1, 1], [], []>} : vector<2x64xf32>, vector<64x128xf32>, vector<2x128xf32> -> vector<2x128xf32>
    %232 = vector.broadcast %4 : vector<1x128xf32> to vector<2x128xf32>
    %233 = arith.addf %231, %232 : vector<2x128xf32>
    %234 = vector.extract_strided_slice %233 {offsets = [0, 0], sizes = [2, 96], strides = [1, 1]} : vector<2x128xf32> to vector<2x96xf32>
    %235 = arith.negf %234 : vector<2x96xf32>
    %236 = math.exp %235 : vector<2x96xf32>
    %cst_44 = arith.constant 1.000000e+00 : f32
    %237 = vector.broadcast %cst_44 : f32 to vector<2x96xf32>
    %238 = arith.addf %237, %236 : vector<2x96xf32>
    %239 = arith.divf %237, %238 : vector<2x96xf32>
    %240 = vector.extract_strided_slice %239 {offsets = [0, 0], sizes = [2, 32], strides = [1, 1]} : vector<2x96xf32> to vector<2x32xf32>
    %241 = vector.extract_strided_slice %239 {offsets = [0, 32], sizes = [2, 32], strides = [1, 1]} : vector<2x96xf32> to vector<2x32xf32>
    %242 = vector.extract_strided_slice %239 {offsets = [0, 64], sizes = [2, 32], strides = [1, 1]} : vector<2x96xf32> to vector<2x32xf32>
    %243 = vector.extract_strided_slice %233 {offsets = [0, 96], sizes = [2, 32], strides = [1, 1]} : vector<2x128xf32> to vector<2x32xf32>
    %244 = math.tanh %243 : vector<2x32xf32>
    %245 = arith.mulf %241, %208 : vector<2x32xf32>
    %246 = arith.mulf %240, %244 : vector<2x32xf32>
    %247 = arith.addf %245, %246 : vector<2x32xf32>
    %248 = math.tanh %247 : vector<2x32xf32>
    %249 = arith.mulf %242, %248 : vector<2x32xf32>
    %250 = vector.extract_strided_slice %11 {offsets = [12, 0], sizes = [2, 128], strides = [1, 1]} : vector<16x128xf32> to vector<2x128xf32>
    %cst_45 = arith.constant dense<0.000000e+00> : vector<2x128xf32>
    %251 = tpu.matmul %229, %1, %cst_45 {dimension_numbers = #tpu.dot_dimension_numbers<[1], [0], [0], [1], [0, 0, 1, 1], [], []>} : vector<2x32xf32>, vector<32x128xf32>, vector<2x128xf32> -> vector<2x128xf32>
    %252 = arith.addf %250, %251 : vector<2x128xf32>
    %253 = vector.extract_strided_slice %252 {offsets = [0, 0], sizes = [2, 96], strides = [1, 1]} : vector<2x128xf32> to vector<2x96xf32>
    %254 = arith.negf %253 : vector<2x96xf32>
    %255 = math.exp %254 : vector<2x96xf32>
    %cst_46 = arith.constant 1.000000e+00 : f32
    %256 = vector.broadcast %cst_46 : f32 to vector<2x96xf32>
    %257 = arith.addf %256, %255 : vector<2x96xf32>
    %258 = arith.divf %256, %257 : vector<2x96xf32>
    %259 = vector.extract_strided_slice %258 {offsets = [0, 0], sizes = [2, 32], strides = [1, 1]} : vector<2x96xf32> to vector<2x32xf32>
    %260 = vector.extract_strided_slice %258 {offsets = [0, 32], sizes = [2, 32], strides = [1, 1]} : vector<2x96xf32> to vector<2x32xf32>
    %261 = vector.extract_strided_slice %258 {offsets = [0, 64], sizes = [2, 32], strides = [1, 1]} : vector<2x96xf32> to vector<2x32xf32>
    %262 = vector.extract_strided_slice %252 {offsets = [0, 96], sizes = [2, 32], strides = [1, 1]} : vector<2x128xf32> to vector<2x32xf32>
    %263 = math.tanh %262 : vector<2x32xf32>
    %264 = arith.mulf %260, %227 : vector<2x32xf32>
    %265 = arith.mulf %259, %263 : vector<2x32xf32>
    %266 = arith.addf %264, %265 : vector<2x32xf32>
    %267 = math.tanh %266 : vector<2x32xf32>
    %268 = arith.mulf %261, %267 : vector<2x32xf32>
    %269 = tpu.concatenate %268, %249 in 1 : vector<2x32xf32>, vector<2x32xf32> -> vector<2x64xf32>
    %cst_47 = arith.constant dense<0.000000e+00> : vector<2x128xf32>
    %270 = tpu.matmul %269, %3, %cst_47 {dimension_numbers = #tpu.dot_dimension_numbers<[1], [0], [0], [1], [0, 0, 1, 1], [], []>} : vector<2x64xf32>, vector<64x128xf32>, vector<2x128xf32> -> vector<2x128xf32>
    %271 = vector.broadcast %4 : vector<1x128xf32> to vector<2x128xf32>
    %272 = arith.addf %270, %271 : vector<2x128xf32>
    %273 = vector.extract_strided_slice %272 {offsets = [0, 0], sizes = [2, 96], strides = [1, 1]} : vector<2x128xf32> to vector<2x96xf32>
    %274 = arith.negf %273 : vector<2x96xf32>
    %275 = math.exp %274 : vector<2x96xf32>
    %cst_48 = arith.constant 1.000000e+00 : f32
    %276 = vector.broadcast %cst_48 : f32 to vector<2x96xf32>
    %277 = arith.addf %276, %275 : vector<2x96xf32>
    %278 = arith.divf %276, %277 : vector<2x96xf32>
    %279 = vector.extract_strided_slice %278 {offsets = [0, 0], sizes = [2, 32], strides = [1, 1]} : vector<2x96xf32> to vector<2x32xf32>
    %280 = vector.extract_strided_slice %278 {offsets = [0, 32], sizes = [2, 32], strides = [1, 1]} : vector<2x96xf32> to vector<2x32xf32>
    %281 = vector.extract_strided_slice %278 {offsets = [0, 64], sizes = [2, 32], strides = [1, 1]} : vector<2x96xf32> to vector<2x32xf32>
    %282 = vector.extract_strided_slice %272 {offsets = [0, 96], sizes = [2, 32], strides = [1, 1]} : vector<2x128xf32> to vector<2x32xf32>
    %283 = math.tanh %282 : vector<2x32xf32>
    %284 = arith.mulf %280, %247 : vector<2x32xf32>
    %285 = arith.mulf %279, %283 : vector<2x32xf32>
    %286 = arith.addf %284, %285 : vector<2x32xf32>
    %287 = math.tanh %286 : vector<2x32xf32>
    %288 = arith.mulf %281, %287 : vector<2x32xf32>
    %289 = vector.extract_strided_slice %11 {offsets = [14, 0], sizes = [2, 128], strides = [1, 1]} : vector<16x128xf32> to vector<2x128xf32>
    %cst_49 = arith.constant dense<0.000000e+00> : vector<2x128xf32>
    %290 = tpu.matmul %268, %1, %cst_49 {dimension_numbers = #tpu.dot_dimension_numbers<[1], [0], [0], [1], [0, 0, 1, 1], [], []>} : vector<2x32xf32>, vector<32x128xf32>, vector<2x128xf32> -> vector<2x128xf32>
    %291 = arith.addf %289, %290 : vector<2x128xf32>
    %292 = vector.extract_strided_slice %291 {offsets = [0, 0], sizes = [2, 96], strides = [1, 1]} : vector<2x128xf32> to vector<2x96xf32>
    %293 = arith.negf %292 : vector<2x96xf32>
    %294 = math.exp %293 : vector<2x96xf32>
    %cst_50 = arith.constant 1.000000e+00 : f32
    %295 = vector.broadcast %cst_50 : f32 to vector<2x96xf32>
    %296 = arith.addf %295, %294 : vector<2x96xf32>
    %297 = arith.divf %295, %296 : vector<2x96xf32>
    %298 = vector.extract_strided_slice %297 {offsets = [0, 0], sizes = [2, 32], strides = [1, 1]} : vector<2x96xf32> to vector<2x32xf32>
    %299 = vector.extract_strided_slice %297 {offsets = [0, 32], sizes = [2, 32], strides = [1, 1]} : vector<2x96xf32> to vector<2x32xf32>
    %300 = vector.extract_strided_slice %297 {offsets = [0, 64], sizes = [2, 32], strides = [1, 1]} : vector<2x96xf32> to vector<2x32xf32>
    %301 = vector.extract_strided_slice %291 {offsets = [0, 96], sizes = [2, 32], strides = [1, 1]} : vector<2x128xf32> to vector<2x32xf32>
    %302 = math.tanh %301 : vector<2x32xf32>
    %303 = arith.mulf %299, %266 : vector<2x32xf32>
    %304 = arith.mulf %298, %302 : vector<2x32xf32>
    %305 = arith.addf %303, %304 : vector<2x32xf32>
    %306 = math.tanh %305 : vector<2x32xf32>
    %307 = arith.mulf %300, %306 : vector<2x32xf32>
    %308 = tpu.concatenate %307, %288 in 1 : vector<2x32xf32>, vector<2x32xf32> -> vector<2x64xf32>
    %cst_51 = arith.constant dense<0.000000e+00> : vector<2x128xf32>
    %309 = tpu.matmul %308, %3, %cst_51 {dimension_numbers = #tpu.dot_dimension_numbers<[1], [0], [0], [1], [0, 0, 1, 1], [], []>} : vector<2x64xf32>, vector<64x128xf32>, vector<2x128xf32> -> vector<2x128xf32>
    %310 = vector.broadcast %4 : vector<1x128xf32> to vector<2x128xf32>
    %311 = arith.addf %309, %310 : vector<2x128xf32>
    %312 = vector.extract_strided_slice %311 {offsets = [0, 0], sizes = [2, 96], strides = [1, 1]} : vector<2x128xf32> to vector<2x96xf32>
    %313 = arith.negf %312 : vector<2x96xf32>
    %314 = math.exp %313 : vector<2x96xf32>
    %cst_52 = arith.constant 1.000000e+00 : f32
    %315 = vector.broadcast %cst_52 : f32 to vector<2x96xf32>
    %316 = arith.addf %315, %314 : vector<2x96xf32>
    %317 = arith.divf %315, %316 : vector<2x96xf32>
    %318 = vector.extract_strided_slice %317 {offsets = [0, 0], sizes = [2, 32], strides = [1, 1]} : vector<2x96xf32> to vector<2x32xf32>
    %319 = vector.extract_strided_slice %317 {offsets = [0, 32], sizes = [2, 32], strides = [1, 1]} : vector<2x96xf32> to vector<2x32xf32>
    %320 = vector.extract_strided_slice %317 {offsets = [0, 64], sizes = [2, 32], strides = [1, 1]} : vector<2x96xf32> to vector<2x32xf32>
    %321 = vector.extract_strided_slice %311 {offsets = [0, 96], sizes = [2, 32], strides = [1, 1]} : vector<2x128xf32> to vector<2x32xf32>
    %322 = math.tanh %321 : vector<2x32xf32>
    %323 = arith.mulf %319, %286 : vector<2x32xf32>
    %324 = arith.mulf %318, %322 : vector<2x32xf32>
    %325 = arith.addf %323, %324 : vector<2x32xf32>
    %326 = math.tanh %325 : vector<2x32xf32>
    %327 = arith.mulf %320, %326 : vector<2x32xf32>
    %328 = arith.addf %54, %93 : vector<2x32xf32>
    %329 = arith.addf %328, %132 : vector<2x32xf32>
    %330 = arith.addf %329, %171 : vector<2x32xf32>
    %331 = arith.addf %330, %210 : vector<2x32xf32>
    %332 = arith.addf %331, %249 : vector<2x32xf32>
    %333 = arith.addf %332, %288 : vector<2x32xf32>
    %334 = arith.addf %333, %327 : vector<2x32xf32>
    %c0_53 = arith.constant 0 : index
    %c0_54 = arith.constant 0 : index
    %335 = vector.load %arg6[%c0_53, %c0_54] : memref<32x16xf32, #tpu.memory_space<vmem>>, vector<32x16xf32>
    %cst_55 = arith.constant dense<0.000000e+00> : vector<2x16xf32>
    %336 = tpu.matmul %334, %335, %cst_55 {dimension_numbers = #tpu.dot_dimension_numbers<[1], [0], [0], [1], [0, 0, 1, 1], [], []>} : vector<2x32xf32>, vector<32x16xf32>, vector<2x16xf32> -> vector<2x16xf32>
    %c0_56 = arith.constant 0 : index
    %c0_57 = arith.constant 0 : index
    %337 = vector.load %arg7[%c0_56, %c0_57] : memref<1x16xf32, #tpu.memory_space<vmem>>, vector<1x16xf32>
    %338 = vector.broadcast %337 : vector<1x16xf32> to vector<2x16xf32>
    %339 = arith.addf %336, %338 : vector<2x16xf32>
    %c0_58 = arith.constant 0 : index
    %c0_59 = arith.constant 0 : index
    %340 = vector.load %arg8[%c0_58, %c0_59] : memref<16x32xf32, #tpu.memory_space<vmem>>, vector<16x32xf32>
    %cst_60 = arith.constant dense<0.000000e+00> : vector<2x32xf32>
    %341 = tpu.matmul %339, %340, %cst_60 {dimension_numbers = #tpu.dot_dimension_numbers<[1], [0], [0], [1], [0, 0, 1, 1], [], []>} : vector<2x16xf32>, vector<16x32xf32>, vector<2x32xf32> -> vector<2x32xf32>
    %c0_61 = arith.constant 0 : index
    %c0_62 = arith.constant 0 : index
    %342 = vector.load %arg9[%c0_61, %c0_62] : memref<1x32xf32, #tpu.memory_space<vmem>>, vector<1x32xf32>
    %343 = vector.broadcast %342 : vector<1x32xf32> to vector<2x32xf32>
    %344 = arith.addf %341, %343 : vector<2x32xf32>
    %345 = vector.extract_strided_slice %344 {offsets = [0, 0], sizes = [2, 16], strides = [1, 1]} : vector<2x32xf32> to vector<2x16xf32>
    %c0_63 = arith.constant 0 : index
    %c0_64 = arith.constant 0 : index
    %346 = vector.load %arg18[%c0_63, %c0_64] : memref<2x16xf32, #tpu.memory_space<vmem>>, vector<2x16xf32>
    tpu.vector_store %arg18[%c0_63, %c0_64], %345 {strides = array<i32>} : memref<2x16xf32, #tpu.memory_space<vmem>>, vector<2x16xf32>,
    %347 = vector.extract_strided_slice %344 {offsets = [0, 16], sizes = [2, 16], strides = [1, 1]} : vector<2x32xf32> to vector<2x16xf32>
    %c0_65 = arith.constant 0 : index
    %c0_66 = arith.constant 0 : index
    %348 = vector.load %arg19[%c0_65, %c0_66] : memref<2x16xf32, #tpu.memory_space<vmem>>, vector<2x16xf32>
    tpu.vector_store %arg19[%c0_65, %c0_66], %347 {strides = array<i32>} : memref<2x16xf32, #tpu.memory_space<vmem>>, vector<2x16xf32>,
    %c0_67 = arith.constant 0 : index
    %c0_68 = arith.constant 0 : index
    %349 = vector.load %arg10[%c0_67, %c0_68] : memref<16x128xf32, #tpu.memory_space<vmem>>, vector<16x128xf32>
    %cst_69 = arith.constant dense<0.000000e+00> : vector<2x128xf32>
    %350 = tpu.matmul %339, %349, %cst_69 {dimension_numbers = #tpu.dot_dimension_numbers<[1], [0], [0], [1], [0, 0, 1, 1], [], []>} : vector<2x16xf32>, vector<16x128xf32>, vector<2x128xf32> -> vector<2x128xf32>
    %c0_70 = arith.constant 0 : index
    %c0_71 = arith.constant 0 : index
    %351 = vector.load %arg11[%c0_70, %c0_71] : memref<1x128xf32, #tpu.memory_space<vmem>>, vector<1x128xf32>
    %352 = vector.broadcast %351 : vector<1x128xf32> to vector<2x128xf32>
    %353 = arith.addf %350, %352 : vector<2x128xf32>
    %cst_72 = arith.constant 0.000000e+00 : f32
    %354 = vector.broadcast %cst_72 : f32 to vector<2x32xf32>
    %cst_73 = arith.constant 0.000000e+00 : f32
    %355 = vector.broadcast %cst_73 : f32 to vector<2x32xf32>
    %cst_74 = arith.constant 0.000000e+00 : f32
    %356 = vector.broadcast %cst_74 : f32 to vector<2x32xf32>
    %cst_75 = arith.constant 0.000000e+00 : f32
    %357 = vector.broadcast %cst_75 : f32 to vector<2x32xf32>
    %cst_76 = arith.constant dense<0.000000e+00> : vector<2x128xf32>
    %358 = tpu.matmul %354, %5, %cst_76 {dimension_numbers = #tpu.dot_dimension_numbers<[1], [0], [0], [1], [0, 0, 1, 1], [], []>} : vector<2x32xf32>, vector<32x128xf32>, vector<2x128xf32> -> vector<2x128xf32>
    %359 = arith.addf %353, %358 : vector<2x128xf32>
    %360 = vector.extract_strided_slice %359 {offsets = [0, 0], sizes = [2, 96], strides = [1, 1]} : vector<2x128xf32> to vector<2x96xf32>
    %361 = arith.negf %360 : vector<2x96xf32>
    %362 = math.exp %361 : vector<2x96xf32>
    %cst_77 = arith.constant 1.000000e+00 : f32
    %363 = vector.broadcast %cst_77 : f32 to vector<2x96xf32>
    %364 = arith.addf %363, %362 : vector<2x96xf32>
    %365 = arith.divf %363, %364 : vector<2x96xf32>
    %366 = vector.extract_strided_slice %365 {offsets = [0, 0], sizes = [2, 32], strides = [1, 1]} : vector<2x96xf32> to vector<2x32xf32>
    %367 = vector.extract_strided_slice %365 {offsets = [0, 32], sizes = [2, 32], strides = [1, 1]} : vector<2x96xf32> to vector<2x32xf32>
    %368 = vector.extract_strided_slice %365 {offsets = [0, 64], sizes = [2, 32], strides = [1, 1]} : vector<2x96xf32> to vector<2x32xf32>
    %369 = vector.extract_strided_slice %359 {offsets = [0, 96], sizes = [2, 32], strides = [1, 1]} : vector<2x128xf32> to vector<2x32xf32>
    %370 = math.tanh %369 : vector<2x32xf32>
    %371 = arith.mulf %367, %356 : vector<2x32xf32>
    %372 = arith.mulf %366, %370 : vector<2x32xf32>
    %373 = arith.addf %371, %372 : vector<2x32xf32>
    %374 = math.tanh %373 : vector<2x32xf32>
    %375 = arith.mulf %368, %374 : vector<2x32xf32>
    %376 = tpu.concatenate %375, %355 in 1 : vector<2x32xf32>, vector<2x32xf32> -> vector<2x64xf32>
    %cst_78 = arith.constant dense<0.000000e+00> : vector<2x128xf32>
    %377 = tpu.matmul %376, %6, %cst_78 {dimension_numbers = #tpu.dot_dimension_numbers<[1], [0], [0], [1], [0, 0, 1, 1], [], []>} : vector<2x64xf32>, vector<64x128xf32>, vector<2x128xf32> -> vector<2x128xf32>
    %378 = vector.broadcast %7 : vector<1x128xf32> to vector<2x128xf32>
    %379 = arith.addf %377, %378 : vector<2x128xf32>
    %380 = vector.extract_strided_slice %379 {offsets = [0, 0], sizes = [2, 96], strides = [1, 1]} : vector<2x128xf32> to vector<2x96xf32>
    %381 = arith.negf %380 : vector<2x96xf32>
    %382 = math.exp %381 : vector<2x96xf32>
    %cst_79 = arith.constant 1.000000e+00 : f32
    %383 = vector.broadcast %cst_79 : f32 to vector<2x96xf32>
    %384 = arith.addf %383, %382 : vector<2x96xf32>
    %385 = arith.divf %383, %384 : vector<2x96xf32>
    %386 = vector.extract_strided_slice %385 {offsets = [0, 0], sizes = [2, 32], strides = [1, 1]} : vector<2x96xf32> to vector<2x32xf32>
    %387 = vector.extract_strided_slice %385 {offsets = [0, 32], sizes = [2, 32], strides = [1, 1]} : vector<2x96xf32> to vector<2x32xf32>
    %388 = vector.extract_strided_slice %385 {offsets = [0, 64], sizes = [2, 32], strides = [1, 1]} : vector<2x96xf32> to vector<2x32xf32>
    %389 = vector.extract_strided_slice %379 {offsets = [0, 96], sizes = [2, 32], strides = [1, 1]} : vector<2x128xf32> to vector<2x32xf32>
    %390 = math.tanh %389 : vector<2x32xf32>
    %391 = arith.mulf %387, %357 : vector<2x32xf32>
    %392 = arith.mulf %386, %390 : vector<2x32xf32>
    %393 = arith.addf %391, %392 : vector<2x32xf32>
    %394 = math.tanh %393 : vector<2x32xf32>
    %395 = arith.mulf %388, %394 : vector<2x32xf32>
    %cst_80 = arith.constant dense<0.000000e+00> : vector<2x128xf32>
    %396 = tpu.matmul %375, %5, %cst_80 {dimension_numbers = #tpu.dot_dimension_numbers<[1], [0], [0], [1], [0, 0, 1, 1], [], []>} : vector<2x32xf32>, vector<32x128xf32>, vector<2x128xf32> -> vector<2x128xf32>
    %397 = arith.addf %353, %396 : vector<2x128xf32>
    %398 = vector.extract_strided_slice %397 {offsets = [0, 0], sizes = [2, 96], strides = [1, 1]} : vector<2x128xf32> to vector<2x96xf32>
    %399 = arith.negf %398 : vector<2x96xf32>
    %400 = math.exp %399 : vector<2x96xf32>
    %cst_81 = arith.constant 1.000000e+00 : f32
    %401 = vector.broadcast %cst_81 : f32 to vector<2x96xf32>
    %402 = arith.addf %401, %400 : vector<2x96xf32>
    %403 = arith.divf %401, %402 : vector<2x96xf32>
    %404 = vector.extract_strided_slice %403 {offsets = [0, 0], sizes = [2, 32], strides = [1, 1]} : vector<2x96xf32> to vector<2x32xf32>
    %405 = vector.extract_strided_slice %403 {offsets = [0, 32], sizes = [2, 32], strides = [1, 1]} : vector<2x96xf32> to vector<2x32xf32>
    %406 = vector.extract_strided_slice %403 {offsets = [0, 64], sizes = [2, 32], strides = [1, 1]} : vector<2x96xf32> to vector<2x32xf32>
    %407 = vector.extract_strided_slice %397 {offsets = [0, 96], sizes = [2, 32], strides = [1, 1]} : vector<2x128xf32> to vector<2x32xf32>
    %408 = math.tanh %407 : vector<2x32xf32>
    %409 = arith.mulf %405, %373 : vector<2x32xf32>
    %410 = arith.mulf %404, %408 : vector<2x32xf32>
    %411 = arith.addf %409, %410 : vector<2x32xf32>
    %412 = math.tanh %411 : vector<2x32xf32>
    %413 = arith.mulf %406, %412 : vector<2x32xf32>
    %414 = tpu.concatenate %413, %395 in 1 : vector<2x32xf32>, vector<2x32xf32> -> vector<2x64xf32>
    %cst_82 = arith.constant dense<0.000000e+00> : vector<2x128xf32>
    %415 = tpu.matmul %414, %6, %cst_82 {dimension_numbers = #tpu.dot_dimension_numbers<[1], [0], [0], [1], [0, 0, 1, 1], [], []>} : vector<2x64xf32>, vector<64x128xf32>, vector<2x128xf32> -> vector<2x128xf32>
    %416 = vector.broadcast %7 : vector<1x128xf32> to vector<2x128xf32>
    %417 = arith.addf %415, %416 : vector<2x128xf32>
    %418 = vector.extract_strided_slice %417 {offsets = [0, 0], sizes = [2, 96], strides = [1, 1]} : vector<2x128xf32> to vector<2x96xf32>
    %419 = arith.negf %418 : vector<2x96xf32>
    %420 = math.exp %419 : vector<2x96xf32>
    %cst_83 = arith.constant 1.000000e+00 : f32
    %421 = vector.broadcast %cst_83 : f32 to vector<2x96xf32>
    %422 = arith.addf %421, %420 : vector<2x96xf32>
    %423 = arith.divf %421, %422 : vector<2x96xf32>
    %424 = vector.extract_strided_slice %423 {offsets = [0, 0], sizes = [2, 32], strides = [1, 1]} : vector<2x96xf32> to vector<2x32xf32>
    %425 = vector.extract_strided_slice %423 {offsets = [0, 32], sizes = [2, 32], strides = [1, 1]} : vector<2x96xf32> to vector<2x32xf32>
    %426 = vector.extract_strided_slice %423 {offsets = [0, 64], sizes = [2, 32], strides = [1, 1]} : vector<2x96xf32> to vector<2x32xf32>
    %427 = vector.extract_strided_slice %417 {offsets = [0, 96], sizes = [2, 32], strides = [1, 1]} : vector<2x128xf32> to vector<2x32xf32>
    %428 = math.tanh %427 : vector<2x32xf32>
    %429 = arith.mulf %425, %393 : vector<2x32xf32>
    %430 = arith.mulf %424, %428 : vector<2x32xf32>
    %431 = arith.addf %429, %430 : vector<2x32xf32>
    %432 = math.tanh %431 : vector<2x32xf32>
    %433 = arith.mulf %426, %432 : vector<2x32xf32>
    %cst_84 = arith.constant dense<0.000000e+00> : vector<2x128xf32>
    %434 = tpu.matmul %413, %5, %cst_84 {dimension_numbers = #tpu.dot_dimension_numbers<[1], [0], [0], [1], [0, 0, 1, 1], [], []>} : vector<2x32xf32>, vector<32x128xf32>, vector<2x128xf32> -> vector<2x128xf32>
    %435 = arith.addf %353, %434 : vector<2x128xf32>
    %436 = vector.extract_strided_slice %435 {offsets = [0, 0], sizes = [2, 96], strides = [1, 1]} : vector<2x128xf32> to vector<2x96xf32>
    %437 = arith.negf %436 : vector<2x96xf32>
    %438 = math.exp %437 : vector<2x96xf32>
    %cst_85 = arith.constant 1.000000e+00 : f32
    %439 = vector.broadcast %cst_85 : f32 to vector<2x96xf32>
    %440 = arith.addf %439, %438 : vector<2x96xf32>
    %441 = arith.divf %439, %440 : vector<2x96xf32>
    %442 = vector.extract_strided_slice %441 {offsets = [0, 0], sizes = [2, 32], strides = [1, 1]} : vector<2x96xf32> to vector<2x32xf32>
    %443 = vector.extract_strided_slice %441 {offsets = [0, 32], sizes = [2, 32], strides = [1, 1]} : vector<2x96xf32> to vector<2x32xf32>
    %444 = vector.extract_strided_slice %441 {offsets = [0, 64], sizes = [2, 32], strides = [1, 1]} : vector<2x96xf32> to vector<2x32xf32>
    %445 = vector.extract_strided_slice %435 {offsets = [0, 96], sizes = [2, 32], strides = [1, 1]} : vector<2x128xf32> to vector<2x32xf32>
    %446 = math.tanh %445 : vector<2x32xf32>
    %447 = arith.mulf %443, %411 : vector<2x32xf32>
    %448 = arith.mulf %442, %446 : vector<2x32xf32>
    %449 = arith.addf %447, %448 : vector<2x32xf32>
    %450 = math.tanh %449 : vector<2x32xf32>
    %451 = arith.mulf %444, %450 : vector<2x32xf32>
    %452 = tpu.concatenate %451, %433 in 1 : vector<2x32xf32>, vector<2x32xf32> -> vector<2x64xf32>
    %cst_86 = arith.constant dense<0.000000e+00> : vector<2x128xf32>
    %453 = tpu.matmul %452, %6, %cst_86 {dimension_numbers = #tpu.dot_dimension_numbers<[1], [0], [0], [1], [0, 0, 1, 1], [], []>} : vector<2x64xf32>, vector<64x128xf32>, vector<2x128xf32> -> vector<2x128xf32>
    %454 = vector.broadcast %7 : vector<1x128xf32> to vector<2x128xf32>
    %455 = arith.addf %453, %454 : vector<2x128xf32>
    %456 = vector.extract_strided_slice %455 {offsets = [0, 0], sizes = [2, 96], strides = [1, 1]} : vector<2x128xf32> to vector<2x96xf32>
    %457 = arith.negf %456 : vector<2x96xf32>
    %458 = math.exp %457 : vector<2x96xf32>
    %cst_87 = arith.constant 1.000000e+00 : f32
    %459 = vector.broadcast %cst_87 : f32 to vector<2x96xf32>
    %460 = arith.addf %459, %458 : vector<2x96xf32>
    %461 = arith.divf %459, %460 : vector<2x96xf32>
    %462 = vector.extract_strided_slice %461 {offsets = [0, 0], sizes = [2, 32], strides = [1, 1]} : vector<2x96xf32> to vector<2x32xf32>
    %463 = vector.extract_strided_slice %461 {offsets = [0, 32], sizes = [2, 32], strides = [1, 1]} : vector<2x96xf32> to vector<2x32xf32>
    %464 = vector.extract_strided_slice %461 {offsets = [0, 64], sizes = [2, 32], strides = [1, 1]} : vector<2x96xf32> to vector<2x32xf32>
    %465 = vector.extract_strided_slice %455 {offsets = [0, 96], sizes = [2, 32], strides = [1, 1]} : vector<2x128xf32> to vector<2x32xf32>
    %466 = math.tanh %465 : vector<2x32xf32>
    %467 = arith.mulf %463, %431 : vector<2x32xf32>
    %468 = arith.mulf %462, %466 : vector<2x32xf32>
    %469 = arith.addf %467, %468 : vector<2x32xf32>
    %470 = math.tanh %469 : vector<2x32xf32>
    %471 = arith.mulf %464, %470 : vector<2x32xf32>
    %cst_88 = arith.constant dense<0.000000e+00> : vector<2x128xf32>
    %472 = tpu.matmul %451, %5, %cst_88 {dimension_numbers = #tpu.dot_dimension_numbers<[1], [0], [0], [1], [0, 0, 1, 1], [], []>} : vector<2x32xf32>, vector<32x128xf32>, vector<2x128xf32> -> vector<2x128xf32>
    %473 = arith.addf %353, %472 : vector<2x128xf32>
    %474 = vector.extract_strided_slice %473 {offsets = [0, 0], sizes = [2, 96], strides = [1, 1]} : vector<2x128xf32> to vector<2x96xf32>
    %475 = arith.negf %474 : vector<2x96xf32>
    %476 = math.exp %475 : vector<2x96xf32>
    %cst_89 = arith.constant 1.000000e+00 : f32
    %477 = vector.broadcast %cst_89 : f32 to vector<2x96xf32>
    %478 = arith.addf %477, %476 : vector<2x96xf32>
    %479 = arith.divf %477, %478 : vector<2x96xf32>
    %480 = vector.extract_strided_slice %479 {offsets = [0, 0], sizes = [2, 32], strides = [1, 1]} : vector<2x96xf32> to vector<2x32xf32>
    %481 = vector.extract_strided_slice %479 {offsets = [0, 32], sizes = [2, 32], strides = [1, 1]} : vector<2x96xf32> to vector<2x32xf32>
    %482 = vector.extract_strided_slice %479 {offsets = [0, 64], sizes = [2, 32], strides = [1, 1]} : vector<2x96xf32> to vector<2x32xf32>
    %483 = vector.extract_strided_slice %473 {offsets = [0, 96], sizes = [2, 32], strides = [1, 1]} : vector<2x128xf32> to vector<2x32xf32>
    %484 = math.tanh %483 : vector<2x32xf32>
    %485 = arith.mulf %481, %449 : vector<2x32xf32>
    %486 = arith.mulf %480, %484 : vector<2x32xf32>
    %487 = arith.addf %485, %486 : vector<2x32xf32>
    %488 = math.tanh %487 : vector<2x32xf32>
    %489 = arith.mulf %482, %488 : vector<2x32xf32>
    %490 = tpu.concatenate %489, %471 in 1 : vector<2x32xf32>, vector<2x32xf32> -> vector<2x64xf32>
    %cst_90 = arith.constant dense<0.000000e+00> : vector<2x128xf32>
    %491 = tpu.matmul %490, %6, %cst_90 {dimension_numbers = #tpu.dot_dimension_numbers<[1], [0], [0], [1], [0, 0, 1, 1], [], []>} : vector<2x64xf32>, vector<64x128xf32>, vector<2x128xf32> -> vector<2x128xf32>
    %492 = vector.broadcast %7 : vector<1x128xf32> to vector<2x128xf32>
    %493 = arith.addf %491, %492 : vector<2x128xf32>
    %494 = vector.extract_strided_slice %493 {offsets = [0, 0], sizes = [2, 96], strides = [1, 1]} : vector<2x128xf32> to vector<2x96xf32>
    %495 = arith.negf %494 : vector<2x96xf32>
    %496 = math.exp %495 : vector<2x96xf32>
    %cst_91 = arith.constant 1.000000e+00 : f32
    %497 = vector.broadcast %cst_91 : f32 to vector<2x96xf32>
    %498 = arith.addf %497, %496 : vector<2x96xf32>
    %499 = arith.divf %497, %498 : vector<2x96xf32>
    %500 = vector.extract_strided_slice %499 {offsets = [0, 0], sizes = [2, 32], strides = [1, 1]} : vector<2x96xf32> to vector<2x32xf32>
    %501 = vector.extract_strided_slice %499 {offsets = [0, 32], sizes = [2, 32], strides = [1, 1]} : vector<2x96xf32> to vector<2x32xf32>
    %502 = vector.extract_strided_slice %499 {offsets = [0, 64], sizes = [2, 32], strides = [1, 1]} : vector<2x96xf32> to vector<2x32xf32>
    %503 = vector.extract_strided_slice %493 {offsets = [0, 96], sizes = [2, 32], strides = [1, 1]} : vector<2x128xf32> to vector<2x32xf32>
    %504 = math.tanh %503 : vector<2x32xf32>
    %505 = arith.mulf %501, %469 : vector<2x32xf32>
    %506 = arith.mulf %500, %504 : vector<2x32xf32>
    %507 = arith.addf %505, %506 : vector<2x32xf32>
    %508 = math.tanh %507 : vector<2x32xf32>
    %509 = arith.mulf %502, %508 : vector<2x32xf32>
    %cst_92 = arith.constant dense<0.000000e+00> : vector<2x128xf32>
    %510 = tpu.matmul %489, %5, %cst_92 {dimension_numbers = #tpu.dot_dimension_numbers<[1], [0], [0], [1], [0, 0, 1, 1], [], []>} : vector<2x32xf32>, vector<32x128xf32>, vector<2x128xf32> -> vector<2x128xf32>
    %511 = arith.addf %353, %510 : vector<2x128xf32>
    %512 = vector.extract_strided_slice %511 {offsets = [0, 0], sizes = [2, 96], strides = [1, 1]} : vector<2x128xf32> to vector<2x96xf32>
    %513 = arith.negf %512 : vector<2x96xf32>
    %514 = math.exp %513 : vector<2x96xf32>
    %cst_93 = arith.constant 1.000000e+00 : f32
    %515 = vector.broadcast %cst_93 : f32 to vector<2x96xf32>
    %516 = arith.addf %515, %514 : vector<2x96xf32>
    %517 = arith.divf %515, %516 : vector<2x96xf32>
    %518 = vector.extract_strided_slice %517 {offsets = [0, 0], sizes = [2, 32], strides = [1, 1]} : vector<2x96xf32> to vector<2x32xf32>
    %519 = vector.extract_strided_slice %517 {offsets = [0, 32], sizes = [2, 32], strides = [1, 1]} : vector<2x96xf32> to vector<2x32xf32>
    %520 = vector.extract_strided_slice %517 {offsets = [0, 64], sizes = [2, 32], strides = [1, 1]} : vector<2x96xf32> to vector<2x32xf32>
    %521 = vector.extract_strided_slice %511 {offsets = [0, 96], sizes = [2, 32], strides = [1, 1]} : vector<2x128xf32> to vector<2x32xf32>
    %522 = math.tanh %521 : vector<2x32xf32>
    %523 = arith.mulf %519, %487 : vector<2x32xf32>
    %524 = arith.mulf %518, %522 : vector<2x32xf32>
    %525 = arith.addf %523, %524 : vector<2x32xf32>
    %526 = math.tanh %525 : vector<2x32xf32>
    %527 = arith.mulf %520, %526 : vector<2x32xf32>
    %528 = tpu.concatenate %527, %509 in 1 : vector<2x32xf32>, vector<2x32xf32> -> vector<2x64xf32>
    %cst_94 = arith.constant dense<0.000000e+00> : vector<2x128xf32>
    %529 = tpu.matmul %528, %6, %cst_94 {dimension_numbers = #tpu.dot_dimension_numbers<[1], [0], [0], [1], [0, 0, 1, 1], [], []>} : vector<2x64xf32>, vector<64x128xf32>, vector<2x128xf32> -> vector<2x128xf32>
    %530 = vector.broadcast %7 : vector<1x128xf32> to vector<2x128xf32>
    %531 = arith.addf %529, %530 : vector<2x128xf32>
    %532 = vector.extract_strided_slice %531 {offsets = [0, 0], sizes = [2, 96], strides = [1, 1]} : vector<2x128xf32> to vector<2x96xf32>
    %533 = arith.negf %532 : vector<2x96xf32>
    %534 = math.exp %533 : vector<2x96xf32>
    %cst_95 = arith.constant 1.000000e+00 : f32
    %535 = vector.broadcast %cst_95 : f32 to vector<2x96xf32>
    %536 = arith.addf %535, %534 : vector<2x96xf32>
    %537 = arith.divf %535, %536 : vector<2x96xf32>
    %538 = vector.extract_strided_slice %537 {offsets = [0, 0], sizes = [2, 32], strides = [1, 1]} : vector<2x96xf32> to vector<2x32xf32>
    %539 = vector.extract_strided_slice %537 {offsets = [0, 32], sizes = [2, 32], strides = [1, 1]} : vector<2x96xf32> to vector<2x32xf32>
    %540 = vector.extract_strided_slice %537 {offsets = [0, 64], sizes = [2, 32], strides = [1, 1]} : vector<2x96xf32> to vector<2x32xf32>
    %541 = vector.extract_strided_slice %531 {offsets = [0, 96], sizes = [2, 32], strides = [1, 1]} : vector<2x128xf32> to vector<2x32xf32>
    %542 = math.tanh %541 : vector<2x32xf32>
    %543 = arith.mulf %539, %507 : vector<2x32xf32>
    %544 = arith.mulf %538, %542 : vector<2x32xf32>
    %545 = arith.addf %543, %544 : vector<2x32xf32>
    %546 = math.tanh %545 : vector<2x32xf32>
    %547 = arith.mulf %540, %546 : vector<2x32xf32>
    %cst_96 = arith.constant dense<0.000000e+00> : vector<2x128xf32>
    %548 = tpu.matmul %527, %5, %cst_96 {dimension_numbers = #tpu.dot_dimension_numbers<[1], [0], [0], [1], [0, 0, 1, 1], [], []>} : vector<2x32xf32>, vector<32x128xf32>, vector<2x128xf32> -> vector<2x128xf32>
    %549 = arith.addf %353, %548 : vector<2x128xf32>
    %550 = vector.extract_strided_slice %549 {offsets = [0, 0], sizes = [2, 96], strides = [1, 1]} : vector<2x128xf32> to vector<2x96xf32>
    %551 = arith.negf %550 : vector<2x96xf32>
    %552 = math.exp %551 : vector<2x96xf32>
    %cst_97 = arith.constant 1.000000e+00 : f32
    %553 = vector.broadcast %cst_97 : f32 to vector<2x96xf32>
    %554 = arith.addf %553, %552 : vector<2x96xf32>
    %555 = arith.divf %553, %554 : vector<2x96xf32>
    %556 = vector.extract_strided_slice %555 {offsets = [0, 0], sizes = [2, 32], strides = [1, 1]} : vector<2x96xf32> to vector<2x32xf32>
    %557 = vector.extract_strided_slice %555 {offsets = [0, 32], sizes = [2, 32], strides = [1, 1]} : vector<2x96xf32> to vector<2x32xf32>
    %558 = vector.extract_strided_slice %555 {offsets = [0, 64], sizes = [2, 32], strides = [1, 1]} : vector<2x96xf32> to vector<2x32xf32>
    %559 = vector.extract_strided_slice %549 {offsets = [0, 96], sizes = [2, 32], strides = [1, 1]} : vector<2x128xf32> to vector<2x32xf32>
    %560 = math.tanh %559 : vector<2x32xf32>
    %561 = arith.mulf %557, %525 : vector<2x32xf32>
    %562 = arith.mulf %556, %560 : vector<2x32xf32>
    %563 = arith.addf %561, %562 : vector<2x32xf32>
    %564 = math.tanh %563 : vector<2x32xf32>
    %565 = arith.mulf %558, %564 : vector<2x32xf32>
    %566 = tpu.concatenate %565, %547 in 1 : vector<2x32xf32>, vector<2x32xf32> -> vector<2x64xf32>
    %cst_98 = arith.constant dense<0.000000e+00> : vector<2x128xf32>
    %567 = tpu.matmul %566, %6, %cst_98 {dimension_numbers = #tpu.dot_dimension_numbers<[1], [0], [0], [1], [0, 0, 1, 1], [], []>} : vector<2x64xf32>, vector<64x128xf32>, vector<2x128xf32> -> vector<2x128xf32>
    %568 = vector.broadcast %7 : vector<1x128xf32> to vector<2x128xf32>
    %569 = arith.addf %567, %568 : vector<2x128xf32>
    %570 = vector.extract_strided_slice %569 {offsets = [0, 0], sizes = [2, 96], strides = [1, 1]} : vector<2x128xf32> to vector<2x96xf32>
    %571 = arith.negf %570 : vector<2x96xf32>
    %572 = math.exp %571 : vector<2x96xf32>
    %cst_99 = arith.constant 1.000000e+00 : f32
    %573 = vector.broadcast %cst_99 : f32 to vector<2x96xf32>
    %574 = arith.addf %573, %572 : vector<2x96xf32>
    %575 = arith.divf %573, %574 : vector<2x96xf32>
    %576 = vector.extract_strided_slice %575 {offsets = [0, 0], sizes = [2, 32], strides = [1, 1]} : vector<2x96xf32> to vector<2x32xf32>
    %577 = vector.extract_strided_slice %575 {offsets = [0, 32], sizes = [2, 32], strides = [1, 1]} : vector<2x96xf32> to vector<2x32xf32>
    %578 = vector.extract_strided_slice %575 {offsets = [0, 64], sizes = [2, 32], strides = [1, 1]} : vector<2x96xf32> to vector<2x32xf32>
    %579 = vector.extract_strided_slice %569 {offsets = [0, 96], sizes = [2, 32], strides = [1, 1]} : vector<2x128xf32> to vector<2x32xf32>
    %580 = math.tanh %579 : vector<2x32xf32>
    %581 = arith.mulf %577, %545 : vector<2x32xf32>
    %582 = arith.mulf %576, %580 : vector<2x32xf32>
    %583 = arith.addf %581, %582 : vector<2x32xf32>
    %584 = math.tanh %583 : vector<2x32xf32>
    %585 = arith.mulf %578, %584 : vector<2x32xf32>
    %cst_100 = arith.constant dense<0.000000e+00> : vector<2x128xf32>
    %586 = tpu.matmul %565, %5, %cst_100 {dimension_numbers = #tpu.dot_dimension_numbers<[1], [0], [0], [1], [0, 0, 1, 1], [], []>} : vector<2x32xf32>, vector<32x128xf32>, vector<2x128xf32> -> vector<2x128xf32>
    %587 = arith.addf %353, %586 : vector<2x128xf32>
    %588 = vector.extract_strided_slice %587 {offsets = [0, 0], sizes = [2, 96], strides = [1, 1]} : vector<2x128xf32> to vector<2x96xf32>
    %589 = arith.negf %588 : vector<2x96xf32>
    %590 = math.exp %589 : vector<2x96xf32>
    %cst_101 = arith.constant 1.000000e+00 : f32
    %591 = vector.broadcast %cst_101 : f32 to vector<2x96xf32>
    %592 = arith.addf %591, %590 : vector<2x96xf32>
    %593 = arith.divf %591, %592 : vector<2x96xf32>
    %594 = vector.extract_strided_slice %593 {offsets = [0, 0], sizes = [2, 32], strides = [1, 1]} : vector<2x96xf32> to vector<2x32xf32>
    %595 = vector.extract_strided_slice %593 {offsets = [0, 32], sizes = [2, 32], strides = [1, 1]} : vector<2x96xf32> to vector<2x32xf32>
    %596 = vector.extract_strided_slice %593 {offsets = [0, 64], sizes = [2, 32], strides = [1, 1]} : vector<2x96xf32> to vector<2x32xf32>
    %597 = vector.extract_strided_slice %587 {offsets = [0, 96], sizes = [2, 32], strides = [1, 1]} : vector<2x128xf32> to vector<2x32xf32>
    %598 = math.tanh %597 : vector<2x32xf32>
    %599 = arith.mulf %595, %563 : vector<2x32xf32>
    %600 = arith.mulf %594, %598 : vector<2x32xf32>
    %601 = arith.addf %599, %600 : vector<2x32xf32>
    %602 = math.tanh %601 : vector<2x32xf32>
    %603 = arith.mulf %596, %602 : vector<2x32xf32>
    %604 = tpu.concatenate %603, %585 in 1 : vector<2x32xf32>, vector<2x32xf32> -> vector<2x64xf32>
    %cst_102 = arith.constant dense<0.000000e+00> : vector<2x128xf32>
    %605 = tpu.matmul %604, %6, %cst_102 {dimension_numbers = #tpu.dot_dimension_numbers<[1], [0], [0], [1], [0, 0, 1, 1], [], []>} : vector<2x64xf32>, vector<64x128xf32>, vector<2x128xf32> -> vector<2x128xf32>
    %606 = vector.broadcast %7 : vector<1x128xf32> to vector<2x128xf32>
    %607 = arith.addf %605, %606 : vector<2x128xf32>
    %608 = vector.extract_strided_slice %607 {offsets = [0, 0], sizes = [2, 96], strides = [1, 1]} : vector<2x128xf32> to vector<2x96xf32>
    %609 = arith.negf %608 : vector<2x96xf32>
    %610 = math.exp %609 : vector<2x96xf32>
    %cst_103 = arith.constant 1.000000e+00 : f32
    %611 = vector.broadcast %cst_103 : f32 to vector<2x96xf32>
    %612 = arith.addf %611, %610 : vector<2x96xf32>
    %613 = arith.divf %611, %612 : vector<2x96xf32>
    %614 = vector.extract_strided_slice %613 {offsets = [0, 0], sizes = [2, 32], strides = [1, 1]} : vector<2x96xf32> to vector<2x32xf32>
    %615 = vector.extract_strided_slice %613 {offsets = [0, 32], sizes = [2, 32], strides = [1, 1]} : vector<2x96xf32> to vector<2x32xf32>
    %616 = vector.extract_strided_slice %613 {offsets = [0, 64], sizes = [2, 32], strides = [1, 1]} : vector<2x96xf32> to vector<2x32xf32>
    %617 = vector.extract_strided_slice %607 {offsets = [0, 96], sizes = [2, 32], strides = [1, 1]} : vector<2x128xf32> to vector<2x32xf32>
    %618 = math.tanh %617 : vector<2x32xf32>
    %619 = arith.mulf %615, %583 : vector<2x32xf32>
    %620 = arith.mulf %614, %618 : vector<2x32xf32>
    %621 = arith.addf %619, %620 : vector<2x32xf32>
    %622 = math.tanh %621 : vector<2x32xf32>
    %623 = arith.mulf %616, %622 : vector<2x32xf32>
    %cst_104 = arith.constant dense<0.000000e+00> : vector<2x128xf32>
    %624 = tpu.matmul %603, %5, %cst_104 {dimension_numbers = #tpu.dot_dimension_numbers<[1], [0], [0], [1], [0, 0, 1, 1], [], []>} : vector<2x32xf32>, vector<32x128xf32>, vector<2x128xf32> -> vector<2x128xf32>
    %625 = arith.addf %353, %624 : vector<2x128xf32>
    %626 = vector.extract_strided_slice %625 {offsets = [0, 0], sizes = [2, 96], strides = [1, 1]} : vector<2x128xf32> to vector<2x96xf32>
    %627 = arith.negf %626 : vector<2x96xf32>
    %628 = math.exp %627 : vector<2x96xf32>
    %cst_105 = arith.constant 1.000000e+00 : f32
    %629 = vector.broadcast %cst_105 : f32 to vector<2x96xf32>
    %630 = arith.addf %629, %628 : vector<2x96xf32>
    %631 = arith.divf %629, %630 : vector<2x96xf32>
    %632 = vector.extract_strided_slice %631 {offsets = [0, 0], sizes = [2, 32], strides = [1, 1]} : vector<2x96xf32> to vector<2x32xf32>
    %633 = vector.extract_strided_slice %631 {offsets = [0, 32], sizes = [2, 32], strides = [1, 1]} : vector<2x96xf32> to vector<2x32xf32>
    %634 = vector.extract_strided_slice %631 {offsets = [0, 64], sizes = [2, 32], strides = [1, 1]} : vector<2x96xf32> to vector<2x32xf32>
    %635 = vector.extract_strided_slice %625 {offsets = [0, 96], sizes = [2, 32], strides = [1, 1]} : vector<2x128xf32> to vector<2x32xf32>
    %636 = math.tanh %635 : vector<2x32xf32>
    %637 = arith.mulf %633, %601 : vector<2x32xf32>
    %638 = arith.mulf %632, %636 : vector<2x32xf32>
    %639 = arith.addf %637, %638 : vector<2x32xf32>
    %640 = math.tanh %639 : vector<2x32xf32>
    %641 = arith.mulf %634, %640 : vector<2x32xf32>
    %642 = tpu.concatenate %641, %623 in 1 : vector<2x32xf32>, vector<2x32xf32> -> vector<2x64xf32>
    %cst_106 = arith.constant dense<0.000000e+00> : vector<2x128xf32>
    %643 = tpu.matmul %642, %6, %cst_106 {dimension_numbers = #tpu.dot_dimension_numbers<[1], [0], [0], [1], [0, 0, 1, 1], [], []>} : vector<2x64xf32>, vector<64x128xf32>, vector<2x128xf32> -> vector<2x128xf32>
    %644 = vector.broadcast %7 : vector<1x128xf32> to vector<2x128xf32>
    %645 = arith.addf %643, %644 : vector<2x128xf32>
    %646 = vector.extract_strided_slice %645 {offsets = [0, 0], sizes = [2, 96], strides = [1, 1]} : vector<2x128xf32> to vector<2x96xf32>
    %647 = arith.negf %646 : vector<2x96xf32>
    %648 = math.exp %647 : vector<2x96xf32>
    %cst_107 = arith.constant 1.000000e+00 : f32
    %649 = vector.broadcast %cst_107 : f32 to vector<2x96xf32>
    %650 = arith.addf %649, %648 : vector<2x96xf32>
    %651 = arith.divf %649, %650 : vector<2x96xf32>
    %652 = vector.extract_strided_slice %651 {offsets = [0, 0], sizes = [2, 32], strides = [1, 1]} : vector<2x96xf32> to vector<2x32xf32>
    %653 = vector.extract_strided_slice %651 {offsets = [0, 32], sizes = [2, 32], strides = [1, 1]} : vector<2x96xf32> to vector<2x32xf32>
    %654 = vector.extract_strided_slice %651 {offsets = [0, 64], sizes = [2, 32], strides = [1, 1]} : vector<2x96xf32> to vector<2x32xf32>
    %655 = vector.extract_strided_slice %645 {offsets = [0, 96], sizes = [2, 32], strides = [1, 1]} : vector<2x128xf32> to vector<2x32xf32>
    %656 = math.tanh %655 : vector<2x32xf32>
    %657 = arith.mulf %653, %621 : vector<2x32xf32>
    %658 = arith.mulf %652, %656 : vector<2x32xf32>
    %659 = arith.addf %657, %658 : vector<2x32xf32>
    %660 = math.tanh %659 : vector<2x32xf32>
    %661 = arith.mulf %654, %660 : vector<2x32xf32>
    %662 = tpu.concatenate %395, %433, %471, %509, %547, %585, %623, %661 in 0 : vector<2x32xf32>, vector<2x32xf32>, vector<2x32xf32>, vector<2x32xf32>, vector<2x32xf32>, vector<2x32xf32>, vector<2x32xf32>, vector<2x32xf32> -> vector<16x32xf32>
    %c0_108 = arith.constant 0 : index
    %c0_109 = arith.constant 0 : index
    %663 = vector.load %arg15[%c0_108, %c0_109] : memref<32x16xf32, #tpu.memory_space<vmem>>, vector<32x16xf32>
    %cst_110 = arith.constant dense<0.000000e+00> : vector<16x16xf32>
    %664 = tpu.matmul %662, %663, %cst_110 {dimension_numbers = #tpu.dot_dimension_numbers<[1], [0], [0], [1], [0, 0, 1, 1], [], []>} : vector<16x32xf32>, vector<32x16xf32>, vector<16x16xf32> -> vector<16x16xf32>
    %c0_111 = arith.constant 0 : index
    %c0_112 = arith.constant 0 : index
    %665 = vector.load %arg16[%c0_111, %c0_112] : memref<1x16xf32, #tpu.memory_space<vmem>>, vector<1x16xf32>
    %666 = vector.broadcast %665 : vector<1x16xf32> to vector<16x16xf32>
    %667 = arith.addf %664, %666 : vector<16x16xf32>
    %c0_113 = arith.constant 0 : index
    %c0_114 = arith.constant 0 : index
    %668 = vector.load %arg17[%c0_113, %c0_114] : memref<16x16xf32, #tpu.memory_space<vmem>>, vector<16x16xf32>
    tpu.vector_store %arg17[%c0_113, %c0_114], %667 {strides = array<i32>} : memref<16x16xf32, #tpu.memory_space<vmem>>, vector<16x16xf32>,
    return
  }
}

</mosaic_0001>

<bundles_post_ra>
// kernel: lstm_vae_forward.1
= control target key start
LH: loop header
LB: loop body
LE: loop exit
PB: predicated region body
PF: predicated region fallthrough
CT: control target
= control target key end

     0   :  { %s6734_s0 = inlined_call_operand.vmem [shape: f32[16,16], index: 0, kind: input, shape index: {}]   ;;  %s6735_s1 = inlined_call_operand.hbm [shape: f32[16,128], index: 1, kind: input, shape index: {}]   ;;  %s6736_s2 = inlined_call_operand.hbm [shape: f32[32,128], index: 2, kind: input, shape index: {}]   ;;  %s6737_s3 = inlined_call_operand.vmem [shape: f32[1,128], index: 3, kind: input, shape index: {}]   ;;  %s6738_s4 = inlined_call_operand.vmem [shape: f32[64,128], index: 4, kind: input, shape index: {}]   ;;  %s6739_s5 = inlined_call_operand.hbm [shape: f32[1,128], index: 5, kind: input, shape index: {}]   ;;  %s6740_s6 = inlined_call_operand.vmem [shape: f32[32,16], index: 6, kind: input, shape index: {}]   ;;  %s6741_s7 = inlined_call_operand.hbm [shape: f32[1,16], index: 7, kind: input, shape index: {}]   ;;  %s6742_s8 = inlined_call_operand.hbm [shape: f32[16,32], index: 8, kind: input, shape index: {}]   ;;  %s6743_s9 = inlined_call_operand.hbm [shape: f32[1,32], index: 9, kind: input, shape index: {}]   ;;  %s6744_s10 = inlined_call_operand.hbm [shape: f32[16,128], index: 10, kind: input, shape index: {}]   ;;  %s6745_s11 = inlined_call_operand.hbm [shape: f32[1,128], index: 11, kind: input, shape index: {}]   ;;  %s6746_s12 = inlined_call_operand.vmem [shape: f32[32,128], index: 12, kind: input, shape index: {}]   ;;  %s6747_s13 = inlined_call_operand.vmem [shape: f32[64,128], index: 13, kind: input, shape index: {}]   ;;  %s6748_s14 = inlined_call_operand.vmem [shape: f32[1,128], index: 14, kind: input, shape index: {}]   ;;  %s6749_s15 = inlined_call_operand.vmem [shape: f32[32,16], index: 15, kind: input, shape index: {}]   ;;  %s6750_s16 = inlined_call_operand.vmem [shape: f32[1,16], index: 16, kind: input, shape index: {}]   ;;  %s6751_s17 = inlined_call_operand.vmem [shape: f32[16,16], index: 17, kind: output, shape index: {0}]   ;;  %s6752_s18 = inlined_call_operand.hbm [shape: f32[2,16], index: 18, kind: output, shape index: {1}]   ;;  %s6753_s19 = inlined_call_operand.hbm [shape: f32[2,16], index: 19, kind: output, shape index: {2}]  }
   0x1   :  { %6759 = sst [smem:[#allocation26_spill]] %s6734_s0 }
   0x2   :  { %6760 = sst [smem:[#allocation27_spill]] %s6735_s1 }
   0x3   :  { %6761 = sst [smem:[#allocation28_spill]] %s6736_s2 }
   0x4   :  { %6762 = sst [smem:[#allocation29_spill]] %s6737_s3 }
   0x5   :  { %25 = vsyncpa [#allocation3], 0 }
   0x6   :  { %26 = vsyncpa [#allocation6], 0 }
   0x7   :  { %27 = vsyncpa [#allocation9], 0 }
   0x8   :  { %28 = vsyncpa [#allocation12], 0 }
   0x9   :  { %29 = vsyncpa [#allocation15], 0 }
   0xa   :  { %30 = vsyncpa [#allocation4], 0 }
   0xb   :  { %31 = vsyncpa [#allocation18], 0  ;;  %s5683_s0 = smov [#allocation5]   ;;  %s5684_s20 = smov [#allocation8]  }
   0xc   :  { %s51_s30 = sshll.u32 %s5683_s0, 4  ;;  %s80_s21 = sshll.u32 %s5684_s20, 4  ;;  %s52_s30 = int_to_ptr.vmem [resolvable:$true] %s51_s30  ;;  %s5802_s21 = int_to_ptr.vmem [resolvable:$true] %s80_s21 }
   0xd   :  { %s6763_s2 = sld [smem:[#allocation28_spill]] }
  0x13   :  { %s5449_s23 = scalar_lea.hbm %s6763_s2, 512 }
  0x14   :  { %p5450_p0 = scmp.ne.s32.totalorder %s6763_s2, %s5449_s23  ;;  %p5453_p1 = scmp.lt.u32.totalorder %s5449_s23, %s6763_s2 }
  0x16   :  { %p5455_p2 = pnand %p5453_p1, %p5450_p0 }
  0x18   :  { %5458 = shalt.err (!%p5455_p2)
}
  0x19   :  { %s5459_s27 = scalar_lea.vmem %s52_s30, 512  ;;  %p5464_p4 = scmp.lt.s32.totalorder %s52_s30, %s52_s30 }
  0x1a   :  { %p5460_p3 = scmp.ne.s32.totalorder %s52_s30, %s5459_s27  ;;  %p5465_p5 = scmp.lt.s32.totalorder %s5459_s27, %s5459_s27 }
  0x1c   :  { %p5466_p6 = por %p5465_p5, %p5464_p4 }
  0x1e   :  { %p5467_p7 = pnand %p5466_p6, %p5460_p3 }
  0x20   :  { %5470 = shalt.err (!%p5467_p7)
}
  0x21   :  { %s6757_s28 = smov 128   ;;  %s5686_s29 = smov 8  }
  0x22   :  { %57 = dma.hbm_to_vmem [thread:$0]  %s6763_s2, 512, %s52_s30, [#allocation6], %s6757_s28, %s6757_s28, %s5686_s29  }
  0x23   :  { %s5471_s23 = scalar_lea.hbm %s6741_s7, 16 }
  0x24   :  { %p5472_p8 = scmp.ne.s32.totalorder %s6741_s7, %s5471_s23  ;;  %p5475_p9 = scmp.lt.u32.totalorder %s5471_s23, %s6741_s7 }
  0x26   :  { %p5477_p10 = pnand %p5475_p9, %p5472_p8 }
  0x28   :  { %5480 = shalt.err (!%p5477_p10)
}
  0x29   :  { %s5481_s27 = scalar_lea.vmem %s5802_s21, 16  ;;  %s5485_s30 = scalar_lea.vmem %s5802_s21, 32 }
  0x2a   :  { %p5482_p11 = scmp.ne.s32.totalorder %s5802_s21, %s5481_s27  ;;  %p5486_p12 = scmp.lt.s32.totalorder %s5802_s21, %s5802_s21 }
  0x2b   :  { %p5487_p13 = scmp.lt.s32.totalorder %s5485_s30, %s5481_s27 }
  0x2d   :  { %p5488_p0 = por %p5487_p13, %p5486_p12 }
  0x2f   :  { %p5489_p1 = pnand %p5488_p0, %p5482_p11 }
  0x31   :  { %5492 = shalt.err (!%p5489_p1)
}
  0x32   :  { %83 = dma.hbm_to_vmem [thread:$0]  %s6741_s7, 16, %s5802_s21, [#allocation9]  }
  0x33   :  { %s5687_s20 = smov [#allocation11]   ;;  %s5688_s22 = smov [#allocation2]  }
  0x34   :  { %s102_s1 = sshll.u32 %s5687_s20, 4  ;;  %s39_s23 = sshll.u32 %s5688_s22, 4  ;;  %s103_s1 = int_to_ptr.vmem [resolvable:$true] %s102_s1  ;;  %s5837_s23 = int_to_ptr.vmem [resolvable:$true] %s39_s23 }
  0x35   :  { %s5493_s3 = scalar_lea.hbm %s6743_s9, 16 }
  0x36   :  { %p5494_p2 = scmp.ne.s32.totalorder %s6743_s9, %s5493_s3  ;;  %p5497_p3 = scmp.lt.u32.totalorder %s5493_s3, %s6743_s9 }
  0x38   :  { %p5499_p4 = pnand %p5497_p3, %p5494_p2 }
  0x3a   :  { %5502 = shalt.err (!%p5499_p4)
}
  0x3b   :  { %s5503_s7 = scalar_lea.vmem %s103_s1, 16  ;;  %s5507_s21 = scalar_lea.vmem %s103_s1, 32 }
  0x3c   :  { %p5504_p5 = scmp.ne.s32.totalorder %s103_s1, %s5503_s7  ;;  %p5508_p6 = scmp.lt.s32.totalorder %s103_s1, %s103_s1 }
  0x3d   :  { %p5509_p7 = scmp.lt.s32.totalorder %s5507_s21, %s5503_s7 }
  0x3f   :  { %p5510_p8 = por %p5509_p7, %p5508_p6 }
  0x41   :  { %p5511_p9 = pnand %p5510_p8, %p5504_p5 }
  0x43   :  { %5514 = shalt.err (!%p5511_p9)
}
  0x44   :  { %105 = dma.hbm_to_vmem [thread:$0]  %s6743_s9, 16, %s103_s1, [#allocation12]  }
  0x45   :  { %s6764_s24 = sld [smem:[#allocation27_spill]] }
  0x4b   :  { %s5515_s25 = scalar_lea.hbm %s6764_s24, 256 }
  0x4c   :  { %p5516_p10 = scmp.ne.s32.totalorder %s6764_s24, %s5515_s25  ;;  %p5519_p11 = scmp.lt.u32.totalorder %s5515_s25, %s6764_s24 }
  0x4e   :  { %p5521_p12 = pnand %p5519_p11, %p5516_p10 }
  0x50   :  { %5524 = shalt.err (!%p5521_p12)
}
  0x51   :  { %s5525_s30 = scalar_lea.vmem %s5837_s23, 256  ;;  %p5530_p0 = scmp.lt.s32.totalorder %s5837_s23, %s5837_s23 }
  0x52   :  { %p5526_p13 = scmp.ne.s32.totalorder %s5837_s23, %s5525_s30  ;;  %p5531_p1 = scmp.lt.s32.totalorder %s5525_s30, %s5525_s30 }
  0x54   :  { %p5532_p2 = por %p5531_p1, %p5530_p0 }
  0x56   :  { %p5533_p3 = pnand %p5532_p2, %p5526_p13 }
  0x58   :  { %5536 = shalt.err (!%p5533_p3)
}
  0x59   :  { %s6765_s9 = smov 128   ;;  %s5689_s21 = smov [#allocation7]  }
  0x5a   :  { %45 = dma.hbm_to_vmem [thread:$0]  %s6764_s24, 256, %s5837_s23, [#allocation3], %s6765_s9, %s6765_s9, %s5686_s29  }
  0x5b   :  { %s68_s2 = sshll.u32 %s5689_s21, 4  ;;  %s5690_s0 = smov [#allocation10]   ;;  %s69_s2 = int_to_ptr.vmem [resolvable:$true] %s68_s2 }
  0x5c   :  { %s89_s20 = sshll.u32 %s5690_s0, 4  ;;  %s5537_s28 = scalar_lea.hbm %s6739_s5, 16  ;;  %s5871_s20 = int_to_ptr.vmem [resolvable:$true] %s89_s20 }
  0x5d   :  { %p5538_p4 = scmp.ne.s32.totalorder %s6739_s5, %s5537_s28  ;;  %p5541_p5 = scmp.lt.u32.totalorder %s5537_s28, %s6739_s5 }
  0x5f   :  { %p5543_p6 = pnand %p5541_p5, %p5538_p4 }
  0x61   :  { %5546 = shalt.err (!%p5543_p6)
}
  0x62   :  { %s5547_s23 = scalar_lea.vmem %s69_s2, 16  ;;  %s5551_s24 = scalar_lea.vmem %s69_s2, 32 }
  0x63   :  { %p5548_p7 = scmp.ne.s32.totalorder %s69_s2, %s5547_s23  ;;  %p5552_p8 = scmp.lt.s32.totalorder %s69_s2, %s69_s2 }
  0x64   :  { %p5553_p9 = scmp.lt.s32.totalorder %s5551_s24, %s5547_s23 }
  0x66   :  { %p5554_p10 = por %p5553_p9, %p5552_p8 }
  0x68   :  { %p5555_p11 = pnand %p5554_p10, %p5548_p7 }
  0x6a   :  { %5558 = shalt.err (!%p5555_p11)
}
  0x6b   :  { %71 = dma.hbm_to_vmem [thread:$0]  %s6739_s5, 16, %s69_s2, [#allocation6]  }
  0x6c   :  { %s5559_s22 = scalar_lea.hbm %s6742_s8, 256 }
  0x6d   :  { %p5560_p12 = scmp.ne.s32.totalorder %s6742_s8, %s5559_s22  ;;  %p5563_p13 = scmp.lt.u32.totalorder %s5559_s22, %s6742_s8 }
  0x6f   :  { %p5565_p0 = pnand %p5563_p13, %p5560_p12 }
  0x71   :  { %5568 = shalt.err (!%p5565_p0)
}
  0x72   :  { %s5569_s27 = scalar_lea.vmem %s5871_s20, 256  ;;  %p5574_p2 = scmp.lt.s32.totalorder %s5871_s20, %s5871_s20 }
  0x73   :  { %p5570_p1 = scmp.ne.s32.totalorder %s5871_s20, %s5569_s27  ;;  %p5575_p3 = scmp.lt.s32.totalorder %s5569_s27, %s5569_s27 }
  0x75   :  { %p5576_p4 = por %p5575_p3, %p5574_p2 }
  0x77   :  { %p5577_p5 = pnand %p5576_p4, %p5570_p1 }
  0x79   :  { %5580 = shalt.err (!%p5577_p5)
}
  0x7a   :  { %95 = dma.hbm_to_vmem [thread:$0]  %s6742_s8, 256, %s5871_s20, [#allocation9], %s6765_s9, %s6765_s9, %s5686_s29  }
  0x7b   :  { %s5691_s30 = smov [#allocation13]   ;;  %s5692_s24 = smov [#allocation14]  }
  0x7c   :  { %s111_s23 = sshll.u32 %s5691_s30, 4  ;;  %s124_s1 = sshll.u32 %s5692_s24, 4  ;;  %s112_s23 = int_to_ptr.vmem [resolvable:$true] %s111_s23  ;;  %s125_s1 = int_to_ptr.vmem [resolvable:$true] %s124_s1 }
  0x7d   :  { %s5581_s0 = scalar_lea.hbm %s6744_s10, 256 }
  0x7e   :  { %p5582_p6 = scmp.ne.s32.totalorder %s6744_s10, %s5581_s0  ;;  %p5585_p7 = scmp.lt.u32.totalorder %s5581_s0, %s6744_s10 }
  0x80   :  { %p5587_p8 = pnand %p5585_p7, %p5582_p6 }
  0x82   :  { %5590 = shalt.err (!%p5587_p8)
}
  0x83   :  { %s5591_s8 = scalar_lea.vmem %s112_s23, 256  ;;  %p5596_p10 = scmp.lt.s32.totalorder %s112_s23, %s112_s23 }
  0x84   :  { %p5592_p9 = scmp.ne.s32.totalorder %s112_s23, %s5591_s8  ;;  %p5597_p11 = scmp.lt.s32.totalorder %s5591_s8, %s5591_s8 }
  0x86   :  { %p5598_p12 = por %p5597_p11, %p5596_p10 }
  0x88   :  { %p5599_p13 = pnand %p5598_p12, %p5592_p9 }
  0x8a   :  { %5602 = shalt.err (!%p5599_p13)
}
  0x8b   :  { %117 = dma.hbm_to_vmem [thread:$0]  %s6744_s10, 256, %s112_s23, [#allocation12], %s6765_s9, %s6765_s9, %s5686_s29  }
  0x8c   :  { %s5603_s2 = scalar_lea.hbm %s6745_s11, 16 }
  0x8d   :  { %p5604_p0 = scmp.ne.s32.totalorder %s6745_s11, %s5603_s2  ;;  %p5607_p1 = scmp.lt.u32.totalorder %s5603_s2, %s6745_s11 }
  0x8f   :  { %p5609_p2 = pnand %p5607_p1, %p5604_p0 }
  0x91   :  { %5612 = shalt.err (!%p5609_p2)
}
  0x92   :  { %s5613_s0 = scalar_lea.vmem %s125_s1, 16  ;;  %s5617_s22 = scalar_lea.vmem %s125_s1, 32 }
  0x93   :  { %p5614_p3 = scmp.ne.s32.totalorder %s125_s1, %s5613_s0  ;;  %p5618_p4 = scmp.lt.s32.totalorder %s125_s1, %s125_s1 }
  0x94   :  { %p5619_p5 = scmp.lt.s32.totalorder %s5617_s22, %s5613_s0 }
  0x96   :  { %p5620_p6 = por %p5619_p5, %p5618_p4 }
  0x98   :  { %p5621_p7 = pnand %p5620_p6, %p5614_p3 }
  0x9a   :  { %5624 = shalt.err (!%p5621_p7)
}
  0x9b   :  { %127 = dma.hbm_to_vmem [thread:$0]  %s6745_s11, 16, %s125_s1, [#allocation15]  }
  0x9c   :  { %5669 = dma.done.wait [#allocation3], 256  }
  0x9d   :  { %5670 = vsyncadd [#allocation3], 4294967040 }
  0x9e   :  { %5671 = dma.done.wait [#allocation6], 528  }
  0x9f   :  { %5672 = vsyncadd [#allocation6], 4294966768 }
  0xa0   :  { %5673 = dma.done.wait [#allocation9], 272  }
  0xa1   :  { %5674 = vsyncadd [#allocation9], 4294967024 }
  0xa2   :  { %5675 = dma.done.wait [#allocation12], 272  }
  0xa3   :  { %5676 = vsyncadd [#allocation12], 4294967024 }
  0xa4   :  { %5677 = dma.done.wait [#allocation15], 16  }
  0xa5   :  { %5678 = vsyncadd [#allocation15], 4294967280  ;;  %v5693_v0 = vmov 0.0|0.0   ;;  %vm5694_vm0 = vmmov 0   ;;  %v5695_v1 = vmov 0.0   ;;  %vm199_vm1 = vcmask 130048  }
  0xa6   :  { %4866 = vmatprep.subr.bf16.mxu1 %v5693_v0  ;;  %4354 = vmatprep.mubr.msk.f32.mxu1 %vm5694_vm0, %v5695_v1  ;;  %v162_v2 = vld [vmem:[#allocation2] sm:$0xff]  ;;  %v163_v3 = vld [vmem:[#allocation2 + $0x8] sm:$0xff]  ;;  %v164_v4 = vld [vmem:[#allocation5] sm:$0xff]  ;;  %s6766_s23 = sld [smem:[#allocation26_spill]]  ;;  %s6767_s8 = sld [smem:[#allocation29_spill]]  ;;  %vm281_vm2 = vcmask 261120  }
  0xa7   :  { %v4862_v5 = vpack.c.bf16 %v163_v3, %v162_v2  ;;  %v165_v6 = vld [vmem:[#allocation5 + $0x8] sm:$0xff]  ;;  %v166_v9 = vld [vmem:[#allocation5 + $0x10] sm:$0xff]  ;;  %v167_v10 = vld [vmem:[#allocation5 + $0x18] sm:$0xff]  ;;  %s5696_s20 = smov 32   ;;  %s5697_s25 = smov 64   ;;  %vm391_vm3 = vcmask 523264  }
  0xa8   :  { %v5938_v8 = vpack.c.bf16 %v165_v6, %v164_v4  ;;  %v5945_v12 = vpack.c.bf16 %v167_v10, %v166_v9  ;;  %v169_v31 = vld [vmem:[%s6738_s4] sm:$0xff]  ;;  %v170_v32 = vld [vmem:[%s6738_s4 + $0x8] sm:$0xff]  ;;  %v171_v33 = vld [vmem:[%s6738_s4 + $0x10] sm:$0xff]  ;;  %vm2151_vm4 = vcmask 123904   ;;  %vm3874_vm5 = vcmask 1041408   ;;  %s5701_s1 = smov [#allocation17]  }
  0xa9   :  { %4863 = vmatprep.subr.bf16.mxu0 %v4862_v5  ;;  %v5983_v34 = vpack.c.bf16 %v170_v32, %v169_v31  ;;  %v172_v35 = vld [vmem:[%s6738_s4 + $0x18] sm:$0xff]  ;;  %v173_v37 = vld [vmem:[%s6738_s4 + $0x20] sm:$0xff]  ;;  %v174_v38 = vld [vmem:[%s6738_s4 + $0x28] sm:$0xff]  ;;  %vm3876_vm6 = vcmask 1043456   ;;  %vm3878_vm7 = vcmask 1045504   ;;  %s3999_s28 = sshll.u32 %s5701_s1, 4  ;;  %s4000_s28 = int_to_ptr.vmem [resolvable:$true] %s3999_s28 }
  0xaa   :  { %4868 = vmatpush3.bf16.msra.mxu1 %v5938_v8  ;;  %4865 = vmatpush3.bf16.msra.mxu0 %v4862_v5  ;;  %v5989_v36 = vpack.c.bf16 %v172_v35, %v171_v33  ;;  %v5999_v39 = vpack.c.bf16 %v174_v38, %v173_v37  ;;  %v175_v40 = vld [vmem:[%s6738_s4 + $0x30] sm:$0xff]  ;;  %v176_v41 = vld [vmem:[%s6738_s4 + $0x38] sm:$0xff]  ;;  %s5698_s4 = smov 96  }
  0xab   :  { %4869 = vmatprep.subr.bf16.mxu1 %v5693_v0  ;;  %4872 = vmatprep.subr.bf16.mxu0 %v5693_v0  ;;  %v6010_v43 = vpack.c.bf16 %v176_v41, %v175_v40  ;;  %v6035_v48 = vld [vmem:[#allocation7] ss:$0 sm:$0xff] }
  0xac   :  { %v191_v7 = vld [vmem:[%s6766_s23] sm:$0xff]  ;;  %v192_v11 = vld [vmem:[%s6766_s23 + $0x8] sm:$0xff] }
  0xad   :  { %4343 = vmatprep.mubr.msk.f32.mxu0 %vm199_vm1, %v191_v7  ;;  %v4018_v13 = vld [vmem:[%s6767_s8] ss:$0 sm:$0xff] }
  0xae   :  { %4344 = vmatmul.mubr.msk.f32.vlgmr.msra.gmra.mrb[0].mxu0 %vm199_vm1, %v192_v11  ;;  %4871 = vmatpush3.bf16.msra.mxu1 %v5945_v12 }
  0xaf   :  { %4373 = vmatprep.mubr.msk.f32.mxu0 %vm5694_vm0, %v5695_v1  ;;  %4884 = vmatprep.subr.bf16.mxu1 %v5693_v0 }
  0xb0   :  { %4874 = vmatpush3.bf16.msra.mxu0 %v5983_v34 }
  0xb1   :  { %4355 = vmatmul.mubr.f32.vlgmr.msra.gmra.mrb[0].mxu1 %v5695_v1  ;;  %4875 = vmatprep.subr.bf16.mxu0 %v5693_v0 }
  0xb2   :  { %4886 = vmatpush3.bf16.msra.mxu1 %v5938_v8  ;;  %4384 = vmatprep.mubr.msk.f32.mxu1 %vm5694_vm0, %v5695_v1 }
  0xb3   :  { %4887 = vmatprep.subr.bf16.mxu1 %v5693_v0 }
  0xb4   :  { %4877 = vmatpush3.bf16.msra.mxu0 %v5989_v36 }
  0xb5   :  { %4878 = vmatprep.subr.bf16.mxu0 %v5693_v0 }
  0xb6   :  { %4889 = vmatpush3.bf16.msra.mxu1 %v5945_v12 }
  0xb7   :  { %4890 = vmatprep.subr.bf16.mxu1 %v5693_v0 }
  0xb8   :  { %4880 = vmatpush3.bf16.msra.mxu0 %v5999_v39 }
  0xb9   :  { %4881 = vmatprep.subr.bf16.mxu0 %v5693_v0 }
  0xbc   :  { %4883 = vmatpush3.bf16.msra.mxu0 %v6010_v43 }
  0xbd   :  { %4902 = vmatprep.subr.bf16.mxu0 %v5693_v0 }
 0x181   :  { %v4345_v14 = vpop.f32.mrb[0].mxu0 }
 0x182   :  { %v5964_v15 = vadd.f32 %v4345_v14, %v4018_v13  ;;  %v272_v16 = vpop.f32.mrb[1].mxu0 }
 0x183   :  { %v5966_v17 = vadd.f32 %v4018_v13, %v272_v16 }
 0x184   :  { %v351_v18 = vpop.f32.mrb[0].mxu1 }
 0x185   :  { %v355_v19 = vadd.f32 %v351_v18, %v5966_v17  ;;  %v4356_v20 = vpop.f32.mrb[1].mxu1 }
 0x187   :  { %5193 = vtanh.f32 %v355_v19  ;;  %v4021_v22 = vmul.f32 -1.442695, %v355_v19 }
 0x189   :  { %5195 = vpow2.f32 %v4021_v22 }
 0x191   :  { %v5194_v21 = vpop.eup %5193 }
 0x192   :  { %365 = vrot.lane.b32.xlu0 %v5194_v21, %s5696_s20 }
 0x193   :  { %v5196_v23 = vpop.eup %5195 }
 0x194   :  { %v359_v24 = vadd.f32 1.0, %v5196_v23 }
 0x196   :  { %5197 = vrcp.f32 %v359_v24 }
 0x1a0   :  { %v5198_v25 = vpop.eup %5197 }
 0x1a1   :  { %v363_v28 = vmul.f32 0.0, %v5198_v25 }
 0x204   :  { %v366_v26 = vpop.permute.xlu0 %365 }
 0x205   :  { %v368_v27 = vmul.f32 %v5198_v25, %v366_v26 }
 0x207   :  { %370 = vrot.lane.b32.xlu0 %v368_v27, %s5696_s20 }
 0x279   :  { %v371_v29 = vpop.permute.xlu0 %370 }
 0x27a   :  { %v5971_v30 = vadd.f32 %v371_v29, %v363_v28 }
 0x27c   :  { %5199 = vtanh.f32 %v5971_v30  ;;  %v573_v9 = vrot.slane %v5971_v30, 6 }
 0x286   :  { %v5200_v42 = vpop.eup %5199 }
 0x287   :  { %376 = vrot.lane.b32.xlu1 %v5200_v42, %s5696_s20 }
 0x2f9   :  { %v377_v44 = vpop.permute.xlu1 %376 }
 0x2fa   :  { %v379_v45 = vmul.f32 %v5198_v25, %v377_v44 }
 0x2fc   :  { %381 = vrot.lane.b32.xlu1 %v379_v45, %s5697_s25 }
 0x36e   :  { %v382_v46 = vpop.permute.xlu1 %381 }
 0x36f   :  { %v384_v47 = vsel %vm281_vm2, %v382_v46, 0.0  ;;  %4385 = vmatmul.mubr.msk.f32.vlgmr.msra.gmra.mrb[2].mxu1 %vm281_vm2, %v382_v46 }
 0x370   :  { %4374 = vmatmul.mubr.msk.f32.vlgmr.msra.gmra.mrb[2].mxu0 %vm391_vm3, %v384_v47  ;;  %4892 = vmatpush3.bf16.msra.mxu1 %v5983_v34 }
 0x371   :  { %4893 = vmatprep.subr.bf16.mxu1 %v5693_v0  ;;  %4904 = vmatpush3.bf16.msra.mxu0 %v5938_v8 }
 0x372   :  { %4905 = vmatprep.subr.bf16.mxu0 %v5693_v0  ;;  %4403 = vmatprep.mubr.msk.f32.mxu1 %vm5694_vm0, %v5695_v1 }
 0x373   :  { %4414 = vmatprep.mubr.msk.f32.mxu0 %vm5694_vm0, %v5695_v1 }
 0x374   :  { %4895 = vmatpush3.bf16.msra.mxu1 %v5989_v36 }
 0x375   :  { %4896 = vmatprep.subr.bf16.mxu1 %v5693_v0  ;;  %4907 = vmatpush3.bf16.msra.mxu0 %v5945_v12 }
 0x376   :  { %4908 = vmatprep.subr.bf16.mxu0 %v5693_v0 }
 0x378   :  { %4898 = vmatpush3.bf16.msra.mxu1 %v5999_v39 }
 0x379   :  { %4899 = vmatprep.subr.bf16.mxu1 %v5693_v0 }
 0x37c   :  { %4901 = vmatpush3.bf16.msra.mxu1 %v6010_v43 }
 0x37d   :  { %4920 = vmatprep.subr.bf16.mxu1 %v5693_v0 }
 0x442   :  { %v557_v49 = vpop.f32.mrb[2].mxu1 }
 0x443   :  { %v562_v50 = vrot.slane %v557_v49, 6  ;;  %v461_v51 = vpop.f32.mrb[2].mxu0  ;;  %v4386_v52 = vpop.f32.mrb[3].mxu1 }
 0x444   :  { %v462_v53 = vadd.f32 %v6035_v48, %v461_v51  ;;  %v4375_v54 = vpop.f32.mrb[3].mxu0 }
 0x445   :  { %v564_v55 = vadd.f32 %v562_v50, %v5966_v17 }
 0x446   :  { %5201 = vtanh.f32 %v462_v53  ;;  %v4024_v58 = vmul.f32 -1.442695, %v462_v53 }
 0x447   :  { %5203 = vtanh.f32 %v564_v55  ;;  %v4026_v59 = vmul.f32 -1.442695, %v564_v55 }
 0x448   :  { %5205 = vpow2.f32 %v4024_v58 }
 0x449   :  { %5207 = vpow2.f32 %v4026_v59 }
 0x450   :  { %v5202_v56 = vpop.eup %5201 }
 0x451   :  { %v5204_v57 = vpop.eup %5203  ;;  %474 = vrot.lane.b32.xlu0 %v5202_v56, %s5696_s20 }
 0x452   :  { %577 = vrot.lane.b32.xlu1 %v5204_v57, %s5696_s20  ;;  %v5206_v60 = vpop.eup %5205 }
 0x453   :  { %v5208_v61 = vpop.eup %5207  ;;  %v468_v62 = vadd.f32 1.0, %v5206_v60 }
 0x454   :  { %v568_v63 = vadd.f32 1.0, %v5208_v61 }
 0x455   :  { %5209 = vrcp.f32 %v468_v62 }
 0x456   :  { %5211 = vrcp.f32 %v568_v63 }
 0x45f   :  { %v5210_v2 = vpop.eup %5209 }
 0x460   :  { %v5212_v4 = vpop.eup %5211  ;;  %v472_v10 = vmul.f32 0.0, %v5210_v2 }
 0x461   :  { %v575_v13 = vmul.f32 %v5212_v4, %v573_v9 }
 0x4c3   :  { %v475_v3 = vpop.permute.xlu0 %474 }
 0x4c4   :  { %v477_v5 = vmul.f32 %v5210_v2, %v475_v3  ;;  %v578_v6 = vpop.permute.xlu1 %577 }
 0x4c5   :  { %v580_v7 = vmul.f32 %v5212_v4, %v578_v6 }
 0x4c6   :  { %479 = vrot.lane.b32.xlu0 %v477_v5, %s5696_s20 }
 0x4c7   :  { %582 = vrot.lane.b32.xlu1 %v580_v7, %s5696_s20 }
 0x538   :  { %v480_v11 = vpop.permute.xlu0 %479 }
 0x539   :  { %v6044_v14 = vadd.f32 %v480_v11, %v472_v10  ;;  %v583_v16 = vpop.permute.xlu1 %582 }
 0x53a   :  { %v6046_v18 = vadd.f32 %v583_v16, %v575_v13 }
 0x53b   :  { %5213 = vtanh.f32 %v6044_v14 }
 0x53c   :  { %5215 = vtanh.f32 %v6046_v18  ;;  %v787_v59 = vrot.slane %v6046_v18, 6 }
 0x545   :  { %v5214_v19 = vpop.eup %5213 }
 0x546   :  { %v5216_v20 = vpop.eup %5215  ;;  %485 = vrot.lane.b32.xlu0 %v5214_v19, %s5696_s20 }
 0x547   :  { %588 = vrot.lane.b32.xlu1 %v5216_v20, %s5696_s20 }
 0x5b8   :  { %v486_v21 = vpop.permute.xlu0 %485 }
 0x5b9   :  { %v6052_v22 = vmul.f32 %v5210_v2, %v486_v21  ;;  %v589_v23 = vpop.permute.xlu1 %588 }
 0x5ba   :  { %v591_v24 = vmul.f32 %v5212_v4, %v589_v23 }
 0x5bb   :  { %v597_v25 = vrot.slane %v6052_v22, 6 }
 0x5bc   :  { %593 = vrot.lane.b32.xlu0 %v591_v24, %s5697_s25  ;;  %v700_v26 = vrot.slane %v591_v24, 2 }
 0x5bd   :  { %598 = vrot.lane.b32.xlu1 %v597_v25, %s5698_s4 }
 0x5c0   :  { %701 = vrot.lane.b32.xlu0 %v700_v26, %s5697_s25 }
 0x62e   :  { %v594_v27 = vpop.permute.xlu0 %593 }
 0x62f   :  { %v599_v28 = vpop.permute.xlu1 %598 }
 0x630   :  { %v601_v29 = vsel %vm281_vm2, %v594_v27, %v599_v28 }
 0x631   :  { %v603_v30 = vrot.slane %v601_v29, 2 }
 0x632   :  { %v702_v31 = vpop.permute.xlu0 %701 }
 0x633   :  { %4404 = vmatmul.mubr.msk.f32.vlgmr.msra.gmra.mrb[4].mxu1 %vm391_vm3, %v603_v30  ;;  %4415 = vmatmul.mubr.msk.f32.vlgmr.msra.gmra.mrb[4].mxu0 %vm281_vm2, %v702_v31 }
 0x634   :  { %4910 = vmatpush3.bf16.msra.mxu0 %v5983_v34  ;;  %4922 = vmatpush3.bf16.msra.mxu1 %v5938_v8 }
 0x635   :  { %4911 = vmatprep.subr.bf16.mxu0 %v5693_v0  ;;  %4923 = vmatprep.subr.bf16.mxu1 %v5693_v0 }
 0x636   :  { %4433 = vmatprep.mubr.msk.f32.mxu0 %vm5694_vm0, %v5695_v1  ;;  %4444 = vmatprep.mubr.msk.f32.mxu1 %vm5694_vm0, %v5695_v1 }
 0x638   :  { %4913 = vmatpush3.bf16.msra.mxu0 %v5989_v36  ;;  %4925 = vmatpush3.bf16.msra.mxu1 %v5945_v12 }
 0x639   :  { %4914 = vmatprep.subr.bf16.mxu0 %v5693_v0  ;;  %4926 = vmatprep.subr.bf16.mxu1 %v5693_v0 }
 0x63c   :  { %4916 = vmatpush3.bf16.msra.mxu0 %v5999_v39 }
 0x63d   :  { %4917 = vmatprep.subr.bf16.mxu0 %v5693_v0 }
 0x640   :  { %4919 = vmatpush3.bf16.msra.mxu0 %v6010_v43 }
 0x641   :  { %4938 = vmatprep.subr.bf16.mxu0 %v5693_v0 }
 0x706   :  { %v672_v32 = vpop.f32.mrb[4].mxu1  ;;  %v771_v33 = vpop.f32.mrb[4].mxu0 }
 0x707   :  { %v673_v35 = vadd.f32 %v6035_v48, %v672_v32  ;;  %v776_v37 = vrot.slane %v771_v33, 4  ;;  %v4405_v38 = vpop.f32.mrb[5].mxu1  ;;  %v4416_v40 = vpop.f32.mrb[5].mxu0 }
 0x709   :  { %5217 = vtanh.f32 %v673_v35  ;;  %v778_v41 = vadd.f32 %v776_v37, %v5966_v17  ;;  %v4028_v45 = vmul.f32 -1.442695, %v673_v35 }
 0x70b   :  { %5219 = vtanh.f32 %v778_v41  ;;  %v4030_v46 = vmul.f32 -1.442695, %v778_v41 }
 0x70c   :  { %5221 = vpow2.f32 %v4028_v45 }
 0x70d   :  { %5223 = vpow2.f32 %v4030_v46 }
 0x713   :  { %v5218_v42 = vpop.eup %5217 }
 0x714   :  { %685 = vrot.lane.b32.xlu1 %v5218_v42, %s5696_s20 }
 0x715   :  { %v5220_v44 = vpop.eup %5219 }
 0x716   :  { %791 = vrot.lane.b32.xlu0 %v5220_v44, %s5696_s20  ;;  %v5222_v47 = vpop.eup %5221 }
 0x717   :  { %v5224_v49 = vpop.eup %5223  ;;  %v679_v50 = vadd.f32 1.0, %v5222_v47 }
 0x718   :  { %v782_v51 = vadd.f32 1.0, %v5224_v49 }
 0x719   :  { %5225 = vrcp.f32 %v679_v50 }
 0x71a   :  { %5227 = vrcp.f32 %v782_v51 }
 0x723   :  { %v5226_v52 = vpop.eup %5225 }
 0x724   :  { %v5228_v55 = vpop.eup %5227  ;;  %v683_v58 = vmul.f32 %v5226_v52, %v6044_v14 }
 0x725   :  { %v789_v62 = vmul.f32 %v5228_v55, %v787_v59 }
 0x786   :  { %v686_v53 = vpop.permute.xlu1 %685 }
 0x787   :  { %v688_v54 = vmul.f32 %v5226_v52, %v686_v53 }
 0x788   :  { %v792_v56 = vpop.permute.xlu0 %791 }
 0x789   :  { %690 = vrot.lane.b32.xlu1 %v688_v54, %s5696_s20  ;;  %v794_v57 = vmul.f32 %v5228_v55, %v792_v56 }
 0x78b   :  { %796 = vrot.lane.b32.xlu0 %v794_v57, %s5696_s20 }
 0x7fb   :  { %v691_v60 = vpop.permute.xlu1 %690 }
 0x7fc   :  { %v6085_v61 = vadd.f32 %v691_v60, %v683_v58 }
 0x7fd   :  { %v797_v63 = vpop.permute.xlu0 %796 }
 0x7fe   :  { %5229 = vtanh.f32 %v6085_v61  ;;  %v6088_v2 = vadd.f32 %v797_v63, %v789_v62 }
 0x800   :  { %5231 = vtanh.f32 %v6088_v2  ;;  %v1001_v46 = vrot.slane %v6088_v2, 6 }
 0x808   :  { %v5230_v3 = vpop.eup %5229 }
 0x809   :  { %696 = vrot.lane.b32.xlu1 %v5230_v3, %s5696_s20 }
 0x80a   :  { %v5232_v4 = vpop.eup %5231 }
 0x80b   :  { %802 = vrot.lane.b32.xlu0 %v5232_v4, %s5696_s20 }
 0x87b   :  { %v697_v5 = vpop.permute.xlu1 %696 }
 0x87c   :  { %v6093_v6 = vmul.f32 %v5226_v52, %v697_v5 }
 0x87d   :  { %v803_v9 = vpop.permute.xlu0 %802 }
 0x87e   :  { %v811_v7 = vrot.slane %v6093_v6, 4  ;;  %v805_v10 = vmul.f32 %v5228_v55, %v803_v9  ;;  %v1976_v56 = vadd.f32 %v6093_v6, %v6052_v22 }
 0x880   :  { %812 = vrot.lane.b32.xlu0 %v811_v7, %s5698_s4  ;;  %807 = vrot.lane.b32.xlu1 %v805_v10, %s5697_s25  ;;  %v914_v11 = vrot.slane %v805_v10, 4 }
 0x884   :  { %915 = vrot.lane.b32.xlu1 %v914_v11, %s5697_s25 }
 0x8f2   :  { %v813_v13 = vpop.permute.xlu0 %812  ;;  %v808_v14 = vpop.permute.xlu1 %807 }
 0x8f3   :  { %v815_v16 = vsel %vm281_vm2, %v808_v14, %v813_v13 }
 0x8f4   :  { %v817_v18 = vrot.slane %v815_v16, 4 }
 0x8f6   :  { %v916_v19 = vpop.permute.xlu1 %915  ;;  %4434 = vmatmul.mubr.msk.f32.vlgmr.msra.gmra.mrb[6].mxu0 %vm391_vm3, %v817_v18 }
 0x8f7   :  { %4445 = vmatmul.mubr.msk.f32.vlgmr.msra.gmra.mrb[6].mxu1 %vm281_vm2, %v916_v19  ;;  %4940 = vmatpush3.bf16.msra.mxu0 %v5938_v8 }
 0x8f8   :  { %4928 = vmatpush3.bf16.msra.mxu1 %v5983_v34  ;;  %4941 = vmatprep.subr.bf16.mxu0 %v5693_v0 }
 0x8f9   :  { %4929 = vmatprep.subr.bf16.mxu1 %v5693_v0  ;;  %4463 = vmatprep.mubr.msk.f32.mxu1 %vm5694_vm0, %v5695_v1 }
 0x8fa   :  { %4474 = vmatprep.mubr.msk.f32.mxu0 %vm5694_vm0, %v5695_v1 }
 0x8fb   :  { %4943 = vmatpush3.bf16.msra.mxu0 %v5945_v12 }
 0x8fc   :  { %4931 = vmatpush3.bf16.msra.mxu1 %v5989_v36  ;;  %4944 = vmatprep.subr.bf16.mxu0 %v5693_v0 }
 0x8fd   :  { %4932 = vmatprep.subr.bf16.mxu1 %v5693_v0 }
 0x900   :  { %4934 = vmatpush3.bf16.msra.mxu1 %v5999_v39 }
 0x901   :  { %4935 = vmatprep.subr.bf16.mxu1 %v5693_v0 }
 0x904   :  { %4937 = vmatpush3.bf16.msra.mxu1 %v6010_v43 }
 0x905   :  { %4956 = vmatprep.subr.bf16.mxu1 %v5693_v0 }
 0x9c9   :  { %v886_v20 = vpop.f32.mrb[6].mxu0 }
 0x9ca   :  { %v887_v21 = vadd.f32 %v6035_v48, %v886_v20  ;;  %v4435_v23 = vpop.f32.mrb[7].mxu0  ;;  %v985_v24 = vpop.f32.mrb[6].mxu1 }
 0x9cb   :  { %v990_v25 = vrot.slane %v985_v24, 2  ;;  %v4446_v26 = vpop.f32.mrb[7].mxu1 }
 0x9cc   :  { %5233 = vtanh.f32 %v887_v21  ;;  %v4032_v30 = vmul.f32 -1.442695, %v887_v21 }
 0x9cd   :  { %v992_v27 = vadd.f32 %v990_v25, %v5966_v17 }
 0x9cf   :  { %5235 = vtanh.f32 %v992_v27  ;;  %v4034_v31 = vmul.f32 -1.442695, %v992_v27 }
 0x9d0   :  { %5237 = vpow2.f32 %v4032_v30 }
 0x9d1   :  { %5239 = vpow2.f32 %v4034_v31 }
 0x9d6   :  { %v5234_v28 = vpop.eup %5233 }
 0x9d7   :  { %899 = vrot.lane.b32.xlu0 %v5234_v28, %s5696_s20 }
 0x9d9   :  { %v5236_v29 = vpop.eup %5235 }
 0x9da   :  { %1005 = vrot.lane.b32.xlu1 %v5236_v29, %s5696_s20  ;;  %v5238_v32 = vpop.eup %5237 }
 0x9db   :  { %v5240_v33 = vpop.eup %5239  ;;  %v893_v35 = vadd.f32 1.0, %v5238_v32 }
 0x9dc   :  { %v996_v37 = vadd.f32 1.0, %v5240_v33 }
 0x9dd   :  { %5241 = vrcp.f32 %v893_v35 }
 0x9de   :  { %5243 = vrcp.f32 %v996_v37 }
 0x9e7   :  { %v5242_v38 = vpop.eup %5241 }
 0x9e8   :  { %v5244_v41 = vpop.eup %5243  ;;  %v897_v45 = vmul.f32 %v5242_v38, %v6085_v61 }
 0x9e9   :  { %v1003_v50 = vmul.f32 %v5244_v41, %v1001_v46 }
 0xa49   :  { %v900_v40 = vpop.permute.xlu0 %899 }
 0xa4a   :  { %v902_v17 = vmul.f32 %v5242_v38, %v900_v40 }
 0xa4c   :  { %v1006_v42 = vpop.permute.xlu1 %1005  ;;  %904 = vrot.lane.b32.xlu0 %v902_v17, %s5696_s20 }
 0xa4d   :  { %v1008_v44 = vmul.f32 %v5244_v41, %v1006_v42 }
 0xa4f   :  { %1010 = vrot.lane.b32.xlu1 %v1008_v44, %s5696_s20 }
 0xabe   :  { %v905_v47 = vpop.permute.xlu0 %904 }
 0xabf   :  { %v6126_v49 = vadd.f32 %v905_v47, %v897_v45 }
 0xac1   :  { %5245 = vtanh.f32 %v6126_v49  ;;  %v1011_v51 = vpop.permute.xlu1 %1010 }
 0xac2   :  { %v6129_v52 = vadd.f32 %v1011_v51, %v1003_v50 }
 0xac4   :  { %5247 = vtanh.f32 %v6129_v52  ;;  %v1212_v30 = vrot.slane %v6129_v52, 6 }
 0xacb   :  { %v5246_v53 = vpop.eup %5245 }
 0xacc   :  { %910 = vrot.lane.b32.xlu0 %v5246_v53, %s5696_s20 }
 0xace   :  { %v5248_v54 = vpop.eup %5247 }
 0xacf   :  { %1016 = vrot.lane.b32.xlu1 %v5248_v54, %s5696_s20 }
 0xb3e   :  { %v911_v55 = vpop.permute.xlu0 %910 }
 0xb3f   :  { %v913_v57 = vmul.f32 %v5242_v38, %v911_v55 }
 0xb41   :  { %v1025_v58 = vrot.slane %v913_v57, 2  ;;  %v6136_v59 = vadd.f32 %v1976_v56, %v913_v57  ;;  %v1017_v60 = vpop.permute.xlu1 %1016 }
 0xb42   :  { %v1019_v61 = vmul.f32 %v5244_v41, %v1017_v60 }
 0xb43   :  { %1026 = vrot.lane.b32.xlu1 %v1025_v58, %s5698_s4 }
 0xb44   :  { %1021 = vrot.lane.b32.xlu0 %v1019_v61, %s5697_s25  ;;  %v1128_v62 = vrot.slane %v1019_v61, 6 }
 0xb48   :  { %1129 = vrot.lane.b32.xlu0 %v1128_v62, %s5697_s25 }
 0xbb5   :  { %v1027_v63 = vpop.permute.xlu1 %1026 }
 0xbb6   :  { %v1022_v2 = vpop.permute.xlu0 %1021 }
 0xbb7   :  { %v1029_v3 = vsel %vm281_vm2, %v1022_v2, %v1027_v63 }
 0xbb8   :  { %v1031_v4 = vrot.slane %v1029_v3, 6 }
 0xbba   :  { %4464 = vmatmul.mubr.msk.f32.vlgmr.msra.gmra.mrb[8].mxu1 %vm391_vm3, %v1031_v4  ;;  %v1130_v22 = vpop.permute.xlu0 %1129 }
 0xbbb   :  { %4475 = vmatmul.mubr.msk.f32.vlgmr.msra.gmra.mrb[8].mxu0 %vm281_vm2, %v1130_v22  ;;  %4958 = vmatpush3.bf16.msra.mxu1 %v5938_v8 }
 0xbbc   :  { %4946 = vmatpush3.bf16.msra.mxu0 %v5983_v34  ;;  %4959 = vmatprep.subr.bf16.mxu1 %v5693_v0 }
 0xbbd   :  { %4947 = vmatprep.subr.bf16.mxu0 %v5693_v0  ;;  %4504 = vmatprep.mubr.msk.f32.mxu1 %vm5694_vm0, %v5695_v1 }
 0xbbe   :  { %4493 = vmatprep.mubr.msk.f32.mxu0 %vm5694_vm0, %v5695_v1 }
 0xbbf   :  { %4961 = vmatpush3.bf16.msra.mxu1 %v5945_v12 }
 0xbc0   :  { %4949 = vmatpush3.bf16.msra.mxu0 %v5989_v36  ;;  %4962 = vmatprep.subr.bf16.mxu1 %v5693_v0 }
 0xbc1   :  { %4950 = vmatprep.subr.bf16.mxu0 %v5693_v0 }
 0xbc4   :  { %4952 = vmatpush3.bf16.msra.mxu0 %v5999_v39 }
 0xbc5   :  { %4953 = vmatprep.subr.bf16.mxu0 %v5693_v0 }
 0xbc8   :  { %4955 = vmatpush3.bf16.msra.mxu0 %v6010_v43 }
 0xbc9   :  { %4974 = vmatprep.subr.bf16.mxu0 %v5693_v0 }
 0xc8d   :  { %v1100_v5 = vpop.f32.mrb[8].mxu1 }
 0xc8e   :  { %v1101_v6 = vadd.f32 %v6035_v48, %v1100_v5  ;;  %v4465_v7 = vpop.f32.mrb[9].mxu1  ;;  %v1199_v9 = vpop.f32.mrb[8].mxu0 }
 0xc8f   :  { %v1203_v10 = vadd.f32 %v1199_v9, %v5964_v15  ;;  %v4476_v11 = vpop.f32.mrb[9].mxu0 }
 0xc90   :  { %5249 = vtanh.f32 %v1101_v6  ;;  %v4036_v16 = vmul.f32 -1.442695, %v1101_v6 }
 0xc91   :  { %5251 = vtanh.f32 %v1203_v10  ;;  %v4038_v18 = vmul.f32 -1.442695, %v1203_v10 }
 0xc92   :  { %5253 = vpow2.f32 %v4036_v16 }
 0xc93   :  { %5255 = vpow2.f32 %v4038_v18 }
 0xc9a   :  { %v5250_v13 = vpop.eup %5249 }
 0xc9b   :  { %v5252_v14 = vpop.eup %5251  ;;  %1113 = vrot.lane.b32.xlu1 %v5250_v13, %s5696_s20 }
 0xc9c   :  { %1216 = vrot.lane.b32.xlu0 %v5252_v14, %s5696_s20  ;;  %v5254_v19 = vpop.eup %5253 }
 0xc9d   :  { %v5256_v20 = vpop.eup %5255  ;;  %v1107_v21 = vadd.f32 1.0, %v5254_v19 }
 0xc9e   :  { %v1207_v23 = vadd.f32 1.0, %v5256_v20 }
 0xc9f   :  { %5257 = vrcp.f32 %v1107_v21 }
 0xca0   :  { %5259 = vrcp.f32 %v1207_v23 }
 0xca9   :  { %v5258_v24 = vpop.eup %5257 }
 0xcaa   :  { %v5260_v26 = vpop.eup %5259  ;;  %v1111_v31 = vmul.f32 %v5258_v24, %v6126_v49 }
 0xcab   :  { %v1214_v33 = vmul.f32 %v5260_v26, %v1212_v30 }
 0xd0d   :  { %v1114_v25 = vpop.permute.xlu1 %1113 }
 0xd0e   :  { %v1116_v27 = vmul.f32 %v5258_v24, %v1114_v25  ;;  %v1217_v28 = vpop.permute.xlu0 %1216 }
 0xd0f   :  { %v1219_v29 = vmul.f32 %v5260_v26, %v1217_v28 }
 0xd10   :  { %1118 = vrot.lane.b32.xlu1 %v1116_v27, %s5696_s20 }
 0xd11   :  { %1221 = vrot.lane.b32.xlu0 %v1219_v29, %s5696_s20 }
 0xd82   :  { %v1119_v32 = vpop.permute.xlu1 %1118 }
 0xd83   :  { %v6168_v35 = vadd.f32 %v1119_v32, %v1111_v31  ;;  %v1222_v37 = vpop.permute.xlu0 %1221 }
 0xd84   :  { %v6170_v38 = vadd.f32 %v1222_v37, %v1214_v33 }
 0xd85   :  { %5261 = vtanh.f32 %v6168_v35 }
 0xd86   :  { %5263 = vtanh.f32 %v6170_v38  ;;  %v1421_v10 = vrot.slane %v6170_v38, 6 }
 0xd8f   :  { %v5262_v40 = vpop.eup %5261 }
 0xd90   :  { %v5264_v17 = vpop.eup %5263  ;;  %1124 = vrot.lane.b32.xlu1 %v5262_v40, %s5696_s20 }
 0xd91   :  { %1227 = vrot.lane.b32.xlu0 %v5264_v17, %s5696_s20 }
 0xe02   :  { %v1125_v41 = vpop.permute.xlu1 %1124 }
 0xe03   :  { %v1127_v42 = vmul.f32 %v5258_v24, %v1125_v41  ;;  %v1228_v44 = vpop.permute.xlu0 %1227 }
 0xe04   :  { %v1230_v45 = vmul.f32 %v5260_v26, %v1228_v44 }
 0xe05   :  { %v6177_v46 = vadd.f32 %v6136_v59, %v1127_v42  ;;  %1236 = vrot.lane.b32.xlu0 %v1127_v42, %s5698_s4 }
 0xe06   :  { %1232 = vrot.lane.b32.xlu1 %v1230_v45, %s5697_s25 }
 0xe77   :  { %v1237_v47 = vpop.permute.xlu0 %1236 }
 0xe78   :  { %v1233_v49 = vpop.permute.xlu1 %1232 }
 0xe79   :  { %v1239_v50 = vsel %vm281_vm2, %v1233_v49, %v1237_v47  ;;  %4505 = vmatmul.mubr.msk.f32.vlgmr.msra.gmra.mrb[10].mxu1 %vm281_vm2, %v1233_v49 }
 0xe7a   :  { %4494 = vmatmul.mubr.msk.f32.vlgmr.msra.gmra.mrb[10].mxu0 %vm391_vm3, %v1239_v50  ;;  %4964 = vmatpush3.bf16.msra.mxu1 %v5983_v34 }
 0xe7b   :  { %4965 = vmatprep.subr.bf16.mxu1 %v5693_v0  ;;  %4976 = vmatpush3.bf16.msra.mxu0 %v5938_v8 }
 0xe7c   :  { %4977 = vmatprep.subr.bf16.mxu0 %v5693_v0  ;;  %4523 = vmatprep.mubr.msk.f32.mxu1 %vm5694_vm0, %v5695_v1 }
 0xe7d   :  { %4534 = vmatprep.mubr.msk.f32.mxu0 %vm5694_vm0, %v5695_v1 }
 0xe7e   :  { %4967 = vmatpush3.bf16.msra.mxu1 %v5989_v36 }
 0xe7f   :  { %4968 = vmatprep.subr.bf16.mxu1 %v5693_v0  ;;  %4979 = vmatpush3.bf16.msra.mxu0 %v5945_v12 }
 0xe80   :  { %4980 = vmatprep.subr.bf16.mxu0 %v5693_v0 }
 0xe82   :  { %4970 = vmatpush3.bf16.msra.mxu1 %v5999_v39 }
 0xe83   :  { %4971 = vmatprep.subr.bf16.mxu1 %v5693_v0 }
 0xe86   :  { %4973 = vmatpush3.bf16.msra.mxu1 %v6010_v43 }
 0xe87   :  { %4992 = vmatprep.subr.bf16.mxu1 %v5693_v0 }
 0xf4c   :  { %v1405_v51 = vpop.f32.mrb[10].mxu1 }
 0xf4d   :  { %v1410_v52 = vrot.slane %v1405_v51, 6  ;;  %v1309_v53 = vpop.f32.mrb[10].mxu0  ;;  %v4506_v54 = vpop.f32.mrb[11].mxu1 }
 0xf4e   :  { %v1310_v55 = vadd.f32 %v6035_v48, %v1309_v53  ;;  %v4495_v56 = vpop.f32.mrb[11].mxu0 }
 0xf4f   :  { %v1412_v57 = vadd.f32 %v1410_v52, %v5964_v15 }
 0xf50   :  { %5265 = vtanh.f32 %v1310_v55  ;;  %v4040_v60 = vmul.f32 -1.442695, %v1310_v55 }
 0xf51   :  { %5267 = vtanh.f32 %v1412_v57  ;;  %v4042_v61 = vmul.f32 -1.442695, %v1412_v57 }
 0xf52   :  { %5269 = vpow2.f32 %v4040_v60 }
 0xf53   :  { %5271 = vpow2.f32 %v4042_v61 }
 0xf5a   :  { %v5266_v58 = vpop.eup %5265 }
 0xf5b   :  { %v5268_v59 = vpop.eup %5267  ;;  %1322 = vrot.lane.b32.xlu1 %v5266_v58, %s5696_s20 }
 0xf5c   :  { %1425 = vrot.lane.b32.xlu0 %v5268_v59, %s5696_s20  ;;  %v5270_v62 = vpop.eup %5269 }
 0xf5d   :  { %v5272_v63 = vpop.eup %5271  ;;  %v1316_v2 = vadd.f32 1.0, %v5270_v62 }
 0xf5e   :  { %v1416_v3 = vadd.f32 1.0, %v5272_v63 }
 0xf5f   :  { %5273 = vrcp.f32 %v1316_v2 }
 0xf60   :  { %5275 = vrcp.f32 %v1416_v3 }
 0xf69   :  { %v5274_v4 = vpop.eup %5273 }
 0xf6a   :  { %v5276_v5 = vpop.eup %5275  ;;  %v1320_v11 = vmul.f32 %v5274_v4, %v6168_v35 }
 0xf6b   :  { %v1423_v14 = vmul.f32 %v5276_v5, %v1421_v10 }
 0xfcd   :  { %v1323_v22 = vpop.permute.xlu1 %1322 }
 0xfce   :  { %v1325_v6 = vmul.f32 %v5274_v4, %v1323_v22  ;;  %v1426_v7 = vpop.permute.xlu0 %1425 }
 0xfcf   :  { %v1428_v9 = vmul.f32 %v5276_v5, %v1426_v7 }
 0xfd0   :  { %1327 = vrot.lane.b32.xlu1 %v1325_v6, %s5696_s20 }
 0xfd1   :  { %1430 = vrot.lane.b32.xlu0 %v1428_v9, %s5696_s20 }
0x1042   :  { %v1328_v13 = vpop.permute.xlu1 %1327 }
0x1043   :  { %v6208_v16 = vadd.f32 %v1328_v13, %v1320_v11  ;;  %v1431_v18 = vpop.permute.xlu0 %1430 }
0x1044   :  { %v6210_v19 = vadd.f32 %v1431_v18, %v1423_v14 }
0x1045   :  { %5277 = vtanh.f32 %v6208_v16 }
0x1046   :  { %5279 = vtanh.f32 %v6210_v19  ;;  %v1635_v59 = vrot.slane %v6210_v19, 6 }
0x104f   :  { %v5278_v20 = vpop.eup %5277 }
0x1050   :  { %v5280_v21 = vpop.eup %5279  ;;  %1333 = vrot.lane.b32.xlu1 %v5278_v20, %s5696_s20 }
0x1051   :  { %1436 = vrot.lane.b32.xlu0 %v5280_v21, %s5696_s20 }
0x10c2   :  { %v1334_v23 = vpop.permute.xlu1 %1333 }
0x10c3   :  { %v1336_v24 = vmul.f32 %v5274_v4, %v1334_v23  ;;  %v1437_v25 = vpop.permute.xlu0 %1436 }
0x10c4   :  { %v1439_v26 = vmul.f32 %v5276_v5, %v1437_v25 }
0x10c5   :  { %v1445_v27 = vrot.slane %v1336_v24, 6  ;;  %v6217_v28 = vadd.f32 %v6177_v46, %v1336_v24 }
0x10c6   :  { %1441 = vrot.lane.b32.xlu1 %v1439_v26, %s5697_s25  ;;  %v1548_v29 = vrot.slane %v1439_v26, 2 }
0x10c7   :  { %1446 = vrot.lane.b32.xlu0 %v1445_v27, %s5698_s4 }
0x10ca   :  { %1549 = vrot.lane.b32.xlu1 %v1548_v29, %s5697_s25 }
0x1138   :  { %v1442_v30 = vpop.permute.xlu1 %1441 }
0x1139   :  { %v1447_v31 = vpop.permute.xlu0 %1446 }
0x113a   :  { %v1449_v32 = vsel %vm281_vm2, %v1442_v30, %v1447_v31 }
0x113b   :  { %v1451_v33 = vrot.slane %v1449_v32, 2 }
0x113c   :  { %v1550_v35 = vpop.permute.xlu1 %1549 }
0x113d   :  { %4524 = vmatmul.mubr.msk.f32.vlgmr.msra.gmra.mrb[12].mxu1 %vm391_vm3, %v1451_v33  ;;  %4535 = vmatmul.mubr.msk.f32.vlgmr.msra.gmra.mrb[12].mxu0 %vm281_vm2, %v1550_v35 }
0x113e   :  { %4982 = vmatpush3.bf16.msra.mxu0 %v5983_v34  ;;  %4994 = vmatpush3.bf16.msra.mxu1 %v5938_v8 }
0x113f   :  { %4983 = vmatprep.subr.bf16.mxu0 %v5693_v0  ;;  %4995 = vmatprep.subr.bf16.mxu1 %v5693_v0 }
0x1140   :  { %4553 = vmatprep.mubr.msk.f32.mxu0 %vm5694_vm0, %v5695_v1  ;;  %4564 = vmatprep.mubr.msk.f32.mxu1 %vm5694_vm0, %v5695_v1 }
0x1142   :  { %4985 = vmatpush3.bf16.msra.mxu0 %v5989_v36  ;;  %4997 = vmatpush3.bf16.msra.mxu1 %v5945_v12 }
0x1143   :  { %4986 = vmatprep.subr.bf16.mxu0 %v5693_v0  ;;  %4998 = vmatprep.subr.bf16.mxu1 %v5693_v0 }
0x1146   :  { %4988 = vmatpush3.bf16.msra.mxu0 %v5999_v39 }
0x1147   :  { %4989 = vmatprep.subr.bf16.mxu0 %v5693_v0 }
0x114a   :  { %4991 = vmatpush3.bf16.msra.mxu0 %v6010_v43 }
0x114b   :  { %5010 = vmatprep.subr.bf16.mxu0 %v5693_v0 }
0x1210   :  { %v1520_v8 = vpop.f32.mrb[12].mxu1  ;;  %v1619_v37 = vpop.f32.mrb[12].mxu0 }
0x1211   :  { %v1521_v38 = vadd.f32 %v6035_v48, %v1520_v8  ;;  %v1624_v40 = vrot.slane %v1619_v37, 4  ;;  %v4525_v17 = vpop.f32.mrb[13].mxu1  ;;  %v4536_v41 = vpop.f32.mrb[13].mxu0 }
0x1213   :  { %5281 = vtanh.f32 %v1521_v38  ;;  %v1626_v12 = vadd.f32 %v1624_v40, %v5964_v15  ;;  %v4044_v45 = vmul.f32 -1.442695, %v1521_v38 }
0x1215   :  { %5283 = vtanh.f32 %v1626_v12  ;;  %v4046_v46 = vmul.f32 -1.442695, %v1626_v12 }
0x1216   :  { %5285 = vpow2.f32 %v4044_v45 }
0x1217   :  { %5287 = vpow2.f32 %v4046_v46 }
0x121d   :  { %v5282_v42 = vpop.eup %5281 }
0x121e   :  { %1533 = vrot.lane.b32.xlu0 %v5282_v42, %s5696_s20 }
0x121f   :  { %v5284_v44 = vpop.eup %5283 }
0x1220   :  { %1639 = vrot.lane.b32.xlu1 %v5284_v44, %s5696_s20  ;;  %v5286_v47 = vpop.eup %5285 }
0x1221   :  { %v5288_v49 = vpop.eup %5287  ;;  %v1527_v50 = vadd.f32 1.0, %v5286_v47 }
0x1222   :  { %v1630_v51 = vadd.f32 1.0, %v5288_v49 }
0x1223   :  { %5289 = vrcp.f32 %v1527_v50 }
0x1224   :  { %5291 = vrcp.f32 %v1630_v51 }
0x122d   :  { %v5290_v52 = vpop.eup %5289 }
0x122e   :  { %v5292_v55 = vpop.eup %5291  ;;  %v1531_v58 = vmul.f32 %v5290_v52, %v6208_v16 }
0x122f   :  { %v1637_v62 = vmul.f32 %v5292_v55, %v1635_v59 }
0x1290   :  { %v1534_v53 = vpop.permute.xlu0 %1533 }
0x1291   :  { %v1536_v54 = vmul.f32 %v5290_v52, %v1534_v53 }
0x1292   :  { %v1640_v56 = vpop.permute.xlu1 %1639 }
0x1293   :  { %1538 = vrot.lane.b32.xlu0 %v1536_v54, %s5696_s20  ;;  %v1642_v57 = vmul.f32 %v5292_v55, %v1640_v56 }
0x1295   :  { %1644 = vrot.lane.b32.xlu1 %v1642_v57, %s5696_s20 }
0x1305   :  { %v1539_v60 = vpop.permute.xlu0 %1538 }
0x1306   :  { %v6249_v61 = vadd.f32 %v1539_v60, %v1531_v58 }
0x1307   :  { %v1645_v63 = vpop.permute.xlu1 %1644 }
0x1308   :  { %5293 = vtanh.f32 %v6249_v61  ;;  %v6252_v2 = vadd.f32 %v1645_v63, %v1637_v62 }
0x130a   :  { %5295 = vtanh.f32 %v6252_v2  ;;  %v1849_v40 = vrot.slane %v6252_v2, 6 }
0x1312   :  { %v5294_v3 = vpop.eup %5293 }
0x1313   :  { %1544 = vrot.lane.b32.xlu0 %v5294_v3, %s5696_s20 }
0x1314   :  { %v5296_v4 = vpop.eup %5295 }
0x1315   :  { %1650 = vrot.lane.b32.xlu1 %v5296_v4, %s5696_s20 }
0x1385   :  { %v1545_v22 = vpop.permute.xlu0 %1544 }
0x1386   :  { %v1547_v5 = vmul.f32 %v5290_v52, %v1545_v22 }
0x1387   :  { %v1651_v9 = vpop.permute.xlu1 %1650 }
0x1388   :  { %v1659_v6 = vrot.slane %v1547_v5, 4  ;;  %v6258_v7 = vadd.f32 %v6217_v28, %v1547_v5  ;;  %v1653_v10 = vmul.f32 %v5292_v55, %v1651_v9  ;;  %v1984_v9 = vld [vmem:[%s6740_s6 + $0x8] sm:$0xff] }
0x138a   :  { %1660 = vrot.lane.b32.xlu1 %v1659_v6, %s5698_s4  ;;  %1655 = vrot.lane.b32.xlu0 %v1653_v10, %s5697_s25  ;;  %v1762_v11 = vrot.slane %v1653_v10, 4  ;;  %v1985_v10 = vld [vmem:[%s6740_s6 + $0x10] sm:$0xff] }
0x138e   :  { %1763 = vrot.lane.b32.xlu0 %v1762_v11, %s5697_s25 }
0x13fc   :  { %v1661_v13 = vpop.permute.xlu1 %1660  ;;  %v1656_v14 = vpop.permute.xlu0 %1655 }
0x13fd   :  { %v1663_v16 = vsel %vm281_vm2, %v1656_v14, %v1661_v13  ;;  %v1986_v13 = vld [vmem:[%s6740_s6 + $0x18] sm:$0xff] }
0x13fe   :  { %v1665_v18 = vrot.slane %v1663_v16, 4  ;;  %v5014_v14 = vpack.c.bf16 %v1986_v13, %v1985_v10 }
0x1400   :  { %v1764_v19 = vpop.permute.xlu0 %1763  ;;  %4554 = vmatmul.mubr.msk.f32.vlgmr.msra.gmra.mrb[14].mxu0 %vm391_vm3, %v1665_v18 }
0x1401   :  { %4565 = vmatmul.mubr.msk.f32.vlgmr.msra.gmra.mrb[14].mxu1 %vm281_vm2, %v1764_v19  ;;  %4594 = vmatprep.mubr.msk.f32.mxu0 %vm5694_vm0, %v5695_v1 }
0x1402   :  { %5000 = vmatpush3.bf16.msra.mxu1 %v5983_v34  ;;  %4583 = vmatprep.mubr.msk.f32.mxu1 %vm5694_vm0, %v5695_v1 }
0x1403   :  { %5001 = vmatprep.subr.bf16.mxu1 %v5693_v0 }
0x1406   :  { %5003 = vmatpush3.bf16.msra.mxu1 %v5989_v36 }
0x1407   :  { %5004 = vmatprep.subr.bf16.mxu1 %v5693_v0 }
0x140a   :  { %5006 = vmatpush3.bf16.msra.mxu1 %v5999_v39 }
0x140b   :  { %5007 = vmatprep.subr.bf16.mxu1 %v5693_v0 }
0x140e   :  { %5009 = vmatpush3.bf16.msra.mxu1 %v6010_v43 }
0x140f   :  { %5022 = vmatprep.subr.bf16.mxu1 %v5693_v0 }
0x14d3   :  { %v1734_v20 = vpop.f32.mrb[14].mxu0 }
0x14d4   :  { %v1735_v34 = vadd.f32 %v6035_v48, %v1734_v20  ;;  %v4555_v21 = vpop.f32.mrb[15].mxu0  ;;  %v1833_v23 = vpop.f32.mrb[14].mxu1 }
0x14d5   :  { %v1838_v24 = vrot.slane %v1833_v23, 2  ;;  %v4566_v25 = vpop.f32.mrb[15].mxu1  ;;  %v2070_v21 = vld [vmem:[#allocation10 + $0x8] sm:$0xff] }
0x14d6   :  { %5297 = vtanh.f32 %v1735_v34  ;;  %v4048_v43 = vmul.f32 -1.442695, %v1735_v34  ;;  %v2069_v34 = vld [vmem:[#allocation10] sm:$0xff]  ;;  %v178_v25 = vld [vmem:[%s6746_s12] sm:$0xff] }
0x14d7   :  { %v1840_v36 = vadd.f32 %v1838_v24, %v5964_v15  ;;  %v5017_v23 = vpack.c.bf16 %v2070_v21, %v2069_v34 }
0x14d9   :  { %5299 = vtanh.f32 %v1840_v36  ;;  %v4050_v27 = vmul.f32 -1.442695, %v1840_v36  ;;  %v179_v36 = vld [vmem:[%s6746_s12 + $0x8] sm:$0xff] }
0x14da   :  { %5301 = vpow2.f32 %v4048_v43  ;;  %v181_v43 = vld [vmem:[%s6746_s12 + $0x18] sm:$0xff] }
0x14db   :  { %5303 = vpow2.f32 %v4050_v27 }
0x14e0   :  { %v5298_v26 = vpop.eup %5297 }
0x14e1   :  { %1747 = vrot.lane.b32.xlu1 %v5298_v26, %s5696_s20  ;;  %v6324_v26 = vpack.c.bf16 %v179_v36, %v178_v25 }
0x14e3   :  { %v5300_v39 = vpop.eup %5299 }
0x14e4   :  { %1853 = vrot.lane.b32.xlu0 %v5300_v39, %s5696_s20  ;;  %v5302_v28 = vpop.eup %5301  ;;  %v180_v39 = vld [vmem:[%s6746_s12 + $0x10] sm:$0xff] }
0x14e5   :  { %v5304_v29 = vpop.eup %5303  ;;  %v1741_v30 = vadd.f32 1.0, %v5302_v28  ;;  %v6334_v27 = vpack.c.bf16 %v181_v43, %v180_v39  ;;  %v2158_v28 = vld [vmem:[#allocation13] sm:$0xff] }
0x14e6   :  { %v1844_v31 = vadd.f32 1.0, %v5304_v29  ;;  %v2159_v29 = vld [vmem:[#allocation13 + $0x8] sm:$0xff] }
0x14e7   :  { %5305 = vrcp.f32 %v1741_v30  ;;  %v4053_v30 = vld [vmem:[#allocation8] ss:$0 sm:$0xff] }
0x14e8   :  { %5307 = vrcp.f32 %v1844_v31 }
0x14f1   :  { %v5306_v32 = vpop.eup %5305 }
0x14f2   :  { %v5308_v35 = vpop.eup %5307  ;;  %v1745_v38 = vmul.f32 %v5306_v32, %v6249_v61 }
0x14f3   :  { %v1851_v12 = vmul.f32 %v5308_v35, %v1849_v40 }
0x1553   :  { %v1748_v33 = vpop.permute.xlu1 %1747 }
0x1554   :  { %v1750_v15 = vmul.f32 %v5306_v32, %v1748_v33 }
0x1556   :  { %v1854_v8 = vpop.permute.xlu0 %1853  ;;  %1752 = vrot.lane.b32.xlu1 %v1750_v15, %s5696_s20 }
0x1557   :  { %v1856_v37 = vmul.f32 %v5308_v35, %v1854_v8 }
0x1559   :  { %1858 = vrot.lane.b32.xlu0 %v1856_v37, %s5696_s20  ;;  %v4055_v37 = vld [vmem:[#allocation11] ss:$0 sm:$0xff] }
0x15c8   :  { %v1753_v17 = vpop.permute.xlu1 %1752 }
0x15c9   :  { %v1755_v41 = vadd.f32 %v1753_v17, %v1745_v38 }
0x15cb   :  { %5309 = vtanh.f32 %v1755_v41  ;;  %v1859_v42 = vpop.permute.xlu0 %1858 }
0x15cc   :  { %v1861_v44 = vadd.f32 %v1859_v42, %v1851_v12 }
0x15ce   :  { %5311 = vtanh.f32 %v1861_v44 }
0x15d5   :  { %v5310_v45 = vpop.eup %5309 }
0x15d6   :  { %1758 = vrot.lane.b32.xlu1 %v5310_v45, %s5696_s20 }
0x15d8   :  { %v5312_v46 = vpop.eup %5311 }
0x15d9   :  { %1864 = vrot.lane.b32.xlu0 %v5312_v46, %s5696_s20 }
0x1648   :  { %v1759_v47 = vpop.permute.xlu1 %1758 }
0x1649   :  { %v1761_v49 = vmul.f32 %v5306_v32, %v1759_v47  ;;  %v5020_v32 = vpack.c.bf16 %v2159_v29, %v2158_v28 }
0x164b   :  { %v1873_v50 = vrot.slane %v1761_v49, 2  ;;  %v1981_v51 = vadd.f32 %v6258_v7, %v1761_v49  ;;  %v1865_v52 = vpop.permute.xlu0 %1864 }
0x164c   :  { %v1867_v53 = vmul.f32 %v5308_v35, %v1865_v52 }
0x164d   :  { %1874 = vrot.lane.b32.xlu0 %v1873_v50, %s5698_s4 }
0x164e   :  { %1869 = vrot.lane.b32.xlu1 %v1867_v53, %s5697_s25 }
0x16bf   :  { %v1875_v54 = vpop.permute.xlu0 %1874 }
0x16c0   :  { %v1870_v55 = vpop.permute.xlu1 %1869 }
0x16c1   :  { %v1877_v56 = vsel %vm281_vm2, %v1870_v55, %v1875_v54 }
0x16c2   :  { %v1879_v57 = vrot.slane %v1877_v56, 6 }
0x16c4   :  { %4584 = vmatmul.mubr.msk.f32.vlgmr.msra.gmra.mrb[16].mxu1 %vm391_vm3, %v1879_v57  ;;  %v182_v57 = vld [vmem:[%s6747_s13] sm:$0xff] }
0x16c5   :  { %4619 = vmatprep.mubr.msk.f32.mxu1 %vm5694_vm0, %v5695_v1  ;;  %5024 = vmatpush3.bf16.msra.mxu1 %v6324_v26 }
0x16c6   :  { %5025 = vmatprep.subr.bf16.mxu1 %v5693_v0 }
0x16c9   :  { %5027 = vmatpush3.bf16.msra.mxu1 %v6334_v27 }
0x16ca   :  { %5040 = vmatprep.subr.bf16.mxu1 %v5693_v0 }
0x16cc   :  { %4620 = vmatmul.mubr.f32.vlgmr.msra.gmra.mrb[18].mxu1 %v5695_v1 }
0x16cd   :  { %5042 = vmatpush3.bf16.msra.mxu1 %v6324_v26  ;;  %4649 = vmatprep.mubr.msk.f32.mxu1 %vm5694_vm0, %v5695_v1 }
0x16ce   :  { %5043 = vmatprep.subr.bf16.mxu1 %v5693_v0 }
0x16d1   :  { %5045 = vmatpush3.bf16.msra.mxu1 %v6334_v27 }
0x16d2   :  { %5046 = vmatprep.subr.bf16.mxu1 %v5693_v0 }
0x1797   :  { %v1948_v58 = vpop.f32.mrb[16].mxu1 }
0x1798   :  { %v1949_v59 = vadd.f32 %v6035_v48, %v1948_v58  ;;  %v4585_v60 = vpop.f32.mrb[17].mxu1  ;;  %v1983_v48 = vld [vmem:[%s6740_s6] sm:$0xff]  ;;  %v183_v58 = vld [vmem:[%s6747_s13 + $0x8] sm:$0xff] }
0x1799   :  { %v5011_v11 = vpack.c.bf16 %v1984_v9, %v1983_v48  ;;  %v6373_v60 = vpack.c.bf16 %v183_v58, %v182_v57 }
0x179a   :  { %5313 = vtanh.f32 %v1949_v59  ;;  %v4052_v62 = vmul.f32 -1.442695, %v1949_v59  ;;  %v184_v59 = vld [vmem:[%s6747_s13 + $0x10] sm:$0xff] }
0x179b   :  { %5012 = vmatpush3.bf16.msra.mxu0 %v5011_v11  ;;  %v6428_v11 = vld [vmem:[%s6748_s14] ss:$0 sm:$0xff]  ;;  %s5699_s14 = smov 112  }
0x179c   :  { %5315 = vpow2.f32 %v4052_v62  ;;  %5013 = vmatprep.subr.bf16.mxu0 %v5693_v0 }
0x179f   :  { %5015 = vmatpush3.bf16.msra.mxu0 %v5014_v14  ;;  %v2303_v35 = vpop.f32.mrb[18].mxu1 }
0x17a0   :  { %5016 = vmatprep.subr.bf16.mxu0 %v5693_v0  ;;  %v4621_v8 = vpop.f32.mrb[19].mxu1 }
0x17a4   :  { %v5314_v61 = vpop.eup %5313 }
0x17a5   :  { %1961 = vrot.lane.b32.xlu1 %v5314_v61, %s5696_s20  ;;  %v185_v61 = vld [vmem:[%s6747_s13 + $0x18] sm:$0xff] }
0x17a6   :  { %v5316_v63 = vpop.eup %5315  ;;  %v6379_v62 = vpack.c.bf16 %v185_v61, %v184_v59 }
0x17a7   :  { %v1955_v2 = vadd.f32 1.0, %v5316_v63  ;;  %v186_v63 = vld [vmem:[%s6747_s13 + $0x20] sm:$0xff] }
0x17a9   :  { %5317 = vrcp.f32 %v1955_v2  ;;  %v187_v2 = vld [vmem:[%s6747_s13 + $0x28] sm:$0xff] }
0x17b3   :  { %v5318_v3 = vpop.eup %5317 }
0x17b4   :  { %v1959_v5 = vmul.f32 %v5318_v3, %v1755_v41  ;;  %v4057_v41 = vld [vmem:[#allocation14] ss:$0 sm:$0xff] }
0x1817   :  { %v1962_v4 = vpop.permute.xlu1 %1961 }
0x1818   :  { %v1964_v22 = vmul.f32 %v5318_v3, %v1962_v4  ;;  %v188_v4 = vld [vmem:[%s6747_s13 + $0x30] sm:$0xff] }
0x181a   :  { %1966 = vrot.lane.b32.xlu0 %v1964_v22, %s5696_s20  ;;  %v189_v22 = vld [vmem:[%s6747_s13 + $0x38] sm:$0xff] }
0x188c   :  { %v1967_v6 = vpop.permute.xlu0 %1966 }
0x188d   :  { %v1969_v7 = vadd.f32 %v1967_v6, %v1959_v5  ;;  %v6400_v6 = vpack.c.bf16 %v189_v22, %v188_v4 }
0x188f   :  { %5319 = vtanh.f32 %v1969_v7 }
0x1899   :  { %v5320_v16 = vpop.eup %5319 }
0x189a   :  { %1972 = vrot.lane.b32.xlu1 %v5320_v16, %s5696_s20 }
0x190c   :  { %v1973_v18 = vpop.permute.xlu1 %1972 }
0x190d   :  { %v1975_v19 = vmul.f32 %v5318_v3, %v1973_v18  ;;  %v6389_v3 = vpack.c.bf16 %v187_v2, %v186_v63 }
0x190f   :  { %v1982_v20 = vadd.f32 %v1981_v51, %v1975_v19 }
0x1911   :  { %1995 = vrot.lane.b32.xlu0 %v1982_v20, %s5697_s25 }
0x1983   :  { %v1996_v24 = vpop.permute.xlu0 %1995 }
0x1984   :  { %4595 = vmatmul.mubr.msk.f32.vlgmr.msra.gmra.mrb[16].mxu0 %vm281_vm2, %v1996_v24 }
0x1985   :  { %5018 = vmatpush3.bf16.msra.mxu0 %v5017_v23  ;;  %4601 = vmatprep.mubr.msk.f32.mxu0 %vm5694_vm0, %v5695_v1 }
0x1986   :  { %5019 = vmatprep.subr.bf16.mxu0 %v5693_v0 }
0x1a57   :  { %v2065_v31 = vpop.f32.mrb[16].mxu0 }
0x1a58   :  { %v2066_v33 = vadd.f32 %v4053_v30, %v2065_v31  ;;  %v4596_v15 = vpop.f32.mrb[17].mxu0 }
0x1a5a   :  { %4602 = vmatmul.mubr.msk.f32.vlgmr.msra.gmra.mrb[18].mxu0 %vm199_vm1, %v2066_v33 }
0x1a5b   :  { %5021 = vmatpush3.bf16.msra.mxu0 %v5020_v32  ;;  %4608 = vmatprep.mubr.msk.f32.mxu0 %vm5694_vm0, %v5695_v1 }
0x1a5c   :  { %5028 = vmatprep.subr.bf16.mxu0 %v5693_v0 }
0x1a5e   :  { %4609 = vmatmul.mubr.msk.f32.vlgmr.msra.gmra.mrb[20].mxu0 %vm199_vm1, %v2066_v33 }
0x1a5f   :  { %4638 = vmatprep.mubr.msk.f32.mxu0 %vm5694_vm0, %v5695_v1  ;;  %5030 = vmatpush3.bf16.msra.mxu0 %v6373_v60 }
0x1a60   :  { %5031 = vmatprep.subr.bf16.mxu0 %v5693_v0 }
0x1a63   :  { %5033 = vmatpush3.bf16.msra.mxu0 %v6379_v62 }
0x1a64   :  { %5034 = vmatprep.subr.bf16.mxu0 %v5693_v0 }
0x1a67   :  { %5036 = vmatpush3.bf16.msra.mxu0 %v6389_v3 }
0x1a68   :  { %5037 = vmatprep.subr.bf16.mxu0 %v5693_v0 }
0x1a6b   :  { %5039 = vmatpush3.bf16.msra.mxu0 %v6400_v6 }
0x1a6c   :  { %5058 = vmatprep.subr.bf16.mxu0 %v5693_v0 }
0x1b2d   :  { %v2147_v38 = vpop.f32.mrb[18].mxu0 }
0x1b2e   :  { %v6352_v40 = vadd.f32 %v4055_v37, %v2147_v38  ;;  %v4603_v17 = vpop.f32.mrb[19].mxu0 }
0x1b30   :  { %2152 = vst.msk [vmem:[#allocation16] sm:$0x3] %vm2151_vm4, %v6352_v40 }
0x1b31   :  { %v2233_v12 = vpop.f32.mrb[20].mxu0 }
0x1b32   :  { %v6356_v42 = vadd.f32 %v4057_v41, %v2233_v12  ;;  %v4610_v44 = vpop.f32.mrb[21].mxu0 }
0x1b34   :  { %v2307_v45 = vadd.f32 %v2303_v35, %v6356_v42 }
0x1b36   :  { %5321 = vtanh.f32 %v2307_v45  ;;  %v4059_v47 = vmul.f32 -1.442695, %v2307_v45 }
0x1b38   :  { %5323 = vpow2.f32 %v4059_v47 }
0x1b40   :  { %v5322_v46 = vpop.eup %5321 }
0x1b41   :  { %2317 = vrot.lane.b32.xlu1 %v5322_v46, %s5696_s20 }
0x1b42   :  { %v5324_v49 = vpop.eup %5323 }
0x1b43   :  { %v2311_v50 = vadd.f32 1.0, %v5324_v49 }
0x1b45   :  { %5325 = vrcp.f32 %v2311_v50 }
0x1b4f   :  { %v5326_v51 = vpop.eup %5325 }
0x1b50   :  { %v2315_v54 = vmul.f32 0.0, %v5326_v51 }
0x1bb3   :  { %v2318_v52 = vpop.permute.xlu1 %2317 }
0x1bb4   :  { %v2320_v53 = vmul.f32 %v5326_v51, %v2318_v52 }
0x1bb6   :  { %2322 = vrot.lane.b32.xlu0 %v2320_v53, %s5696_s20 }
0x1c28   :  { %v2323_v55 = vpop.permute.xlu0 %2322 }
0x1c29   :  { %v6361_v56 = vadd.f32 %v2323_v55, %v2315_v54 }
0x1c2b   :  { %5327 = vtanh.f32 %v6361_v56 }
0x1c35   :  { %v5328_v5 = vpop.eup %5327 }
0x1c36   :  { %2328 = vrot.lane.b32.xlu1 %v5328_v5, %s5696_s20 }
0x1ca8   :  { %v2329_v7 = vpop.permute.xlu1 %2328 }
0x1ca9   :  { %v2331_v48 = vmul.f32 %v5326_v51, %v2329_v7 }
0x1cab   :  { %2333 = vrot.lane.b32.xlu0 %v2331_v48, %s5697_s25 }
0x1d1d   :  { %v2334_v9 = vpop.permute.xlu0 %2333 }
0x1d1e   :  { %v2336_v10 = vsel %vm281_vm2, %v2334_v9, 0.0  ;;  %4650 = vmatmul.mubr.msk.f32.vlgmr.msra.gmra.mrb[20].mxu1 %vm281_vm2, %v2334_v9 }
0x1d1f   :  { %4639 = vmatmul.mubr.msk.f32.vlgmr.msra.gmra.mrb[22].mxu0 %vm391_vm3, %v2336_v10  ;;  %5048 = vmatpush3.bf16.msra.mxu1 %v6373_v60 }
0x1d20   :  { %5049 = vmatprep.subr.bf16.mxu1 %v5693_v0  ;;  %5060 = vmatpush3.bf16.msra.mxu0 %v6324_v26 }
0x1d21   :  { %5061 = vmatprep.subr.bf16.mxu0 %v5693_v0  ;;  %4679 = vmatprep.mubr.msk.f32.mxu0 %vm5694_vm0, %v5695_v1 }
0x1d22   :  { %4668 = vmatprep.mubr.msk.f32.mxu1 %vm5694_vm0, %v5695_v1 }
0x1d23   :  { %5051 = vmatpush3.bf16.msra.mxu1 %v6379_v62 }
0x1d24   :  { %5052 = vmatprep.subr.bf16.mxu1 %v5693_v0  ;;  %5063 = vmatpush3.bf16.msra.mxu0 %v6334_v27 }
0x1d25   :  { %5064 = vmatprep.subr.bf16.mxu0 %v5693_v0 }
0x1d27   :  { %5054 = vmatpush3.bf16.msra.mxu1 %v6389_v3 }
0x1d28   :  { %5055 = vmatprep.subr.bf16.mxu1 %v5693_v0 }
0x1d2b   :  { %5057 = vmatpush3.bf16.msra.mxu1 %v6400_v6 }
0x1d2c   :  { %5076 = vmatprep.subr.bf16.mxu1 %v5693_v0 }
0x1df1   :  { %v2508_v13 = vpop.f32.mrb[20].mxu1 }
0x1df2   :  { %v2512_v14 = vadd.f32 %v2508_v13, %v6356_v42  ;;  %v2412_v16 = vpop.f32.mrb[22].mxu0  ;;  %v4651_v18 = vpop.f32.mrb[21].mxu1 }
0x1df3   :  { %v2413_v19 = vadd.f32 %v6428_v11, %v2412_v16  ;;  %v4640_v20 = vpop.f32.mrb[23].mxu0 }
0x1df4   :  { %5329 = vtanh.f32 %v2512_v14  ;;  %v4064_v23 = vmul.f32 -1.442695, %v2512_v14 }
0x1df5   :  { %5331 = vtanh.f32 %v2413_v19  ;;  %v4062_v24 = vmul.f32 -1.442695, %v2413_v19 }
0x1df6   :  { %5333 = vpow2.f32 %v4064_v23 }
0x1df7   :  { %5335 = vpow2.f32 %v4062_v24 }
0x1dfe   :  { %v5330_v34 = vpop.eup %5329 }
0x1dff   :  { %v5332_v21 = vpop.eup %5331  ;;  %2522 = vrot.lane.b32.xlu0 %v5330_v34, %s5696_s20 }
0x1e00   :  { %2425 = vrot.lane.b32.xlu1 %v5332_v21, %s5696_s20  ;;  %v5334_v25 = vpop.eup %5333 }
0x1e01   :  { %v5336_v36 = vpop.eup %5335  ;;  %v2516_v39 = vadd.f32 1.0, %v5334_v25 }
0x1e02   :  { %v2419_v43 = vadd.f32 1.0, %v5336_v36 }
0x1e03   :  { %5337 = vrcp.f32 %v2516_v39 }
0x1e04   :  { %5339 = vrcp.f32 %v2419_v43 }
0x1e0d   :  { %v5338_v28 = vpop.eup %5337 }
0x1e0e   :  { %v5340_v30 = vpop.eup %5339  ;;  %v2520_v15 = vmul.f32 %v5338_v28, %v6361_v56 }
0x1e0f   :  { %v2423_v8 = vmul.f32 0.0, %v5340_v30 }
0x1e71   :  { %v2523_v29 = vpop.permute.xlu0 %2522 }
0x1e72   :  { %v2525_v31 = vmul.f32 %v5338_v28, %v2523_v29  ;;  %v2426_v32 = vpop.permute.xlu1 %2425 }
0x1e73   :  { %v2428_v33 = vmul.f32 %v5340_v30, %v2426_v32 }
0x1e74   :  { %2527 = vrot.lane.b32.xlu0 %v2525_v31, %s5696_s20 }
0x1e75   :  { %2430 = vrot.lane.b32.xlu1 %v2428_v33, %s5696_s20 }
0x1ee6   :  { %v2528_v35 = vpop.permute.xlu0 %2527 }
0x1ee7   :  { %v6437_v37 = vadd.f32 %v2528_v35, %v2520_v15  ;;  %v2431_v38 = vpop.permute.xlu1 %2430 }
0x1ee8   :  { %v6439_v17 = vadd.f32 %v2431_v38, %v2423_v8 }
0x1ee9   :  { %5341 = vtanh.f32 %v6437_v37 }
0x1eea   :  { %5343 = vtanh.f32 %v6439_v17 }
0x1ef3   :  { %v5342_v41 = vpop.eup %5341 }
0x1ef4   :  { %v5344_v12 = vpop.eup %5343  ;;  %2533 = vrot.lane.b32.xlu0 %v5342_v41, %s5696_s20 }
0x1ef5   :  { %2436 = vrot.lane.b32.xlu1 %v5344_v12, %s5696_s20 }
0x1f66   :  { %v2534_v44 = vpop.permute.xlu0 %2533 }
0x1f67   :  { %v2536_v45 = vmul.f32 %v5338_v28, %v2534_v44  ;;  %v2437_v46 = vpop.permute.xlu1 %2436 }
0x1f68   :  { %v6445_v47 = vmul.f32 %v5340_v30, %v2437_v46 }
0x1f69   :  { %2538 = vrot.lane.b32.xlu1 %v2536_v45, %s5697_s25 }
0x1f6a   :  { %2542 = vrot.lane.b32.xlu0 %v6445_v47, %s5698_s4 }
0x1fdb   :  { %v2539_v49 = vpop.permute.xlu1 %2538 }
0x1fdc   :  { %v2543_v50 = vpop.permute.xlu0 %2542  ;;  %4680 = vmatmul.mubr.msk.f32.vlgmr.msra.gmra.mrb[24].mxu0 %vm281_vm2, %v2539_v49 }
0x1fdd   :  { %v2545_v51 = vsel %vm281_vm2, %v2539_v49, %v2543_v50  ;;  %5066 = vmatpush3.bf16.msra.mxu0 %v6373_v60  ;;  %4698 = vmatprep.mubr.msk.f32.mxu0 %vm5694_vm0, %v5695_v1 }
0x1fde   :  { %4669 = vmatmul.mubr.msk.f32.vlgmr.msra.gmra.mrb[22].mxu1 %vm391_vm3, %v2545_v51  ;;  %5067 = vmatprep.subr.bf16.mxu0 %v5693_v0 }
0x1fdf   :  { %5078 = vmatpush3.bf16.msra.mxu1 %v6324_v26  ;;  %4709 = vmatprep.mubr.msk.f32.mxu1 %vm5694_vm0, %v5695_v1 }
0x1fe0   :  { %5079 = vmatprep.subr.bf16.mxu1 %v5693_v0 }
0x1fe1   :  { %5069 = vmatpush3.bf16.msra.mxu0 %v6379_v62 }
0x1fe2   :  { %5070 = vmatprep.subr.bf16.mxu0 %v5693_v0 }
0x1fe3   :  { %5081 = vmatpush3.bf16.msra.mxu1 %v6334_v27 }
0x1fe4   :  { %5082 = vmatprep.subr.bf16.mxu1 %v5693_v0 }
0x1fe5   :  { %5072 = vmatpush3.bf16.msra.mxu0 %v6389_v3 }
0x1fe6   :  { %5073 = vmatprep.subr.bf16.mxu0 %v5693_v0 }
0x1fe9   :  { %5075 = vmatpush3.bf16.msra.mxu0 %v6400_v6 }
0x1fea   :  { %5094 = vmatprep.subr.bf16.mxu0 %v5693_v0 }
0x20af   :  { %v2711_v52 = vpop.f32.mrb[24].mxu0 }
0x20b0   :  { %v2715_v53 = vadd.f32 %v2711_v52, %v6356_v42  ;;  %v4681_v54 = vpop.f32.mrb[25].mxu0 }
0x20b1   :  { %v2615_v55 = vpop.f32.mrb[22].mxu1 }
0x20b2   :  { %5345 = vtanh.f32 %v2715_v53  ;;  %v2616_v56 = vadd.f32 %v6428_v11, %v2615_v55  ;;  %v4670_v57 = vpop.f32.mrb[23].mxu1  ;;  %v4068_v61 = vmul.f32 -1.442695, %v2715_v53 }
0x20b4   :  { %5347 = vtanh.f32 %v2616_v56  ;;  %v4066_v63 = vmul.f32 -1.442695, %v2616_v56 }
0x20b5   :  { %5349 = vpow2.f32 %v4068_v61 }
0x20b6   :  { %5351 = vpow2.f32 %v4066_v63 }
0x20bc   :  { %v5346_v58 = vpop.eup %5345 }
0x20bd   :  { %2725 = vrot.lane.b32.xlu0 %v5346_v58, %s5696_s20 }
0x20be   :  { %v5348_v59 = vpop.eup %5347 }
0x20bf   :  { %2628 = vrot.lane.b32.xlu1 %v5348_v59, %s5696_s20  ;;  %v5350_v2 = vpop.eup %5349 }
0x20c0   :  { %v5352_v4 = vpop.eup %5351  ;;  %v2719_v22 = vadd.f32 1.0, %v5350_v2 }
0x20c1   :  { %v2622_v5 = vadd.f32 1.0, %v5352_v4 }
0x20c2   :  { %5353 = vrcp.f32 %v2719_v22 }
0x20c3   :  { %5355 = vrcp.f32 %v2622_v5 }
0x20cc   :  { %v5354_v7 = vpop.eup %5353 }
0x20cd   :  { %v5356_v10 = vpop.eup %5355  ;;  %v2723_v16 = vmul.f32 %v5354_v7, %v6437_v37 }
0x20ce   :  { %v2626_v20 = vmul.f32 %v5356_v10, %v6439_v17 }
0x212f   :  { %v2726_v48 = vpop.permute.xlu0 %2725 }
0x2130   :  { %v2728_v9 = vmul.f32 %v5354_v7, %v2726_v48 }
0x2131   :  { %v2629_v13 = vpop.permute.xlu1 %2628 }
0x2132   :  { %2730 = vrot.lane.b32.xlu0 %v2728_v9, %s5696_s20  ;;  %v2631_v14 = vmul.f32 %v5356_v10, %v2629_v13 }
0x2134   :  { %2633 = vrot.lane.b32.xlu1 %v2631_v14, %s5696_s20 }
0x21a4   :  { %v2731_v18 = vpop.permute.xlu0 %2730 }
0x21a5   :  { %v6476_v19 = vadd.f32 %v2731_v18, %v2723_v16 }
0x21a6   :  { %v2634_v34 = vpop.permute.xlu1 %2633 }
0x21a7   :  { %5357 = vtanh.f32 %v6476_v19  ;;  %v6480_v21 = vadd.f32 %v2634_v34, %v2626_v20 }
0x21a9   :  { %5359 = vtanh.f32 %v6480_v21 }
0x21b1   :  { %v5358_v23 = vpop.eup %5357 }
0x21b2   :  { %2736 = vrot.lane.b32.xlu0 %v5358_v23, %s5696_s20 }
0x21b3   :  { %v5360_v24 = vpop.eup %5359 }
0x21b4   :  { %2639 = vrot.lane.b32.xlu1 %v5360_v24, %s5696_s20 }
0x2224   :  { %v2737_v25 = vpop.permute.xlu0 %2736 }
0x2225   :  { %v2739_v36 = vmul.f32 %v5354_v7, %v2737_v25 }
0x2226   :  { %v2640_v39 = vpop.permute.xlu1 %2639 }
0x2227   :  { %2741 = vrot.lane.b32.xlu1 %v2739_v36, %s5697_s25  ;;  %v6486_v43 = vmul.f32 %v5356_v10, %v2640_v39 }
0x2229   :  { %2745 = vrot.lane.b32.xlu0 %v6486_v43, %s5698_s4  ;;  %v3861_v5 = vrot.slane %v6486_v43, 6 }
0x222b   :  { %v3875_v10 = vsel %vm3874_vm5, %v6445_v47, %v3861_v5 }
0x2299   :  { %v2742_v28 = vpop.permute.xlu1 %2741 }
0x229a   :  { %4710 = vmatmul.mubr.msk.f32.vlgmr.msra.gmra.mrb[24].mxu1 %vm281_vm2, %v2742_v28 }
0x229b   :  { %5084 = vmatpush3.bf16.msra.mxu1 %v6373_v60  ;;  %4728 = vmatprep.mubr.msk.f32.mxu1 %vm5694_vm0, %v5695_v1  ;;  %v2746_v29 = vpop.permute.xlu0 %2745 }
0x229c   :  { %5085 = vmatprep.subr.bf16.mxu1 %v5693_v0  ;;  %v2748_v30 = vsel %vm281_vm2, %v2742_v28, %v2746_v29 }
0x229d   :  { %4699 = vmatmul.mubr.msk.f32.vlgmr.msra.gmra.mrb[26].mxu0 %vm391_vm3, %v2748_v30 }
0x229e   :  { %5096 = vmatpush3.bf16.msra.mxu0 %v6324_v26  ;;  %4739 = vmatprep.mubr.msk.f32.mxu0 %vm5694_vm0, %v5695_v1 }
0x229f   :  { %5087 = vmatpush3.bf16.msra.mxu1 %v6379_v62  ;;  %5097 = vmatprep.subr.bf16.mxu0 %v5693_v0 }
0x22a0   :  { %5088 = vmatprep.subr.bf16.mxu1 %v5693_v0 }
0x22a2   :  { %5099 = vmatpush3.bf16.msra.mxu0 %v6334_v27 }
0x22a3   :  { %5090 = vmatpush3.bf16.msra.mxu1 %v6389_v3  ;;  %5100 = vmatprep.subr.bf16.mxu0 %v5693_v0 }
0x22a4   :  { %5091 = vmatprep.subr.bf16.mxu1 %v5693_v0 }
0x22a7   :  { %5093 = vmatpush3.bf16.msra.mxu1 %v6400_v6 }
0x22a8   :  { %5112 = vmatprep.subr.bf16.mxu1 %v5693_v0 }
0x236d   :  { %v2914_v31 = vpop.f32.mrb[24].mxu1 }
0x236e   :  { %v2918_v32 = vadd.f32 %v2914_v31, %v6356_v42  ;;  %v4711_v33 = vpop.f32.mrb[25].mxu1 }
0x2370   :  { %5361 = vtanh.f32 %v2918_v32  ;;  %v2818_v15 = vpop.f32.mrb[26].mxu0  ;;  %v4072_v17 = vmul.f32 -1.442695, %v2918_v32 }
0x2371   :  { %v2819_v35 = vadd.f32 %v6428_v11, %v2818_v15  ;;  %v4700_v8 = vpop.f32.mrb[27].mxu0 }
0x2373   :  { %5363 = vtanh.f32 %v2819_v35  ;;  %v4070_v41 = vmul.f32 -1.442695, %v2819_v35 }
0x2374   :  { %5365 = vpow2.f32 %v4072_v17 }
0x2375   :  { %5367 = vpow2.f32 %v4070_v41 }
0x237a   :  { %v5362_v37 = vpop.eup %5361 }
0x237b   :  { %2928 = vrot.lane.b32.xlu0 %v5362_v37, %s5696_s20 }
0x237d   :  { %v5364_v38 = vpop.eup %5363 }
0x237e   :  { %2831 = vrot.lane.b32.xlu1 %v5364_v38, %s5696_s20  ;;  %v5366_v12 = vpop.eup %5365 }
0x237f   :  { %v2922_v44 = vadd.f32 1.0, %v5366_v12  ;;  %v5368_v45 = vpop.eup %5367 }
0x2380   :  { %v2825_v46 = vadd.f32 1.0, %v5368_v45 }
0x2381   :  { %5369 = vrcp.f32 %v2922_v44 }
0x2382   :  { %5371 = vrcp.f32 %v2825_v46 }
0x238b   :  { %v5370_v49 = vpop.eup %5369 }
0x238c   :  { %v5372_v52 = vpop.eup %5371  ;;  %v2926_v55 = vmul.f32 %v5370_v49, %v6476_v19 }
0x238d   :  { %v2829_v58 = vmul.f32 %v5372_v52, %v6480_v21 }
0x23ed   :  { %v2929_v50 = vpop.permute.xlu0 %2928 }
0x23ee   :  { %v2931_v51 = vmul.f32 %v5370_v49, %v2929_v50 }
0x23f0   :  { %2933 = vrot.lane.b32.xlu0 %v2931_v51, %s5696_s20  ;;  %v2832_v53 = vpop.permute.xlu1 %2831 }
0x23f1   :  { %v2834_v54 = vmul.f32 %v5372_v52, %v2832_v53 }
0x23f3   :  { %2836 = vrot.lane.b32.xlu1 %v2834_v54, %s5696_s20 }
0x2462   :  { %v2934_v56 = vpop.permute.xlu0 %2933 }
0x2463   :  { %v6516_v57 = vadd.f32 %v2934_v56, %v2926_v55 }
0x2465   :  { %5373 = vtanh.f32 %v6516_v57  ;;  %v2837_v59 = vpop.permute.xlu1 %2836 }
0x2466   :  { %v6520_v61 = vadd.f32 %v2837_v59, %v2829_v58 }
0x2468   :  { %5375 = vtanh.f32 %v6520_v61 }
0x246f   :  { %v5374_v63 = vpop.eup %5373 }
0x2470   :  { %2939 = vrot.lane.b32.xlu0 %v5374_v63, %s5696_s20 }
0x2472   :  { %v5376_v2 = vpop.eup %5375 }
0x2473   :  { %2842 = vrot.lane.b32.xlu1 %v5376_v2, %s5696_s20 }
0x24e2   :  { %v2940_v4 = vpop.permute.xlu0 %2939 }
0x24e3   :  { %v2942_v22 = vmul.f32 %v5370_v49, %v2940_v4 }
0x24e5   :  { %2944 = vrot.lane.b32.xlu1 %v2942_v22, %s5697_s25  ;;  %v2843_v7 = vpop.permute.xlu1 %2842 }
0x24e6   :  { %v2845_v48 = vmul.f32 %v5372_v52, %v2843_v7 }
0x24e8   :  { %v3863_v9 = vrot.slane %v2845_v48, 4  ;;  %2948 = vrot.lane.b32.xlu0 %v2845_v48, %s5698_s4 }
0x24ea   :  { %v6531_v13 = vsel %vm3876_vm6, %v3875_v10, %v3863_v9 }
0x2557   :  { %v2945_v14 = vpop.permute.xlu1 %2944 }
0x2558   :  { %4740 = vmatmul.mubr.msk.f32.vlgmr.msra.gmra.mrb[28].mxu0 %vm281_vm2, %v2945_v14 }
0x2559   :  { %5102 = vmatpush3.bf16.msra.mxu0 %v6373_v60  ;;  %4758 = vmatprep.mubr.msk.f32.mxu0 %vm5694_vm0, %v5695_v1 }
0x255a   :  { %5103 = vmatprep.subr.bf16.mxu0 %v5693_v0  ;;  %v2949_v16 = vpop.permute.xlu0 %2948 }
0x255b   :  { %v2951_v18 = vsel %vm281_vm2, %v2945_v14, %v2949_v16 }
0x255c   :  { %4729 = vmatmul.mubr.msk.f32.vlgmr.msra.gmra.mrb[26].mxu1 %vm391_vm3, %v2951_v18 }
0x255d   :  { %5105 = vmatpush3.bf16.msra.mxu0 %v6379_v62  ;;  %5114 = vmatpush3.bf16.msra.mxu1 %v6324_v26 }
0x255e   :  { %5106 = vmatprep.subr.bf16.mxu0 %v5693_v0  ;;  %5115 = vmatprep.subr.bf16.mxu1 %v5693_v0 }
0x255f   :  { %4769 = vmatprep.mubr.msk.f32.mxu1 %vm5694_vm0, %v5695_v1 }
0x2561   :  { %5108 = vmatpush3.bf16.msra.mxu0 %v6389_v3  ;;  %5117 = vmatpush3.bf16.msra.mxu1 %v6334_v27 }
0x2562   :  { %5109 = vmatprep.subr.bf16.mxu0 %v5693_v0  ;;  %5118 = vmatprep.subr.bf16.mxu1 %v5693_v0 }
0x2565   :  { %5111 = vmatpush3.bf16.msra.mxu0 %v6400_v6 }
0x2566   :  { %5130 = vmatprep.subr.bf16.mxu0 %v5693_v0 }
0x262b   :  { %v3117_v47 = vpop.f32.mrb[28].mxu0 }
0x262c   :  { %v3121_v19 = vadd.f32 %v3117_v47, %v6356_v42  ;;  %v4741_v20 = vpop.f32.mrb[29].mxu0 }
0x262e   :  { %5377 = vtanh.f32 %v3121_v19  ;;  %v4076_v36 = vmul.f32 -1.442695, %v3121_v19 }
0x262f   :  { %v3021_v34 = vpop.f32.mrb[26].mxu1 }
0x2630   :  { %v3022_v21 = vadd.f32 %v6428_v11, %v3021_v34  ;;  %v4730_v23 = vpop.f32.mrb[27].mxu1 }
0x2632   :  { %5379 = vtanh.f32 %v3022_v21  ;;  %v4074_v39 = vmul.f32 -1.442695, %v3022_v21 }
0x2633   :  { %5381 = vpow2.f32 %v4076_v36 }
0x2634   :  { %5383 = vpow2.f32 %v4074_v39 }
0x2638   :  { %v5378_v24 = vpop.eup %5377 }
0x2639   :  { %3131 = vrot.lane.b32.xlu0 %v5378_v24, %s5696_s20 }
0x263c   :  { %v5380_v25 = vpop.eup %5379 }
0x263d   :  { %3034 = vrot.lane.b32.xlu1 %v5380_v25, %s5696_s20  ;;  %v5382_v43 = vpop.eup %5381 }
0x263e   :  { %v3125_v28 = vadd.f32 1.0, %v5382_v43  ;;  %v5384_v29 = vpop.eup %5383 }
0x263f   :  { %v3028_v30 = vadd.f32 1.0, %v5384_v29 }
0x2640   :  { %5385 = vrcp.f32 %v3125_v28 }
0x2641   :  { %5387 = vrcp.f32 %v3028_v30 }
0x264a   :  { %v5386_v31 = vpop.eup %5385 }
0x264b   :  { %v5388_v15 = vpop.eup %5387  ;;  %v3129_v37 = vmul.f32 %v5386_v31, %v6516_v57 }
0x264c   :  { %v3032_v41 = vmul.f32 %v5388_v15, %v6520_v61 }
0x26ab   :  { %v3132_v32 = vpop.permute.xlu0 %3131 }
0x26ac   :  { %v3134_v33 = vmul.f32 %v5386_v31, %v3132_v32 }
0x26ae   :  { %3136 = vrot.lane.b32.xlu0 %v3134_v33, %s5696_s20 }
0x26af   :  { %v3035_v35 = vpop.permute.xlu1 %3034 }
0x26b0   :  { %v3037_v8 = vmul.f32 %v5388_v15, %v3035_v35 }
0x26b2   :  { %3039 = vrot.lane.b32.xlu1 %v3037_v8, %s5696_s20 }
0x2720   :  { %v3137_v38 = vpop.permute.xlu0 %3136 }
0x2721   :  { %v6559_v17 = vadd.f32 %v3137_v38, %v3129_v37 }
0x2723   :  { %5389 = vtanh.f32 %v6559_v17 }
0x2724   :  { %v3040_v12 = vpop.permute.xlu1 %3039 }
0x2725   :  { %v6563_v44 = vadd.f32 %v3040_v12, %v3032_v41 }
0x2727   :  { %5391 = vtanh.f32 %v6563_v44 }
0x272d   :  { %v5390_v45 = vpop.eup %5389 }
0x272e   :  { %3142 = vrot.lane.b32.xlu0 %v5390_v45, %s5696_s20 }
0x2731   :  { %v5392_v46 = vpop.eup %5391 }
0x2732   :  { %3045 = vrot.lane.b32.xlu1 %v5392_v46, %s5696_s20 }
0x27a0   :  { %v3143_v49 = vpop.permute.xlu0 %3142 }
0x27a1   :  { %v3145_v50 = vmul.f32 %v5386_v31, %v3143_v49 }
0x27a3   :  { %3147 = vrot.lane.b32.xlu1 %v3145_v50, %s5697_s25 }
0x27a4   :  { %v3046_v51 = vpop.permute.xlu1 %3045 }
0x27a5   :  { %v3048_v52 = vmul.f32 %v5388_v15, %v3046_v51 }
0x27a7   :  { %v3865_v53 = vrot.slane %v3048_v52, 2  ;;  %3151 = vrot.lane.b32.xlu0 %v3048_v52, %s5698_s4 }
0x27a9   :  { %v6572_v54 = vsel %vm3878_vm7, %v6531_v13, %v3865_v53 }
0x2815   :  { %v3148_v55 = vpop.permute.xlu1 %3147 }
0x2816   :  { %4770 = vmatmul.mubr.msk.f32.vlgmr.msra.gmra.mrb[28].mxu1 %vm281_vm2, %v3148_v55 }
0x2817   :  { %5120 = vmatpush3.bf16.msra.mxu1 %v6373_v60  ;;  %4788 = vmatprep.mubr.msk.f32.mxu1 %vm5694_vm0, %v5695_v1 }
0x2818   :  { %5121 = vmatprep.subr.bf16.mxu1 %v5693_v0 }
0x2819   :  { %v3152_v56 = vpop.permute.xlu0 %3151 }
0x281a   :  { %v3154_v57 = vsel %vm281_vm2, %v3148_v55, %v3152_v56 }
0x281b   :  { %5123 = vmatpush3.bf16.msra.mxu1 %v6379_v62  ;;  %4759 = vmatmul.mubr.msk.f32.vlgmr.msra.gmra.mrb[30].mxu0 %vm391_vm3, %v3154_v57 }
0x281c   :  { %5124 = vmatprep.subr.bf16.mxu1 %v5693_v0  ;;  %5132 = vmatpush3.bf16.msra.mxu0 %v6324_v26 }
0x281d   :  { %4799 = vmatprep.mubr.msk.f32.mxu0 %vm5694_vm0, %v5695_v1  ;;  %5133 = vmatprep.subr.bf16.mxu0 %v5693_v0 }
0x281f   :  { %5126 = vmatpush3.bf16.msra.mxu1 %v6389_v3 }
0x2820   :  { %5127 = vmatprep.subr.bf16.mxu1 %v5693_v0  ;;  %5135 = vmatpush3.bf16.msra.mxu0 %v6334_v27 }
0x2821   :  { %5136 = vmatprep.subr.bf16.mxu0 %v5693_v0 }
0x2823   :  { %5129 = vmatpush3.bf16.msra.mxu1 %v6400_v6 }
0x2824   :  { %5148 = vmatprep.subr.bf16.mxu1 %v5693_v0 }
0x28e9   :  { %v3320_v58 = vpop.f32.mrb[28].mxu1 }
0x28ea   :  { %v3324_v59 = vadd.f32 %v3320_v58, %v6356_v42  ;;  %v4771_v61 = vpop.f32.mrb[29].mxu1 }
0x28ec   :  { %5393 = vtanh.f32 %v3324_v59  ;;  %v4080_v7 = vmul.f32 -1.442695, %v3324_v59 }
0x28ee   :  { %v3224_v63 = vpop.f32.mrb[30].mxu0 }
0x28ef   :  { %v3225_v2 = vadd.f32 %v6428_v11, %v3224_v63  ;;  %v4760_v4 = vpop.f32.mrb[31].mxu0 }
0x28f1   :  { %5395 = vtanh.f32 %v3225_v2  ;;  %v4078_v48 = vmul.f32 -1.442695, %v3225_v2 }
0x28f2   :  { %5397 = vpow2.f32 %v4080_v7 }
0x28f3   :  { %5399 = vpow2.f32 %v4078_v48 }
0x28f6   :  { %v5394_v22 = vpop.eup %5393 }
0x28f7   :  { %3334 = vrot.lane.b32.xlu0 %v5394_v22, %s5696_s20 }
0x28fb   :  { %v5396_v5 = vpop.eup %5395 }
0x28fc   :  { %3237 = vrot.lane.b32.xlu1 %v5396_v5, %s5696_s20  ;;  %v5398_v9 = vpop.eup %5397 }
0x28fd   :  { %v3328_v10 = vadd.f32 1.0, %v5398_v9  ;;  %v5400_v13 = vpop.eup %5399 }
0x28fe   :  { %v3231_v14 = vadd.f32 1.0, %v5400_v13 }
0x28ff   :  { %5401 = vrcp.f32 %v3328_v10 }
0x2900   :  { %5403 = vrcp.f32 %v3231_v14 }
0x2909   :  { %v5402_v16 = vpop.eup %5401 }
0x290a   :  { %v5404_v19 = vpop.eup %5403  ;;  %v3332_v21 = vmul.f32 %v5402_v16, %v6559_v17 }
0x290b   :  { %v3235_v25 = vmul.f32 %v5404_v19, %v6563_v44 }
0x2969   :  { %v3335_v18 = vpop.permute.xlu0 %3334 }
0x296a   :  { %v3337_v47 = vmul.f32 %v5402_v16, %v3335_v18 }
0x296c   :  { %3339 = vrot.lane.b32.xlu0 %v3337_v47, %s5696_s20 }
0x296e   :  { %v3238_v20 = vpop.permute.xlu1 %3237 }
0x296f   :  { %v3240_v34 = vmul.f32 %v5404_v19, %v3238_v20 }
0x2971   :  { %3242 = vrot.lane.b32.xlu1 %v3240_v34, %s5696_s20 }
0x29de   :  { %v3340_v23 = vpop.permute.xlu0 %3339 }
0x29df   :  { %v6600_v24 = vadd.f32 %v3340_v23, %v3332_v21 }
0x29e1   :  { %5405 = vtanh.f32 %v6600_v24 }
0x29e3   :  { %v3243_v36 = vpop.permute.xlu1 %3242 }
0x29e4   :  { %v6604_v39 = vadd.f32 %v3243_v36, %v3235_v25 }
0x29e6   :  { %5407 = vtanh.f32 %v6604_v39 }
0x29eb   :  { %v5406_v43 = vpop.eup %5405 }
0x29ec   :  { %3345 = vrot.lane.b32.xlu0 %v5406_v43, %s5696_s20 }
0x29f0   :  { %v5408_v28 = vpop.eup %5407 }
0x29f1   :  { %3248 = vrot.lane.b32.xlu1 %v5408_v28, %s5696_s20 }
0x2a5e   :  { %v3346_v29 = vpop.permute.xlu0 %3345 }
0x2a5f   :  { %v3348_v30 = vmul.f32 %v5402_v16, %v3346_v29 }
0x2a61   :  { %3350 = vrot.lane.b32.xlu1 %v3348_v30, %s5697_s25 }
0x2a63   :  { %v3249_v31 = vpop.permute.xlu1 %3248 }
0x2a64   :  { %v6610_v32 = vmul.f32 %v5404_v19, %v3249_v31 }
0x2a66   :  { %3354 = vrot.lane.b32.xlu0 %v6610_v32, %s5698_s4 }
0x2ad3   :  { %v3351_v33 = vpop.permute.xlu1 %3350 }
0x2ad4   :  { %4800 = vmatmul.mubr.msk.f32.vlgmr.msra.gmra.mrb[32].mxu0 %vm281_vm2, %v3351_v33 }
0x2ad5   :  { %5138 = vmatpush3.bf16.msra.mxu0 %v6373_v60  ;;  %4818 = vmatprep.mubr.msk.f32.mxu0 %vm5694_vm0, %v5695_v1 }
0x2ad6   :  { %5139 = vmatprep.subr.bf16.mxu0 %v5693_v0 }
0x2ad8   :  { %v3355_v15 = vpop.permute.xlu0 %3354 }
0x2ad9   :  { %5141 = vmatpush3.bf16.msra.mxu0 %v6379_v62  ;;  %v3357_v35 = vsel %vm281_vm2, %v3351_v33, %v3355_v15 }
0x2ada   :  { %5142 = vmatprep.subr.bf16.mxu0 %v5693_v0  ;;  %4789 = vmatmul.mubr.msk.f32.vlgmr.msra.gmra.mrb[30].mxu1 %vm391_vm3, %v3357_v35 }
0x2adb   :  { %5150 = vmatpush3.bf16.msra.mxu1 %v6324_v26  ;;  %4829 = vmatprep.mubr.msk.f32.mxu1 %vm5694_vm0, %v5695_v1 }
0x2adc   :  { %5151 = vmatprep.subr.bf16.mxu1 %v5693_v0 }
0x2add   :  { %5144 = vmatpush3.bf16.msra.mxu0 %v6389_v3 }
0x2ade   :  { %5145 = vmatprep.subr.bf16.mxu0 %v5693_v0 }
0x2adf   :  { %5153 = vmatpush3.bf16.msra.mxu1 %v6334_v27 }
0x2ae0   :  { %5154 = vmatprep.subr.bf16.mxu1 %v5693_v0 }
0x2ae1   :  { %5147 = vmatpush3.bf16.msra.mxu0 %v6400_v6 }
0x2ba7   :  { %v3523_v8 = vpop.f32.mrb[32].mxu0 }
0x2ba8   :  { %v3527_v37 = vadd.f32 %v3523_v8, %v6356_v42  ;;  %v4801_v38 = vpop.f32.mrb[33].mxu0 }
0x2baa   :  { %5409 = vtanh.f32 %v3527_v37  ;;  %v4084_v27 = vmul.f32 -1.442695, %v3527_v37 }
0x2bad   :  { %v3427_v26 = vpop.f32.mrb[30].mxu1 }
0x2bae   :  { %v3428_v17 = vadd.f32 %v6428_v11, %v3427_v26  ;;  %v4790_v41 = vpop.f32.mrb[31].mxu1 }
0x2bb0   :  { %5411 = vtanh.f32 %v3428_v17  ;;  %v4082_v45 = vmul.f32 -1.442695, %v3428_v17 }
0x2bb1   :  { %5413 = vpow2.f32 %v4084_v27 }
0x2bb2   :  { %5415 = vpow2.f32 %v4082_v45 }
0x2bb4   :  { %v5410_v12 = vpop.eup %5409 }
0x2bb5   :  { %3537 = vrot.lane.b32.xlu0 %v5410_v12, %s5696_s20 }
0x2bba   :  { %v5412_v44 = vpop.eup %5411 }
0x2bbb   :  { %3440 = vrot.lane.b32.xlu1 %v5412_v44, %s5696_s20  ;;  %v5414_v46 = vpop.eup %5413 }
0x2bbc   :  { %v3531_v49 = vadd.f32 1.0, %v5414_v46  ;;  %v5416_v50 = vpop.eup %5415 }
0x2bbd   :  { %v3434_v51 = vadd.f32 1.0, %v5416_v50 }
0x2bbe   :  { %5417 = vrcp.f32 %v3531_v49 }
0x2bbf   :  { %5419 = vrcp.f32 %v3434_v51 }
0x2bc8   :  { %v5418_v52 = vpop.eup %5417 }
0x2bc9   :  { %v5420_v56 = vpop.eup %5419  ;;  %v3535_v59 = vmul.f32 %v5418_v52, %v6600_v24 }
0x2bca   :  { %v3438_v2 = vmul.f32 %v5420_v56, %v6604_v39 }
0x2c27   :  { %v3538_v53 = vpop.permute.xlu0 %3537 }
0x2c28   :  { %v3540_v55 = vmul.f32 %v5418_v52, %v3538_v53 }
0x2c2a   :  { %3542 = vrot.lane.b32.xlu0 %v3540_v55, %s5696_s20 }
0x2c2d   :  { %v3441_v57 = vpop.permute.xlu1 %3440 }
0x2c2e   :  { %v3443_v58 = vmul.f32 %v5420_v56, %v3441_v57 }
0x2c30   :  { %3445 = vrot.lane.b32.xlu1 %v3443_v58, %s5696_s20 }
0x2c9c   :  { %v3543_v61 = vpop.permute.xlu0 %3542 }
0x2c9d   :  { %v3545_v63 = vadd.f32 %v3543_v61, %v3535_v59 }
0x2c9f   :  { %5421 = vtanh.f32 %v3545_v63 }
0x2ca2   :  { %v3446_v4 = vpop.permute.xlu1 %3445 }
0x2ca3   :  { %v3448_v22 = vadd.f32 %v3446_v4, %v3438_v2 }
0x2ca5   :  { %5423 = vtanh.f32 %v3448_v22 }
0x2ca9   :  { %v5422_v5 = vpop.eup %5421 }
0x2caa   :  { %3548 = vrot.lane.b32.xlu0 %v5422_v5, %s5696_s20  ;;  %v3883_v5 = vld [vmem:[%s6749_s15] sm:$0xff] }
0x2caf   :  { %v5424_v7 = vpop.eup %5423 }
0x2cb0   :  { %3451 = vrot.lane.b32.xlu1 %v5424_v7, %s5696_s20  ;;  %v3884_v7 = vld [vmem:[%s6749_s15 + $0x8] sm:$0xff] }
0x2d1c   :  { %v3549_v48 = vpop.permute.xlu0 %3548 }
0x2d1d   :  { %v3551_v9 = vmul.f32 %v5418_v52, %v3549_v48  ;;  %v3886_v48 = vld [vmem:[%s6749_s15 + $0x18] sm:$0xff] }
0x2d1f   :  { %3553 = vrot.lane.b32.xlu1 %v3551_v9, %s5697_s25 }
0x2d22   :  { %v3452_v10 = vpop.permute.xlu1 %3451 }
0x2d23   :  { %v6643_v13 = vmul.f32 %v5420_v56, %v3452_v10 }
0x2d25   :  { %3557 = vrot.lane.b32.xlu0 %v6643_v13, %s5698_s4  ;;  %v3867_v41 = vrot.slane %v6643_v13, 6 }
0x2d27   :  { %v3880_v45 = vsel %vm3874_vm5, %v6610_v32, %v3867_v41 }
0x2d91   :  { %v3554_v14 = vpop.permute.xlu1 %3553 }
0x2d92   :  { %4830 = vmatmul.mubr.msk.f32.vlgmr.msra.gmra.mrb[32].mxu1 %vm281_vm2, %v3554_v14 }
0x2d93   :  { %5156 = vmatpush3.bf16.msra.mxu1 %v6373_v60  ;;  %4848 = vmatprep.mubr.msk.f32.mxu1 %vm5694_vm0, %v5695_v1 }
0x2d94   :  { %5157 = vmatprep.subr.bf16.mxu1 %v5693_v0 }
0x2d97   :  { %5159 = vmatpush3.bf16.msra.mxu1 %v6379_v62  ;;  %v3558_v16 = vpop.permute.xlu0 %3557 }
0x2d98   :  { %5160 = vmatprep.subr.bf16.mxu1 %v5693_v0  ;;  %v3560_v18 = vsel %vm281_vm2, %v3554_v14, %v3558_v16 }
0x2d99   :  { %4819 = vmatmul.mubr.msk.f32.vlgmr.msra.gmra.mrb[34].mxu0 %vm391_vm3, %v3560_v18 }
0x2d9b   :  { %5162 = vmatpush3.bf16.msra.mxu1 %v6389_v3 }
0x2d9c   :  { %5163 = vmatprep.subr.bf16.mxu1 %v5693_v0 }
0x2d9f   :  { %5165 = vmatpush3.bf16.msra.mxu1 %v6400_v6 }
0x2e65   :  { %v3726_v60 = vpop.f32.mrb[32].mxu1 }
0x2e66   :  { %v3730_v1 = vadd.f32 %v3726_v60, %v6356_v42  ;;  %v4831_v47 = vpop.f32.mrb[33].mxu1 }
0x2e68   :  { %5425 = vtanh.f32 %v3730_v1  ;;  %v4088_v3 = vmul.f32 -1.442695, %v3730_v1 }
0x2e6c   :  { %v3630_v19 = vpop.f32.mrb[34].mxu0 }
0x2e6d   :  { %v3631_v62 = vadd.f32 %v6428_v11, %v3630_v19  ;;  %v4820_v20 = vpop.f32.mrb[35].mxu0 }
0x2e6f   :  { %5427 = vtanh.f32 %v3631_v62  ;;  %v4086_v0 = vmul.f32 -1.442695, %v3631_v62 }
0x2e70   :  { %5429 = vpow2.f32 %v4088_v3 }
0x2e71   :  { %5431 = vpow2.f32 %v4086_v0 }
0x2e72   :  { %v5426_v34 = vpop.eup %5425 }
0x2e73   :  { %3740 = vrot.lane.b32.xlu0 %v5426_v34, %s5696_s20 }
0x2e79   :  { %v5428_v21 = vpop.eup %5427 }
0x2e7a   :  { %3643 = vrot.lane.b32.xlu1 %v5428_v21, %s5696_s20  ;;  %v5430_v6 = vpop.eup %5429 }
0x2e7b   :  { %v3734_v23 = vadd.f32 1.0, %v5430_v6  ;;  %v5432_v42 = vpop.eup %5431 }
0x2e7c   :  { %v3637_v24 = vadd.f32 1.0, %v5432_v42 }
0x2e7d   :  { %5433 = vrcp.f32 %v3734_v23 }
0x2e7e   :  { %5435 = vrcp.f32 %v3637_v24 }
0x2e87   :  { %v5434_v25 = vpop.eup %5433 }
0x2e88   :  { %v5436_v43 = vpop.eup %5435  ;;  %v3738_v30 = vmul.f32 %v5434_v25, %v3545_v63 }
0x2e89   :  { %v3641_v15 = vmul.f32 %v5436_v43, %v3448_v22 }
0x2ee5   :  { %v3741_v36 = vpop.permute.xlu0 %3740 }
0x2ee6   :  { %v3743_v39 = vmul.f32 %v5434_v25, %v3741_v36 }
0x2ee8   :  { %3745 = vrot.lane.b32.xlu0 %v3743_v39, %s5696_s20 }
0x2eec   :  { %v3644_v28 = vpop.permute.xlu1 %3643 }
0x2eed   :  { %v3646_v29 = vmul.f32 %v5436_v43, %v3644_v28 }
0x2eef   :  { %3648 = vrot.lane.b32.xlu1 %v3646_v29, %s5696_s20 }
0x2f5a   :  { %v3746_v31 = vpop.permute.xlu0 %3745 }
0x2f5b   :  { %v3748_v33 = vadd.f32 %v3746_v31, %v3738_v30 }
0x2f5d   :  { %5437 = vtanh.f32 %v3748_v33 }
0x2f61   :  { %v3649_v35 = vpop.permute.xlu1 %3648 }
0x2f62   :  { %v3651_v8 = vadd.f32 %v3649_v35, %v3641_v15 }
0x2f64   :  { %5439 = vtanh.f32 %v3651_v8 }
0x2f67   :  { %v5438_v37 = vpop.eup %5437 }
0x2f68   :  { %3751 = vrot.lane.b32.xlu0 %v5438_v37, %s5696_s20 }
0x2f6e   :  { %v5440_v38 = vpop.eup %5439 }
0x2f6f   :  { %3654 = vrot.lane.b32.xlu1 %v5440_v38, %s5696_s20 }
0x2fda   :  { %v3752_v26 = vpop.permute.xlu0 %3751 }
0x2fdb   :  { %v3754_v17 = vmul.f32 %v5434_v25, %v3752_v26 }
0x2fdd   :  { %3756 = vrot.lane.b32.xlu1 %v3754_v17, %s5697_s25 }
0x2fe1   :  { %v3655_v12 = vpop.permute.xlu1 %3654 }
0x2fe2   :  { %v3657_v44 = vmul.f32 %v5436_v43, %v3655_v12 }
0x2fe4   :  { %v3869_v27 = vrot.slane %v3657_v44, 4  ;;  %3760 = vrot.lane.b32.xlu0 %v3657_v44, %s5698_s4 }
0x2fe6   :  { %v3881_v46 = vsel %vm3876_vm6, %v3880_v45, %v3869_v27 }
0x304f   :  { %v3757_v49 = vpop.permute.xlu1 %3756 }
0x3056   :  { %v3761_v50 = vpop.permute.xlu0 %3760 }
0x3057   :  { %v3763_v51 = vsel %vm281_vm2, %v3757_v49, %v3761_v50 }
0x3058   :  { %4849 = vmatmul.mubr.msk.f32.vlgmr.msra.gmra.mrb[34].mxu1 %vm391_vm3, %v3763_v51 }
0x312b   :  { %v3833_v52 = vpop.f32.mrb[34].mxu1 }
0x312c   :  { %v3834_v53 = vadd.f32 %v6428_v11, %v3833_v52  ;;  %v4850_v55 = vpop.f32.mrb[35].mxu1 }
0x312e   :  { %5441 = vtanh.f32 %v3834_v53  ;;  %v4090_v57 = vmul.f32 -1.442695, %v3834_v53 }
0x3130   :  { %5443 = vpow2.f32 %v4090_v57 }
0x3138   :  { %v5442_v56 = vpop.eup %5441 }
0x3139   :  { %3846 = vrot.lane.b32.xlu1 %v5442_v56, %s5696_s20 }
0x313a   :  { %v5444_v58 = vpop.eup %5443 }
0x313b   :  { %v3840_v32 = vadd.f32 1.0, %v5444_v58 }
0x313d   :  { %5445 = vrcp.f32 %v3840_v32 }
0x3147   :  { %v5446_v59 = vpop.eup %5445 }
0x3148   :  { %v3844_v11 = vmul.f32 %v5446_v59, %v3651_v8 }
0x31ab   :  { %v3847_v61 = vpop.permute.xlu1 %3846 }
0x31ac   :  { %v3849_v63 = vmul.f32 %v5446_v59, %v3847_v61 }
0x31ae   :  { %3851 = vrot.lane.b32.xlu0 %v3849_v63, %s5696_s20 }
0x31b2   :  { %3896 = vrot.lane.b32.xlu0 %v6572_v54, %s5697_s25  ;;  %v3885_v54 = vld [vmem:[%s6749_s15 + $0x10] sm:$0xff]  ;;  %s5700_s15 = smov [#allocation16]  }
0x31b3   :  { %v5170_v10 = vpack.c.bf16 %v3886_v48, %v3885_v54  ;;  %s3989_s23 = sshll.u32 %s5700_s15, 4  ;;  %s3990_s23 = int_to_ptr.vmem [resolvable:$true] %s3989_s23 }
0x31b4   :  { %s5625_s3 = scalar_lea.vmem %s3990_s23, 32  ;;  %p5630_p9 = scmp.lt.s32.totalorder %s3990_s23, %s3990_s23 }
0x31b5   :  { %p5626_p8 = scmp.ne.s32.totalorder %s3990_s23, %s5625_s3  ;;  %p5631_p10 = scmp.lt.s32.totalorder %s5625_s3, %s5625_s3 }
0x31b6   :  { %2154 = vrot.lane.b32.xlu0 %v6352_v40, %s5699_s14  ;;  %v5166_v40 = vpack.c.bf16 %v3884_v7, %v3883_v5 }
0x31b7   :  { %p5632_p11 = por %p5631_p10, %p5630_p9 }
0x31b8   :  { %5167 = vmatprep.subr.bf16.mxu0 %v5166_v40 }
0x31b9   :  { %5169 = vmatpush3.bf16.msra.mxu0 %v5166_v40  ;;  %p5633_p12 = pnand %p5632_p11, %p5626_p8 }
0x31ba   :  { %5171 = vmatprep.subr.bf16.mxu0 %v5170_v10 }
0x31bd   :  { %5173 = vmatpush3.bf16.msra.mxu0 %v5170_v10 }
0x3220   :  { %v3852_v2 = vpop.permute.xlu0 %3851 }
0x3221   :  { %v3854_v4 = vadd.f32 %v3852_v2, %v3844_v11 }
0x3223   :  { %5447 = vtanh.f32 %v3854_v4 }
0x3224   :  { %v3897_v22 = vpop.permute.xlu0 %3896 }
0x3225   :  { %4859 = vmatprep.mubr.msk.f32.mxu0 %vm281_vm2, %v3897_v22 }
0x3228   :  { %v2155_v9 = vpop.permute.xlu0 %2154 }
0x3229   :  { %2157 = vst.msk [vmem:[#allocation17] sm:$0x3] %vm2151_vm4, %v2155_v9 }
0x322d   :  { %v5448_v13 = vpop.eup %5447 }
0x322e   :  { %3857 = vrot.lane.b32.xlu1 %v5448_v13, %s5696_s20 }
0x32a0   :  { %v3858_v14 = vpop.permute.xlu1 %3857 }
0x32a1   :  { %v3860_v16 = vmul.f32 %v5446_v59, %v3858_v14 }
0x32a3   :  { %v3872_v18 = vrot.slane %v3860_v16, 2 }
0x32a5   :  { %v3882_v60 = vsel %vm3878_vm7, %v3881_v46, %v3872_v18 }
0x32a6   :  { %3898 = vrot.lane.b32.xlu1 %v3882_v60, %s5697_s25 }
0x3318   :  { %v3899_v1 = vpop.permute.xlu1 %3898 }
0x3319   :  { %4860 = vmatmul.mubr.msk.f32.vlgmr.msra.gmra.mrb[36].mxu0 %vm281_vm2, %v3899_v1 }
0x331a   :  { %5636 = shalt.err (!%p5633_p12)
}
0x331b   :  { %s5637_s25 = scalar_lea.hbm %s6752_s18, 32 }
0x331c   :  { %p5638_p13 = scmp.ne.s32.totalorder %s6752_s18, %s5637_s25  ;;  %p5641_p0 = scmp.lt.u32.totalorder %s5637_s25, %s6752_s18 }
0x331e   :  { %p5643_p1 = pnand %p5641_p0, %p5638_p13 }
0x3320   :  { %5646 = shalt.err (!%p5643_p1)
}
0x3321   :  { %3992 = dma.vmem_to_hbm [thread:$0]  %s3990_s23, 32, %s6752_s18, [#allocation4]  }
0x3322   :  { %s5647_s24 = scalar_lea.vmem %s4000_s28, 32  ;;  %p5652_p3 = scmp.lt.s32.totalorder %s4000_s28, %s4000_s28 }
0x3323   :  { %p5648_p2 = scmp.ne.s32.totalorder %s4000_s28, %s5647_s24  ;;  %p5653_p4 = scmp.lt.s32.totalorder %s5647_s24, %s5647_s24 }
0x3325   :  { %p5654_p5 = por %p5653_p4, %p5652_p3 }
0x3327   :  { %p5655_p6 = pnand %p5654_p5, %p5648_p2 }
0x3329   :  { %5658 = shalt.err (!%p5655_p6)
}
0x332a   :  { %s5659_s21 = scalar_lea.hbm %s6753_s19, 32 }
0x332b   :  { %p5660_p7 = scmp.ne.s32.totalorder %s6753_s19, %s5659_s21  ;;  %p5663_p8 = scmp.lt.u32.totalorder %s5659_s21, %s6753_s19 }
0x332d   :  { %p5665_p9 = pnand %p5663_p8, %p5660_p7 }
0x332f   :  { %5668 = shalt.err (!%p5665_p9)
}
0x3330   :  { %4002 = dma.vmem_to_hbm [thread:$0]  %s4000_s28, 32, %s6753_s19, [#allocation18]   ;;  %v4091_v47 = vld [vmem:[%s6750_s16] ss:$0 sm:$0xff] }
0x33ec   :  { %v4861_v19 = vpop.f32.mrb[36].mxu0 }
0x33ed   :  { %v3976_v62 = vadd.f32 %v4861_v19, %v4091_v47  ;;  %v3970_v20 = vpop.f32.mrb[37].mxu0 }
0x33ee   :  { %v3971_v34 = vadd.f32 %v4091_v47, %v3970_v20 }
0x33ef   :  { %3980 = vst.msk [vmem:[%s6751_s17 + $0x8] sm:$0xff] %vm199_vm1, %v3976_v62 }
0x33f0   :  { %3979 = vst.msk [vmem:[%s6751_s17] sm:$0xff] %vm199_vm1, %v3971_v34 }
0x33f1   :  { %5679 = dma.done.wait [#allocation4], 32  }
0x33f2   :  { %5680 = vsyncadd [#allocation4], 4294967264 }
0x33f3   :  { %5681 = dma.done.wait [#allocation18], 32  }
0x33f4   :  { %5682 = vsyncadd [#allocation18], 4294967264 }
0x33f5   :  { %4011 = vsyncpa [#allocation3], 1 }
0x33f6   :  { %4012 = vsyncpa [#allocation6], 1 }
0x33f7   :  { %4013 = vsyncpa [#allocation9], 1 }
0x33f8   :  { %4014 = vsyncpa [#allocation12], 1 }
0x33f9   :  { %4015 = vsyncpa [#allocation15], 1 }
0x33fa   :  { %4016 = vsyncpa [#allocation4], 1 }
0x33fb   :  { %4017 = vsyncpa [#allocation18], 1 }

</bundles_post_ra>
